<compile_context>
chip_gen: v7x
topology: tpu7x:2x2x1
jax: 0.10.0
libtpu: 0.0.40
codegen_flags: <defaults>
</compile_context>

<pallas_src>
import jax
import jax.numpy as jnp
import numpy as np
from jax.experimental import pallas as pl
from jax.experimental.pallas import tpu as pltpu

# ---------------- configuration (small, consistent with the module) ----------------
B = 2                 # batch
S = 8                 # image-feature sequence length
IN_FEATURES = 32      # input feature dim of image_features
DIM = 64              # cross_attention_dim
NUM_HEADS = 4
HEAD_DIM = DIM // NUM_HEADS
MLP_RATIO = 4.0
MLP_DIM = int(DIM * MLP_RATIO)
NUM_IP_TOKENS = 4     # number of learned latent tokens
DEPTH = 2
EPS = 1e-5

# lane offsets inside the fused per-layer weight slab [k | v | q*scale | out | fc1]
_OFF_KV = 0
_OFF_Q = 2 * DIM
_OFF_OUT = 3 * DIM
_OFF_FC1 = 4 * DIM
_W_BIG_COLS = 4 * DIM + MLP_DIM

# row offsets inside the f32 vector slab
_ROW_PIN_B = 0
_ROW_POUT_B = 1
_ROW_NOUT_W = 2
_ROW_NOUT_B = 3
_ROW_LN0 = 4                      # then 6 rows per layer: n1_w,n1_b,n2_w,n2_b,ffn_w,ffn_b
_ROW_MASK = _ROW_LN0 + 6 * DEPTH  # then B*T rows of neg_x, then B*T rows of neg_l


def _layernorm(x, w, b):
    mu = jnp.mean(x, axis=-1, keepdims=True)
    var = jnp.mean((x - mu) ** 2, axis=-1, keepdims=True)
    return (x - mu) * jax.lax.rsqrt(var + EPS) * w + b


def _gelu_tanh(x):
    # TODO(synk): PyTorch nn.GELU() defaults to the exact erf form; tanh approximation used here.
    c = 0.7978845608028654  # sqrt(2/pi)
    return 0.5 * x * (1.0 + jnp.tanh(c * (x + 0.044715 * x ** 3)))


# ------------------------------- Pallas kernel -------------------------------------
def resampler_kernel(img_ref, lat_ref, w_io_ref, w_big_ref, fc2_ref, vec_ref, o_ref):
    f32 = jnp.float32
    bf16 = jnp.bfloat16
    bs = img_ref.shape[0]          # batch * seq
    bt = lat_ref.shape[0]          # batch * num_ip_tokens

    vec = vec_ref[...]             # (32, DIM) f32: biases, LN params, softmax masks
    pin_b = vec[_ROW_PIN_B:_ROW_PIN_B + 1, :]
    pout_b = vec[_ROW_POUT_B:_ROW_POUT_B + 1, :]
    nout_w = vec[_ROW_NOUT_W:_ROW_NOUT_W + 1, :]
    nout_b = vec[_ROW_NOUT_B:_ROW_NOUT_B + 1, :]
    neg_x = vec[_ROW_MASK:_ROW_MASK + bt, 0:bs]               # additive cross-batch mask
    neg_l = vec[_ROW_MASK + bt:_ROW_MASK + 2 * bt, 0:bt]

    # proj_in : (B*S, IN) @ (IN, DIM) + b     (bf16 MXU operands, f32 accumulate)
    x = jnp.dot(img_ref[...].astype(bf16), w_io_ref[0:IN_FEATURES, :],
                preferred_element_type=f32) + pin_b           # (bs, DIM) f32
    lat = lat_ref[...]                                        # (bt, DIM) f32

    for l in range(DEPTH):                                    # static unrolled depth loop
        r = _ROW_LN0 + 6 * l
        n1_w, n1_b = vec[r:r + 1, :], vec[r + 1:r + 2, :]
        n2_w, n2_b = vec[r + 2:r + 3, :], vec[r + 3:r + 4, :]
        ffn_w, ffn_b = vec[r + 4:r + 5, :], vec[r + 5:r + 6, :]

        # ---------------- PerceiverAttention ----------------
        xi = _layernorm(x, n1_w, n1_b).astype(bf16)           # norm1  (bs, DIM)
        li = _layernorm(lat, n2_w, n2_b).astype(bf16)         # norm2  (bt, DIM)

        # fused projections: ONE matmul per input stream, static lane slices of the result
        kv_x = jnp.dot(xi, w_big_ref[l, :, _OFF_KV:_OFF_KV + 2 * DIM],
                       preferred_element_type=f32)            # (bs, 128) = [k_x | v_x]
        qkv_l = jnp.dot(li, w_big_ref[l, :, _OFF_KV:_OFF_Q + DIM],
                        preferred_element_type=f32)           # (bt, 192) = [k_l | v_l | q*scale]
        k_x, v_x = kv_x[:, 0:DIM], kv_x[:, DIM:2 * DIM]
        k_l, v_l = qkv_l[:, 0:DIM], qkv_l[:, DIM:2 * DIM]
        q = qkv_l[:, 2 * DIM:3 * DIM]                         # 1/sqrt(head_dim) already folded in

        # per-head attention via static 16-lane slices (no 4-D transposes / relayouts).
        # Softmax over the concatenated key set [image_features | latents] is computed
        # block-wise with a shared max / shared denominator -> mathematically identical.
        head_out = []
        for h in range(NUM_HEADS):
            lo = h * HEAD_DIM
            hi = lo + HEAD_DIM
            qh = q[:, lo:hi].astype(bf16)                     # (bt, Hd)
            kxh = k_x[:, lo:hi].astype(bf16)                  # (bs, Hd)
            vxh = v_x[:, lo:hi].astype(bf16)
            klh = k_l[:, lo:hi].astype(bf16)                  # (bt, Hd)
            vlh = v_l[:, lo:hi].astype(bf16)

            s_x = jax.lax.dot_general(qh, kxh, (((1,), (1,)), ((), ())),
                                      preferred_element_type=f32) + neg_x   # (bt, bs)
            s_l = jax.lax.dot_general(qh, klh, (((1,), (1,)), ((), ())),
                                      preferred_element_type=f32) + neg_l   # (bt, bt)
            m = jnp.maximum(jnp.max(s_x, axis=-1, keepdims=True),
                            jnp.max(s_l, axis=-1, keepdims=True))
            e_x = jnp.exp(s_x - m)
            e_l = jnp.exp(s_l - m)
            denom = (jnp.sum(e_x, axis=-1, keepdims=True)
                     + jnp.sum(e_l, axis=-1, keepdims=True))
            oh = (jnp.dot(e_x.astype(bf16), vxh, preferred_element_type=f32)
                  + jnp.dot(e_l.astype(bf16), vlh, preferred_element_type=f32))
            head_out.append(oh * pl.reciprocal(denom, approx=True))
        attn = jnp.concatenate(head_out, axis=-1)             # (bt, DIM) f32

        attn = jnp.dot(attn.astype(bf16), w_big_ref[l, :, _OFF_OUT:_OFF_OUT + DIM],
                       preferred_element_type=f32)            # to_out
        lat = lat + attn                                      # residual

        # ---------------- feed forward ----------------
        y = _layernorm(lat, ffn_w, ffn_b).astype(bf16)
        y = jnp.dot(y, w_big_ref[l, :, _OFF_FC1:_OFF_FC1 + MLP_DIM],
                    preferred_element_type=f32)               # (bt, MLP_DIM) f32
        y = _gelu_tanh(y).astype(bf16)
        y = jnp.dot(y, fc2_ref[l], preferred_element_type=f32)
        lat = lat + y                                         # residual

    # proj_out + norm_out
    lat = jnp.dot(lat.astype(bf16), w_io_ref[IN_FEATURES:IN_FEATURES + DIM, :],
                  preferred_element_type=f32) + pout_b
    o_ref[...] = _layernorm(lat, nout_w, nout_b)


# ------------------------ one-time parameter preparation -----------------------------
def prepare_params(params, batch, seq):
    """Fuse / pack / bf16-cast the PyTorch-layout weights into lane-dense slabs (one time)."""
    assert batch * seq <= DIM and batch * NUM_IP_TOKENS <= DIM
    scale = 1.0 / (HEAD_DIM ** 0.5)
    # per-layer K=DIM weights: [k | v | q*scale | out | fc1]  ->  (DEPTH, DIM, 512)
    w_big = jnp.concatenate(
        [params["kv_w"], params["q_w"] * scale, params["out_w"], params["fc1_w"]], axis=-1)
    assert w_big.shape == (DEPTH, DIM, _W_BIG_COLS)
    # proj_in / proj_out stacked on rows -> (IN+DIM, DIM)
    w_io = jnp.concatenate([params["pin_w"], params["pout_w"]], axis=0)

    rows = [params["pin_b"].reshape(1, DIM),
            params["pout_b"].reshape(1, DIM),
            params["nout_w"].reshape(1, DIM),
            params["nout_b"].reshape(1, DIM)]
    for l in range(DEPTH):
        for name in ("n1_w", "n1_b", "n2_w", "n2_b", "ffn_w", "ffn_b"):
            rows.append(params[name][l].reshape(1, DIM))
    ln_rows = jnp.concatenate(rows, axis=0).astype(jnp.float32)   # (4 + 6*DEPTH, DIM)

    # additive masks removing cross-batch attention in the folded-row formulation
    qb = np.arange(batch * NUM_IP_TOKENS) // NUM_IP_TOKENS
    kb = np.arange(batch * seq) // seq
    neg_x = np.where(qb[:, None] == kb[None, :], 0.0, -1e30).astype(np.float32)
    neg_l = np.where(qb[:, None] == qb[None, :], 0.0, -1e30).astype(np.float32)
    pad_x = np.zeros((batch * NUM_IP_TOKENS, DIM), np.float32)
    pad_x[:, :batch * seq] = neg_x
    pad_l = np.zeros((batch * NUM_IP_TOKENS, DIM), np.float32)
    pad_l[:, :batch * NUM_IP_TOKENS] = neg_l
    vec = jnp.concatenate([ln_rows, jnp.asarray(pad_x), jnp.asarray(pad_l)], axis=0)

    return {"w_io": w_io.astype(jnp.bfloat16),
            "w_big": w_big.astype(jnp.bfloat16),
            "fc2": params["fc2_w"].astype(jnp.bfloat16),
            "vec": vec}


# ------------------------------- wrapper --------------------------------------------
def resampler_forward(image_features, latents, prep):
    b, s, fin = image_features.shape
    t = NUM_IP_TOKENS
    # fold batch into the row dim -> single grid step, bigger-M matmuls
    img2d = image_features.reshape(b * s, fin)
    lat2d = jnp.broadcast_to(latents, (b, t, DIM)).reshape(b * t, DIM).astype(jnp.float32)

    inputs = (img2d, lat2d, prep["w_io"], prep["w_big"], prep["fc2"], prep["vec"])

    def full_spec(a):
        nd = a.ndim
        return pl.BlockSpec(a.shape, lambda i, _nd=nd: (0,) * _nd)

    out2d = pl.pallas_call(
        resampler_kernel,
        out_shape=jax.ShapeDtypeStruct((b * t, DIM), jnp.float32),
        grid=(1,),
        in_specs=[full_spec(a) for a in inputs],
        out_specs=pl.BlockSpec((b * t, DIM), lambda i: (0, 0)),
        compiler_params=pltpu.CompilerParams(dimension_semantics=("arbitrary",)),
    )(*inputs)
    return out2d.reshape(b, t, DIM)


# --------------------------- pure-JAX reference --------------------------------------
def resampler_reference(image_features, latents, p):
    x = image_features @ p["pin_w"] + p["pin_b"]
    lat = jnp.broadcast_to(latents, (image_features.shape[0], NUM_IP_TOKENS, DIM))
    scale = 1.0 / (HEAD_DIM ** 0.5)
    for l in range(DEPTH):
        xi = _layernorm(x, p["n1_w"][l], p["n1_b"][l])
        li = _layernorm(lat, p["n2_w"][l], p["n2_b"][l])
        q = li @ p["q_w"][l]
        kv_in = jnp.concatenate([xi, li], axis=1)
        kv = kv_in @ p["kv_w"][l]
        k, v = kv[..., :DIM], kv[..., DIM:]

        def split(tt):
            bsz, sl, _ = tt.shape
            return tt.reshape(bsz, sl, NUM_HEADS, HEAD_DIM).transpose(0, 2, 1, 3)

        qh, kh, vh = split(q), split(k), split(v)
        sc = jnp.einsum('bhqd,bhkd->bhqk', qh, kh) * scale
        pr = jax.nn.softmax(sc, axis=-1)
        at = jnp.einsum('bhqk,bhkd->bhqd', pr, vh)
        at = at.transpose(0, 2, 1, 3).reshape(lat.shape[0], NUM_IP_TOKENS, DIM)
        lat = lat + at @ p["out_w"][l]

        y = _layernorm(lat, p["ffn_w"][l], p["ffn_b"][l])
        y = _gelu_tanh(y @ p["fc1_w"][l]) @ p["fc2_w"][l]
        lat = lat + y
    lat = lat @ p["pout_w"] + p["pout_b"]
    return _layernorm(lat, p["nout_w"], p["nout_b"])


# --------------------------------- main ----------------------------------------------
if __name__ == "__main__":
    key = jax.random.PRNGKey(0)
    ks = jax.random.split(key, 10)

    image_features = jax.random.normal(ks[0], (B, S, IN_FEATURES), jnp.float32)
    latents = jax.random.normal(ks[1], (1, NUM_IP_TOKENS, DIM), jnp.float32) / (DIM ** 0.5)

    params = {
        # projections (weights stored (in, out); biases as (1, out))
        "pin_w": 0.02 * jax.random.normal(ks[2], (IN_FEATURES, DIM), jnp.float32),
        "pin_b": jnp.zeros((1, DIM), jnp.float32),
        "pout_w": 0.02 * jax.random.normal(ks[3], (DIM, DIM), jnp.float32),
        "pout_b": jnp.zeros((1, DIM), jnp.float32),
        "nout_w": jnp.ones((1, DIM), jnp.float32),
        "nout_b": jnp.zeros((1, DIM), jnp.float32),
        # per-layer (stacked along depth)
        "n1_w": jnp.ones((DEPTH, DIM), jnp.float32),
        "n1_b": jnp.zeros((DEPTH, DIM), jnp.float32),
        "n2_w": jnp.ones((DEPTH, DIM), jnp.float32),
        "n2_b": jnp.zeros((DEPTH, DIM), jnp.float32),
        "q_w": 0.02 * jax.random.normal(ks[4], (DEPTH, DIM, DIM), jnp.float32),
        "kv_w": 0.02 * jax.random.normal(ks[5], (DEPTH, DIM, 2 * DIM), jnp.float32),
        "out_w": 0.02 * jax.random.normal(ks[6], (DEPTH, DIM, DIM), jnp.float32),
        "ffn_w": jnp.ones((DEPTH, DIM), jnp.float32),
        "ffn_b": jnp.zeros((DEPTH, DIM), jnp.float32),
        "fc1_w": 0.02 * jax.random.normal(ks[7], (DEPTH, DIM, MLP_DIM), jnp.float32),
        "fc2_w": 0.02 * jax.random.normal(ks[8], (DEPTH, MLP_DIM, DIM), jnp.float32),
    }

    prep = prepare_params(params, B, S)          # one-time fuse / pack / bf16 cast
    fwd = jax.jit(resampler_forward)

    out = jax.block_until_ready(fwd(image_features, latents, prep))

    ref = resampler_reference(image_features, latents, params)
    # bf16 MXU operands (f32 accumulate) vs f32 reference -> slightly looser tolerance
    np.testing.assert_allclose(np.asarray(out), np.asarray(ref), atol=2e-2, rtol=2e-2)

    assert out.shape == (B, NUM_IP_TOKENS, DIM)
    print("KERNEL_OK")
</pallas_src>

<mosaic_0001>
module attributes {stable_mosaic.version = 11 : i64} {
  func.func @resampler_kernel(%arg0: i32, %arg1: memref<16x32xf32, #tpu.memory_space<vmem>>, %arg2: memref<8x64xf32, #tpu.memory_space<vmem>>, %arg3: memref<96x64xbf16, #tpu.memory_space<vmem>>, %arg4: memref<2x64x512xbf16, #tpu.memory_space<vmem>>, %arg5: memref<2x256x64xbf16, #tpu.memory_space<vmem>>, %arg6: memref<32x64xf32, #tpu.memory_space<vmem>>, %arg7: memref<8x64xf32, #tpu.memory_space<vmem>>) attributes {dimension_semantics = [#tpu.dimension_semantics<arbitrary>], iteration_bounds = array<i64: 1>, scalar_prefetch = 0 : i64, scratch_operands = 0 : i64, tpu.core_type = #tpu.core_type<tc>, window_params = [{pipeline_mode = #tpu.pipeline_mode<synchronous>, transform_indices = @transform_0, window_bounds = array<i64: 16, 32>}, {pipeline_mode = #tpu.pipeline_mode<synchronous>, transform_indices = @transform_1, window_bounds = array<i64: 8, 64>}, {pipeline_mode = #tpu.pipeline_mode<synchronous>, transform_indices = @transform_2, window_bounds = array<i64: 96, 64>}, {pipeline_mode = #tpu.pipeline_mode<synchronous>, transform_indices = @transform_3, window_bounds = array<i64: 2, 64, 512>}, {pipeline_mode = #tpu.pipeline_mode<synchronous>, transform_indices = @transform_4, window_bounds = array<i64: 2, 256, 64>}, {pipeline_mode = #tpu.pipeline_mode<synchronous>, transform_indices = @transform_5, window_bounds = array<i64: 32, 64>}, {pipeline_mode = #tpu.pipeline_mode<synchronous>, transform_indices = @transform_6, window_bounds = array<i64: 8, 64>}]} {
    %c0 = arith.constant 0 : index
    %c0_0 = arith.constant 0 : index
    %0 = vector.load %arg6[%c0, %c0_0] : memref<32x64xf32, #tpu.memory_space<vmem>>, vector<32x64xf32>
    %1 = vector.extract_strided_slice %0 {offsets = [0, 0], sizes = [1, 64], strides = [1, 1]} : vector<32x64xf32> to vector<1x64xf32>
    %2 = vector.extract_strided_slice %0 {offsets = [1, 0], sizes = [1, 64], strides = [1, 1]} : vector<32x64xf32> to vector<1x64xf32>
    %3 = vector.extract_strided_slice %0 {offsets = [2, 0], sizes = [1, 64], strides = [1, 1]} : vector<32x64xf32> to vector<1x64xf32>
    %4 = vector.extract_strided_slice %0 {offsets = [3, 0], sizes = [1, 64], strides = [1, 1]} : vector<32x64xf32> to vector<1x64xf32>
    %5 = vector.extract_strided_slice %0 {offsets = [16, 0], sizes = [8, 16], strides = [1, 1]} : vector<32x64xf32> to vector<8x16xf32>
    %6 = vector.extract_strided_slice %0 {offsets = [24, 0], sizes = [8, 8], strides = [1, 1]} : vector<32x64xf32> to vector<8x8xf32>
    %c0_1 = arith.constant 0 : index
    %c0_2 = arith.constant 0 : index
    %7 = vector.load %arg1[%c0_1, %c0_2] : memref<16x32xf32, #tpu.memory_space<vmem>>, vector<16x32xf32>
    %8 = arith.truncf %7 : vector<16x32xf32> to vector<16x32xbf16>
    %c0_3 = arith.constant 0 : index
    %c0_4 = arith.constant 0 : index
    %9 = vector.load %arg3[%c0_3, %c0_4] : memref<96x64xbf16, #tpu.memory_space<vmem>>, vector<32x64xbf16>
    %cst = arith.constant dense<0.000000e+00> : vector<16x64xf32>
    %10 = tpu.matmul %8, %9, %cst {dimension_numbers = #tpu.dot_dimension_numbers<[1], [0], [0], [1], [0, 0, 1, 1], [], []>} : vector<16x32xbf16>, vector<32x64xbf16>, vector<16x64xf32> -> vector<16x64xf32>
    %11 = vector.broadcast %1 : vector<1x64xf32> to vector<16x64xf32>
    %12 = arith.addf %10, %11 : vector<16x64xf32>
    %c0_5 = arith.constant 0 : index
    %c0_6 = arith.constant 0 : index
    %13 = vector.load %arg2[%c0_5, %c0_6] : memref<8x64xf32, #tpu.memory_space<vmem>>, vector<8x64xf32>
    %14 = vector.extract_strided_slice %0 {offsets = [4, 0], sizes = [1, 64], strides = [1, 1]} : vector<32x64xf32> to vector<1x64xf32>
    %15 = vector.extract_strided_slice %0 {offsets = [5, 0], sizes = [1, 64], strides = [1, 1]} : vector<32x64xf32> to vector<1x64xf32>
    %16 = vector.extract_strided_slice %0 {offsets = [6, 0], sizes = [1, 64], strides = [1, 1]} : vector<32x64xf32> to vector<1x64xf32>
    %17 = vector.extract_strided_slice %0 {offsets = [7, 0], sizes = [1, 64], strides = [1, 1]} : vector<32x64xf32> to vector<1x64xf32>
    %18 = vector.extract_strided_slice %0 {offsets = [8, 0], sizes = [1, 64], strides = [1, 1]} : vector<32x64xf32> to vector<1x64xf32>
    %19 = vector.extract_strided_slice %0 {offsets = [9, 0], sizes = [1, 64], strides = [1, 1]} : vector<32x64xf32> to vector<1x64xf32>
    %cst_7 = arith.constant dense<0.000000e+00> : vector<16xf32>
    %20 = vector.multi_reduction <add>, %12, %cst_7 [1] : vector<16x64xf32> to vector<16xf32>
    %21 = vector.shape_cast %20 : vector<16xf32> to vector<16x1xf32>
    %cst_8 = arith.constant 6.400000e+01 : f32
    %22 = vector.broadcast %cst_8 : f32 to vector<16x1xf32>
    %23 = arith.divf %21, %22 : vector<16x1xf32>
    %24 = vector.broadcast %23 : vector<16x1xf32> to vector<16x64xf32>
    %25 = arith.subf %12, %24 : vector<16x64xf32>
    %26 = arith.mulf %25, %25 : vector<16x64xf32>
    %cst_9 = arith.constant dense<0.000000e+00> : vector<16xf32>
    %27 = vector.multi_reduction <add>, %26, %cst_9 [1] : vector<16x64xf32> to vector<16xf32>
    %28 = vector.shape_cast %27 : vector<16xf32> to vector<16x1xf32>
    %cst_10 = arith.constant 6.400000e+01 : f32
    %29 = vector.broadcast %cst_10 : f32 to vector<16x1xf32>
    %30 = arith.divf %28, %29 : vector<16x1xf32>
    %31 = vector.broadcast %23 : vector<16x1xf32> to vector<16x64xf32>
    %32 = arith.subf %12, %31 : vector<16x64xf32>
    %cst_11 = arith.constant 9.99999974E-6 : f32
    %33 = vector.broadcast %cst_11 : f32 to vector<16x1xf32>
    %34 = arith.addf %30, %33 : vector<16x1xf32>
    %35 = math.rsqrt %34 : vector<16x1xf32>
    %36 = vector.broadcast %35 : vector<16x1xf32> to vector<16x64xf32>
    %37 = arith.mulf %32, %36 : vector<16x64xf32>
    %38 = vector.broadcast %14 : vector<1x64xf32> to vector<16x64xf32>
    %39 = arith.mulf %37, %38 : vector<16x64xf32>
    %40 = vector.broadcast %15 : vector<1x64xf32> to vector<16x64xf32>
    %41 = arith.addf %39, %40 : vector<16x64xf32>
    %42 = arith.truncf %41 : vector<16x64xf32> to vector<16x64xbf16>
    %cst_12 = arith.constant dense<0.000000e+00> : vector<8xf32>
    %43 = vector.multi_reduction <add>, %13, %cst_12 [1] : vector<8x64xf32> to vector<8xf32>
    %44 = vector.shape_cast %43 : vector<8xf32> to vector<8x1xf32>
    %cst_13 = arith.constant 6.400000e+01 : f32
    %45 = vector.broadcast %cst_13 : f32 to vector<8x1xf32>
    %46 = arith.divf %44, %45 : vector<8x1xf32>
    %47 = vector.broadcast %46 : vector<8x1xf32> to vector<8x64xf32>
    %48 = arith.subf %13, %47 : vector<8x64xf32>
    %49 = arith.mulf %48, %48 : vector<8x64xf32>
    %cst_14 = arith.constant dense<0.000000e+00> : vector<8xf32>
    %50 = vector.multi_reduction <add>, %49, %cst_14 [1] : vector<8x64xf32> to vector<8xf32>
    %51 = vector.shape_cast %50 : vector<8xf32> to vector<8x1xf32>
    %cst_15 = arith.constant 6.400000e+01 : f32
    %52 = vector.broadcast %cst_15 : f32 to vector<8x1xf32>
    %53 = arith.divf %51, %52 : vector<8x1xf32>
    %54 = vector.broadcast %46 : vector<8x1xf32> to vector<8x64xf32>
    %55 = arith.subf %13, %54 : vector<8x64xf32>
    %cst_16 = arith.constant 9.99999974E-6 : f32
    %56 = vector.broadcast %cst_16 : f32 to vector<8x1xf32>
    %57 = arith.addf %53, %56 : vector<8x1xf32>
    %58 = math.rsqrt %57 : vector<8x1xf32>
    %59 = vector.broadcast %58 : vector<8x1xf32> to vector<8x64xf32>
    %60 = arith.mulf %55, %59 : vector<8x64xf32>
    %61 = vector.broadcast %16 : vector<1x64xf32> to vector<8x64xf32>
    %62 = arith.mulf %60, %61 : vector<8x64xf32>
    %63 = vector.broadcast %17 : vector<1x64xf32> to vector<8x64xf32>
    %64 = arith.addf %62, %63 : vector<8x64xf32>
    %65 = arith.truncf %64 : vector<8x64xf32> to vector<8x64xbf16>
    %c0_17 = arith.constant 0 : index
    %c0_18 = arith.constant 0 : index
    %c0_19 = arith.constant 0 : index
    %66 = vector.load %arg4[%c0_17, %c0_18, %c0_19] : memref<2x64x512xbf16, #tpu.memory_space<vmem>>, vector<1x64x128xbf16>
    %67 = vector.shape_cast %66 : vector<1x64x128xbf16> to vector<64x128xbf16>
    %cst_20 = arith.constant dense<0.000000e+00> : vector<16x128xf32>
    %68 = tpu.matmul %42, %67, %cst_20 {dimension_numbers = #tpu.dot_dimension_numbers<[1], [0], [0], [1], [0, 0, 1, 1], [], []>} : vector<16x64xbf16>, vector<64x128xbf16>, vector<16x128xf32> -> vector<16x128xf32>
    %c0_21 = arith.constant 0 : index
    %c0_22 = arith.constant 0 : index
    %c0_23 = arith.constant 0 : index
    %69 = vector.load %arg4[%c0_21, %c0_22, %c0_23] : memref<2x64x512xbf16, #tpu.memory_space<vmem>>, vector<1x64x192xbf16>
    %70 = vector.shape_cast %69 : vector<1x64x192xbf16> to vector<64x192xbf16>
    %cst_24 = arith.constant dense<0.000000e+00> : vector<8x192xf32>
    %71 = tpu.matmul %65, %70, %cst_24 {dimension_numbers = #tpu.dot_dimension_numbers<[1], [0], [0], [1], [0, 0, 1, 1], [], []>} : vector<8x64xbf16>, vector<64x192xbf16>, vector<8x192xf32> -> vector<8x192xf32>
    %72 = vector.extract_strided_slice %68 {offsets = [0, 0], sizes = [16, 64], strides = [1, 1]} : vector<16x128xf32> to vector<16x64xf32>
    %73 = vector.extract_strided_slice %68 {offsets = [0, 64], sizes = [16, 64], strides = [1, 1]} : vector<16x128xf32> to vector<16x64xf32>
    %74 = vector.extract_strided_slice %71 {offsets = [0, 0], sizes = [8, 64], strides = [1, 1]} : vector<8x192xf32> to vector<8x64xf32>
    %75 = vector.extract_strided_slice %71 {offsets = [0, 64], sizes = [8, 64], strides = [1, 1]} : vector<8x192xf32> to vector<8x64xf32>
    %76 = vector.extract_strided_slice %71 {offsets = [0, 128], sizes = [8, 64], strides = [1, 1]} : vector<8x192xf32> to vector<8x64xf32>
    %77 = vector.extract_strided_slice %76 {offsets = [0, 0], sizes = [8, 16], strides = [1, 1]} : vector<8x64xf32> to vector<8x16xf32>
    %78 = arith.truncf %77 : vector<8x16xf32> to vector<8x16xbf16>
    %79 = vector.extract_strided_slice %72 {offsets = [0, 0], sizes = [16, 16], strides = [1, 1]} : vector<16x64xf32> to vector<16x16xf32>
    %80 = arith.truncf %79 : vector<16x16xf32> to vector<16x16xbf16>
    %81 = vector.extract_strided_slice %73 {offsets = [0, 0], sizes = [16, 16], strides = [1, 1]} : vector<16x64xf32> to vector<16x16xf32>
    %82 = arith.truncf %81 : vector<16x16xf32> to vector<16x16xbf16>
    %83 = vector.extract_strided_slice %74 {offsets = [0, 0], sizes = [8, 16], strides = [1, 1]} : vector<8x64xf32> to vector<8x16xf32>
    %84 = arith.truncf %83 : vector<8x16xf32> to vector<8x16xbf16>
    %85 = vector.extract_strided_slice %75 {offsets = [0, 0], sizes = [8, 16], strides = [1, 1]} : vector<8x64xf32> to vector<8x16xf32>
    %86 = arith.truncf %85 : vector<8x16xf32> to vector<8x16xbf16>
    %cst_25 = arith.constant dense<0.000000e+00> : vector<8x16xf32>
    %87 = tpu.matmul %78, %80, %cst_25 {dimension_numbers = #tpu.dot_dimension_numbers<[1], [1], [0], [0], [0, 0, 1, 0], [], []>} : vector<8x16xbf16>, vector<16x16xbf16>, vector<8x16xf32> -> vector<8x16xf32>
    %88 = arith.addf %87, %5 : vector<8x16xf32>
    %cst_26 = arith.constant dense<0.000000e+00> : vector<8x8xf32>
    %89 = tpu.matmul %78, %84, %cst_26 {dimension_numbers = #tpu.dot_dimension_numbers<[1], [1], [0], [0], [0, 0, 1, 0], [], []>} : vector<8x16xbf16>, vector<8x16xbf16>, vector<8x8xf32> -> vector<8x8xf32>
    %90 = arith.addf %89, %6 : vector<8x8xf32>
    %cst_27 = arith.constant dense<0xFF800000> : vector<8xf32>
    %91 = vector.multi_reduction <maximumf>, %88, %cst_27 [1] : vector<8x16xf32> to vector<8xf32>
    %92 = vector.shape_cast %91 : vector<8xf32> to vector<8x1xf32>
    %cst_28 = arith.constant dense<0xFF800000> : vector<8xf32>
    %93 = vector.multi_reduction <maximumf>, %90, %cst_28 [1] : vector<8x8xf32> to vector<8xf32>
    %94 = vector.shape_cast %93 : vector<8xf32> to vector<8x1xf32>
    %95 = arith.maximumf %92, %94 : vector<8x1xf32>
    %96 = vector.broadcast %95 : vector<8x1xf32> to vector<8x16xf32>
    %97 = arith.subf %88, %96 : vector<8x16xf32>
    %98 = math.exp %97 : vector<8x16xf32>
    %99 = vector.broadcast %95 : vector<8x1xf32> to vector<8x8xf32>
    %100 = arith.subf %90, %99 : vector<8x8xf32>
    %101 = math.exp %100 : vector<8x8xf32>
    %cst_29 = arith.constant dense<0.000000e+00> : vector<8xf32>
    %102 = vector.multi_reduction <add>, %98, %cst_29 [1] : vector<8x16xf32> to vector<8xf32>
    %103 = vector.shape_cast %102 : vector<8xf32> to vector<8x1xf32>
    %cst_30 = arith.constant dense<0.000000e+00> : vector<8xf32>
    %104 = vector.multi_reduction <add>, %101, %cst_30 [1] : vector<8x8xf32> to vector<8xf32>
    %105 = vector.shape_cast %104 : vector<8xf32> to vector<8x1xf32>
    %106 = arith.addf %103, %105 : vector<8x1xf32>
    %107 = arith.truncf %98 : vector<8x16xf32> to vector<8x16xbf16>
    %cst_31 = arith.constant dense<0.000000e+00> : vector<8x16xf32>
    %108 = tpu.matmul %107, %82, %cst_31 {dimension_numbers = #tpu.dot_dimension_numbers<[1], [0], [0], [1], [0, 0, 1, 1], [], []>} : vector<8x16xbf16>, vector<16x16xbf16>, vector<8x16xf32> -> vector<8x16xf32>
    %109 = arith.truncf %101 : vector<8x8xf32> to vector<8x8xbf16>
    %cst_32 = arith.constant dense<0.000000e+00> : vector<8x16xf32>
    %110 = tpu.matmul %109, %86, %cst_32 {dimension_numbers = #tpu.dot_dimension_numbers<[1], [0], [0], [1], [0, 0, 1, 1], [], []>} : vector<8x8xbf16>, vector<8x16xbf16>, vector<8x16xf32> -> vector<8x16xf32>
    %111 = arith.addf %108, %110 : vector<8x16xf32>
    %112 = tpu.reciprocal %106 {approx = true} : vector<8x1xf32> -> vector<8x1xf32>
    %113 = vector.broadcast %112 : vector<8x1xf32> to vector<8x16xf32>
    %114 = arith.mulf %111, %113 : vector<8x16xf32>
    %115 = vector.extract_strided_slice %76 {offsets = [0, 16], sizes = [8, 16], strides = [1, 1]} : vector<8x64xf32> to vector<8x16xf32>
    %116 = arith.truncf %115 : vector<8x16xf32> to vector<8x16xbf16>
    %117 = vector.extract_strided_slice %72 {offsets = [0, 16], sizes = [16, 16], strides = [1, 1]} : vector<16x64xf32> to vector<16x16xf32>
    %118 = arith.truncf %117 : vector<16x16xf32> to vector<16x16xbf16>
    %119 = vector.extract_strided_slice %73 {offsets = [0, 16], sizes = [16, 16], strides = [1, 1]} : vector<16x64xf32> to vector<16x16xf32>
    %120 = arith.truncf %119 : vector<16x16xf32> to vector<16x16xbf16>
    %121 = vector.extract_strided_slice %74 {offsets = [0, 16], sizes = [8, 16], strides = [1, 1]} : vector<8x64xf32> to vector<8x16xf32>
    %122 = arith.truncf %121 : vector<8x16xf32> to vector<8x16xbf16>
    %123 = vector.extract_strided_slice %75 {offsets = [0, 16], sizes = [8, 16], strides = [1, 1]} : vector<8x64xf32> to vector<8x16xf32>
    %124 = arith.truncf %123 : vector<8x16xf32> to vector<8x16xbf16>
    %cst_33 = arith.constant dense<0.000000e+00> : vector<8x16xf32>
    %125 = tpu.matmul %116, %118, %cst_33 {dimension_numbers = #tpu.dot_dimension_numbers<[1], [1], [0], [0], [0, 0, 1, 0], [], []>} : vector<8x16xbf16>, vector<16x16xbf16>, vector<8x16xf32> -> vector<8x16xf32>
    %126 = arith.addf %125, %5 : vector<8x16xf32>
    %cst_34 = arith.constant dense<0.000000e+00> : vector<8x8xf32>
    %127 = tpu.matmul %116, %122, %cst_34 {dimension_numbers = #tpu.dot_dimension_numbers<[1], [1], [0], [0], [0, 0, 1, 0], [], []>} : vector<8x16xbf16>, vector<8x16xbf16>, vector<8x8xf32> -> vector<8x8xf32>
    %128 = arith.addf %127, %6 : vector<8x8xf32>
    %cst_35 = arith.constant dense<0xFF800000> : vector<8xf32>
    %129 = vector.multi_reduction <maximumf>, %126, %cst_35 [1] : vector<8x16xf32> to vector<8xf32>
    %130 = vector.shape_cast %129 : vector<8xf32> to vector<8x1xf32>
    %cst_36 = arith.constant dense<0xFF800000> : vector<8xf32>
    %131 = vector.multi_reduction <maximumf>, %128, %cst_36 [1] : vector<8x8xf32> to vector<8xf32>
    %132 = vector.shape_cast %131 : vector<8xf32> to vector<8x1xf32>
    %133 = arith.maximumf %130, %132 : vector<8x1xf32>
    %134 = vector.broadcast %133 : vector<8x1xf32> to vector<8x16xf32>
    %135 = arith.subf %126, %134 : vector<8x16xf32>
    %136 = math.exp %135 : vector<8x16xf32>
    %137 = vector.broadcast %133 : vector<8x1xf32> to vector<8x8xf32>
    %138 = arith.subf %128, %137 : vector<8x8xf32>
    %139 = math.exp %138 : vector<8x8xf32>
    %cst_37 = arith.constant dense<0.000000e+00> : vector<8xf32>
    %140 = vector.multi_reduction <add>, %136, %cst_37 [1] : vector<8x16xf32> to vector<8xf32>
    %141 = vector.shape_cast %140 : vector<8xf32> to vector<8x1xf32>
    %cst_38 = arith.constant dense<0.000000e+00> : vector<8xf32>
    %142 = vector.multi_reduction <add>, %139, %cst_38 [1] : vector<8x8xf32> to vector<8xf32>
    %143 = vector.shape_cast %142 : vector<8xf32> to vector<8x1xf32>
    %144 = arith.addf %141, %143 : vector<8x1xf32>
    %145 = arith.truncf %136 : vector<8x16xf32> to vector<8x16xbf16>
    %cst_39 = arith.constant dense<0.000000e+00> : vector<8x16xf32>
    %146 = tpu.matmul %145, %120, %cst_39 {dimension_numbers = #tpu.dot_dimension_numbers<[1], [0], [0], [1], [0, 0, 1, 1], [], []>} : vector<8x16xbf16>, vector<16x16xbf16>, vector<8x16xf32> -> vector<8x16xf32>
    %147 = arith.truncf %139 : vector<8x8xf32> to vector<8x8xbf16>
    %cst_40 = arith.constant dense<0.000000e+00> : vector<8x16xf32>
    %148 = tpu.matmul %147, %124, %cst_40 {dimension_numbers = #tpu.dot_dimension_numbers<[1], [0], [0], [1], [0, 0, 1, 1], [], []>} : vector<8x8xbf16>, vector<8x16xbf16>, vector<8x16xf32> -> vector<8x16xf32>
    %149 = arith.addf %146, %148 : vector<8x16xf32>
    %150 = tpu.reciprocal %144 {approx = true} : vector<8x1xf32> -> vector<8x1xf32>
    %151 = vector.broadcast %150 : vector<8x1xf32> to vector<8x16xf32>
    %152 = arith.mulf %149, %151 : vector<8x16xf32>
    %153 = vector.extract_strided_slice %76 {offsets = [0, 32], sizes = [8, 16], strides = [1, 1]} : vector<8x64xf32> to vector<8x16xf32>
    %154 = arith.truncf %153 : vector<8x16xf32> to vector<8x16xbf16>
    %155 = vector.extract_strided_slice %72 {offsets = [0, 32], sizes = [16, 16], strides = [1, 1]} : vector<16x64xf32> to vector<16x16xf32>
    %156 = arith.truncf %155 : vector<16x16xf32> to vector<16x16xbf16>
    %157 = vector.extract_strided_slice %73 {offsets = [0, 32], sizes = [16, 16], strides = [1, 1]} : vector<16x64xf32> to vector<16x16xf32>
    %158 = arith.truncf %157 : vector<16x16xf32> to vector<16x16xbf16>
    %159 = vector.extract_strided_slice %74 {offsets = [0, 32], sizes = [8, 16], strides = [1, 1]} : vector<8x64xf32> to vector<8x16xf32>
    %160 = arith.truncf %159 : vector<8x16xf32> to vector<8x16xbf16>
    %161 = vector.extract_strided_slice %75 {offsets = [0, 32], sizes = [8, 16], strides = [1, 1]} : vector<8x64xf32> to vector<8x16xf32>
    %162 = arith.truncf %161 : vector<8x16xf32> to vector<8x16xbf16>
    %cst_41 = arith.constant dense<0.000000e+00> : vector<8x16xf32>
    %163 = tpu.matmul %154, %156, %cst_41 {dimension_numbers = #tpu.dot_dimension_numbers<[1], [1], [0], [0], [0, 0, 1, 0], [], []>} : vector<8x16xbf16>, vector<16x16xbf16>, vector<8x16xf32> -> vector<8x16xf32>
    %164 = arith.addf %163, %5 : vector<8x16xf32>
    %cst_42 = arith.constant dense<0.000000e+00> : vector<8x8xf32>
    %165 = tpu.matmul %154, %160, %cst_42 {dimension_numbers = #tpu.dot_dimension_numbers<[1], [1], [0], [0], [0, 0, 1, 0], [], []>} : vector<8x16xbf16>, vector<8x16xbf16>, vector<8x8xf32> -> vector<8x8xf32>
    %166 = arith.addf %165, %6 : vector<8x8xf32>
    %cst_43 = arith.constant dense<0xFF800000> : vector<8xf32>
    %167 = vector.multi_reduction <maximumf>, %164, %cst_43 [1] : vector<8x16xf32> to vector<8xf32>
    %168 = vector.shape_cast %167 : vector<8xf32> to vector<8x1xf32>
    %cst_44 = arith.constant dense<0xFF800000> : vector<8xf32>
    %169 = vector.multi_reduction <maximumf>, %166, %cst_44 [1] : vector<8x8xf32> to vector<8xf32>
    %170 = vector.shape_cast %169 : vector<8xf32> to vector<8x1xf32>
    %171 = arith.maximumf %168, %170 : vector<8x1xf32>
    %172 = vector.broadcast %171 : vector<8x1xf32> to vector<8x16xf32>
    %173 = arith.subf %164, %172 : vector<8x16xf32>
    %174 = math.exp %173 : vector<8x16xf32>
    %175 = vector.broadcast %171 : vector<8x1xf32> to vector<8x8xf32>
    %176 = arith.subf %166, %175 : vector<8x8xf32>
    %177 = math.exp %176 : vector<8x8xf32>
    %cst_45 = arith.constant dense<0.000000e+00> : vector<8xf32>
    %178 = vector.multi_reduction <add>, %174, %cst_45 [1] : vector<8x16xf32> to vector<8xf32>
    %179 = vector.shape_cast %178 : vector<8xf32> to vector<8x1xf32>
    %cst_46 = arith.constant dense<0.000000e+00> : vector<8xf32>
    %180 = vector.multi_reduction <add>, %177, %cst_46 [1] : vector<8x8xf32> to vector<8xf32>
    %181 = vector.shape_cast %180 : vector<8xf32> to vector<8x1xf32>
    %182 = arith.addf %179, %181 : vector<8x1xf32>
    %183 = arith.truncf %174 : vector<8x16xf32> to vector<8x16xbf16>
    %cst_47 = arith.constant dense<0.000000e+00> : vector<8x16xf32>
    %184 = tpu.matmul %183, %158, %cst_47 {dimension_numbers = #tpu.dot_dimension_numbers<[1], [0], [0], [1], [0, 0, 1, 1], [], []>} : vector<8x16xbf16>, vector<16x16xbf16>, vector<8x16xf32> -> vector<8x16xf32>
    %185 = arith.truncf %177 : vector<8x8xf32> to vector<8x8xbf16>
    %cst_48 = arith.constant dense<0.000000e+00> : vector<8x16xf32>
    %186 = tpu.matmul %185, %162, %cst_48 {dimension_numbers = #tpu.dot_dimension_numbers<[1], [0], [0], [1], [0, 0, 1, 1], [], []>} : vector<8x8xbf16>, vector<8x16xbf16>, vector<8x16xf32> -> vector<8x16xf32>
    %187 = arith.addf %184, %186 : vector<8x16xf32>
    %188 = tpu.reciprocal %182 {approx = true} : vector<8x1xf32> -> vector<8x1xf32>
    %189 = vector.broadcast %188 : vector<8x1xf32> to vector<8x16xf32>
    %190 = arith.mulf %187, %189 : vector<8x16xf32>
    %191 = vector.extract_strided_slice %76 {offsets = [0, 48], sizes = [8, 16], strides = [1, 1]} : vector<8x64xf32> to vector<8x16xf32>
    %192 = arith.truncf %191 : vector<8x16xf32> to vector<8x16xbf16>
    %193 = vector.extract_strided_slice %72 {offsets = [0, 48], sizes = [16, 16], strides = [1, 1]} : vector<16x64xf32> to vector<16x16xf32>
    %194 = arith.truncf %193 : vector<16x16xf32> to vector<16x16xbf16>
    %195 = vector.extract_strided_slice %73 {offsets = [0, 48], sizes = [16, 16], strides = [1, 1]} : vector<16x64xf32> to vector<16x16xf32>
    %196 = arith.truncf %195 : vector<16x16xf32> to vector<16x16xbf16>
    %197 = vector.extract_strided_slice %74 {offsets = [0, 48], sizes = [8, 16], strides = [1, 1]} : vector<8x64xf32> to vector<8x16xf32>
    %198 = arith.truncf %197 : vector<8x16xf32> to vector<8x16xbf16>
    %199 = vector.extract_strided_slice %75 {offsets = [0, 48], sizes = [8, 16], strides = [1, 1]} : vector<8x64xf32> to vector<8x16xf32>
    %200 = arith.truncf %199 : vector<8x16xf32> to vector<8x16xbf16>
    %cst_49 = arith.constant dense<0.000000e+00> : vector<8x16xf32>
    %201 = tpu.matmul %192, %194, %cst_49 {dimension_numbers = #tpu.dot_dimension_numbers<[1], [1], [0], [0], [0, 0, 1, 0], [], []>} : vector<8x16xbf16>, vector<16x16xbf16>, vector<8x16xf32> -> vector<8x16xf32>
    %202 = arith.addf %201, %5 : vector<8x16xf32>
    %cst_50 = arith.constant dense<0.000000e+00> : vector<8x8xf32>
    %203 = tpu.matmul %192, %198, %cst_50 {dimension_numbers = #tpu.dot_dimension_numbers<[1], [1], [0], [0], [0, 0, 1, 0], [], []>} : vector<8x16xbf16>, vector<8x16xbf16>, vector<8x8xf32> -> vector<8x8xf32>
    %204 = arith.addf %203, %6 : vector<8x8xf32>
    %cst_51 = arith.constant dense<0xFF800000> : vector<8xf32>
    %205 = vector.multi_reduction <maximumf>, %202, %cst_51 [1] : vector<8x16xf32> to vector<8xf32>
    %206 = vector.shape_cast %205 : vector<8xf32> to vector<8x1xf32>
    %cst_52 = arith.constant dense<0xFF800000> : vector<8xf32>
    %207 = vector.multi_reduction <maximumf>, %204, %cst_52 [1] : vector<8x8xf32> to vector<8xf32>
    %208 = vector.shape_cast %207 : vector<8xf32> to vector<8x1xf32>
    %209 = arith.maximumf %206, %208 : vector<8x1xf32>
    %210 = vector.broadcast %209 : vector<8x1xf32> to vector<8x16xf32>
    %211 = arith.subf %202, %210 : vector<8x16xf32>
    %212 = math.exp %211 : vector<8x16xf32>
    %213 = vector.broadcast %209 : vector<8x1xf32> to vector<8x8xf32>
    %214 = arith.subf %204, %213 : vector<8x8xf32>
    %215 = math.exp %214 : vector<8x8xf32>
    %cst_53 = arith.constant dense<0.000000e+00> : vector<8xf32>
    %216 = vector.multi_reduction <add>, %212, %cst_53 [1] : vector<8x16xf32> to vector<8xf32>
    %217 = vector.shape_cast %216 : vector<8xf32> to vector<8x1xf32>
    %cst_54 = arith.constant dense<0.000000e+00> : vector<8xf32>
    %218 = vector.multi_reduction <add>, %215, %cst_54 [1] : vector<8x8xf32> to vector<8xf32>
    %219 = vector.shape_cast %218 : vector<8xf32> to vector<8x1xf32>
    %220 = arith.addf %217, %219 : vector<8x1xf32>
    %221 = arith.truncf %212 : vector<8x16xf32> to vector<8x16xbf16>
    %cst_55 = arith.constant dense<0.000000e+00> : vector<8x16xf32>
    %222 = tpu.matmul %221, %196, %cst_55 {dimension_numbers = #tpu.dot_dimension_numbers<[1], [0], [0], [1], [0, 0, 1, 1], [], []>} : vector<8x16xbf16>, vector<16x16xbf16>, vector<8x16xf32> -> vector<8x16xf32>
    %223 = arith.truncf %215 : vector<8x8xf32> to vector<8x8xbf16>
    %cst_56 = arith.constant dense<0.000000e+00> : vector<8x16xf32>
    %224 = tpu.matmul %223, %200, %cst_56 {dimension_numbers = #tpu.dot_dimension_numbers<[1], [0], [0], [1], [0, 0, 1, 1], [], []>} : vector<8x8xbf16>, vector<8x16xbf16>, vector<8x16xf32> -> vector<8x16xf32>
    %225 = arith.addf %222, %224 : vector<8x16xf32>
    %226 = tpu.reciprocal %220 {approx = true} : vector<8x1xf32> -> vector<8x1xf32>
    %227 = vector.broadcast %226 : vector<8x1xf32> to vector<8x16xf32>
    %228 = arith.mulf %225, %227 : vector<8x16xf32>
    %229 = tpu.concatenate %114, %152, %190, %228 in 1 : vector<8x16xf32>, vector<8x16xf32>, vector<8x16xf32>, vector<8x16xf32> -> vector<8x64xf32>
    %230 = arith.truncf %229 : vector<8x64xf32> to vector<8x64xbf16>
    %c0_57 = arith.constant 0 : index
    %c0_58 = arith.constant 0 : index
    %c192 = arith.constant 192 : index
    %231 = vector.load %arg4[%c0_57, %c0_58, %c192] : memref<2x64x512xbf16, #tpu.memory_space<vmem>>, vector<1x64x64xbf16>
    %232 = vector.shape_cast %231 : vector<1x64x64xbf16> to vector<64x64xbf16>
    %cst_59 = arith.constant dense<0.000000e+00> : vector<8x64xf32>
    %233 = tpu.matmul %230, %232, %cst_59 {dimension_numbers = #tpu.dot_dimension_numbers<[1], [0], [0], [1], [0, 0, 1, 1], [], []>} : vector<8x64xbf16>, vector<64x64xbf16>, vector<8x64xf32> -> vector<8x64xf32>
    %234 = arith.addf %13, %233 : vector<8x64xf32>
    %cst_60 = arith.constant dense<0.000000e+00> : vector<8xf32>
    %235 = vector.multi_reduction <add>, %234, %cst_60 [1] : vector<8x64xf32> to vector<8xf32>
    %236 = vector.shape_cast %235 : vector<8xf32> to vector<8x1xf32>
    %cst_61 = arith.constant 6.400000e+01 : f32
    %237 = vector.broadcast %cst_61 : f32 to vector<8x1xf32>
    %238 = arith.divf %236, %237 : vector<8x1xf32>
    %239 = vector.broadcast %238 : vector<8x1xf32> to vector<8x64xf32>
    %240 = arith.subf %234, %239 : vector<8x64xf32>
    %241 = arith.mulf %240, %240 : vector<8x64xf32>
    %cst_62 = arith.constant dense<0.000000e+00> : vector<8xf32>
    %242 = vector.multi_reduction <add>, %241, %cst_62 [1] : vector<8x64xf32> to vector<8xf32>
    %243 = vector.shape_cast %242 : vector<8xf32> to vector<8x1xf32>
    %cst_63 = arith.constant 6.400000e+01 : f32
    %244 = vector.broadcast %cst_63 : f32 to vector<8x1xf32>
    %245 = arith.divf %243, %244 : vector<8x1xf32>
    %246 = vector.broadcast %238 : vector<8x1xf32> to vector<8x64xf32>
    %247 = arith.subf %234, %246 : vector<8x64xf32>
    %cst_64 = arith.constant 9.99999974E-6 : f32
    %248 = vector.broadcast %cst_64 : f32 to vector<8x1xf32>
    %249 = arith.addf %245, %248 : vector<8x1xf32>
    %250 = math.rsqrt %249 : vector<8x1xf32>
    %251 = vector.broadcast %250 : vector<8x1xf32> to vector<8x64xf32>
    %252 = arith.mulf %247, %251 : vector<8x64xf32>
    %253 = vector.broadcast %18 : vector<1x64xf32> to vector<8x64xf32>
    %254 = arith.mulf %252, %253 : vector<8x64xf32>
    %255 = vector.broadcast %19 : vector<1x64xf32> to vector<8x64xf32>
    %256 = arith.addf %254, %255 : vector<8x64xf32>
    %257 = arith.truncf %256 : vector<8x64xf32> to vector<8x64xbf16>
    %c0_65 = arith.constant 0 : index
    %c0_66 = arith.constant 0 : index
    %c256 = arith.constant 256 : index
    %258 = vector.load %arg4[%c0_65, %c0_66, %c256] : memref<2x64x512xbf16, #tpu.memory_space<vmem>>, vector<1x64x256xbf16>
    %259 = vector.shape_cast %258 : vector<1x64x256xbf16> to vector<64x256xbf16>
    %cst_67 = arith.constant dense<0.000000e+00> : vector<8x256xf32>
    %260 = tpu.matmul %257, %259, %cst_67 {dimension_numbers = #tpu.dot_dimension_numbers<[1], [0], [0], [1], [0, 0, 1, 1], [], []>} : vector<8x64xbf16>, vector<64x256xbf16>, vector<8x256xf32> -> vector<8x256xf32>
    %cst_68 = arith.constant 5.000000e-01 : f32
    %261 = vector.broadcast %cst_68 : f32 to vector<8x256xf32>
    %262 = arith.mulf %261, %260 : vector<8x256xf32>
    %263 = arith.mulf %260, %260 : vector<8x256xf32>
    %264 = arith.mulf %260, %263 : vector<8x256xf32>
    %cst_69 = arith.constant 4.471500e-02 : f32
    %265 = vector.broadcast %cst_69 : f32 to vector<8x256xf32>
    %266 = arith.mulf %265, %264 : vector<8x256xf32>
    %267 = arith.addf %260, %266 : vector<8x256xf32>
    %cst_70 = arith.constant 0.797884583 : f32
    %268 = vector.broadcast %cst_70 : f32 to vector<8x256xf32>
    %269 = arith.mulf %268, %267 : vector<8x256xf32>
    %270 = math.tanh %269 : vector<8x256xf32>
    %cst_71 = arith.constant 1.000000e+00 : f32
    %271 = vector.broadcast %cst_71 : f32 to vector<8x256xf32>
    %272 = arith.addf %271, %270 : vector<8x256xf32>
    %273 = arith.mulf %262, %272 : vector<8x256xf32>
    %274 = arith.truncf %273 : vector<8x256xf32> to vector<8x256xbf16>
    %c0_72 = arith.constant 0 : index
    %c0_73 = arith.constant 0 : index
    %c0_74 = arith.constant 0 : index
    %275 = vector.load %arg5[%c0_72, %c0_73, %c0_74] : memref<2x256x64xbf16, #tpu.memory_space<vmem>>, vector<1x256x64xbf16>
    %276 = vector.shape_cast %275 : vector<1x256x64xbf16> to vector<256x64xbf16>
    %cst_75 = arith.constant dense<0.000000e+00> : vector<8x64xf32>
    %277 = tpu.matmul %274, %276, %cst_75 {dimension_numbers = #tpu.dot_dimension_numbers<[1], [0], [0], [1], [0, 0, 1, 1], [], []>} : vector<8x256xbf16>, vector<256x64xbf16>, vector<8x64xf32> -> vector<8x64xf32>
    %278 = arith.addf %234, %277 : vector<8x64xf32>
    %279 = vector.extract_strided_slice %0 {offsets = [10, 0], sizes = [1, 64], strides = [1, 1]} : vector<32x64xf32> to vector<1x64xf32>
    %280 = vector.extract_strided_slice %0 {offsets = [11, 0], sizes = [1, 64], strides = [1, 1]} : vector<32x64xf32> to vector<1x64xf32>
    %281 = vector.extract_strided_slice %0 {offsets = [12, 0], sizes = [1, 64], strides = [1, 1]} : vector<32x64xf32> to vector<1x64xf32>
    %282 = vector.extract_strided_slice %0 {offsets = [13, 0], sizes = [1, 64], strides = [1, 1]} : vector<32x64xf32> to vector<1x64xf32>
    %283 = vector.extract_strided_slice %0 {offsets = [14, 0], sizes = [1, 64], strides = [1, 1]} : vector<32x64xf32> to vector<1x64xf32>
    %284 = vector.extract_strided_slice %0 {offsets = [15, 0], sizes = [1, 64], strides = [1, 1]} : vector<32x64xf32> to vector<1x64xf32>
    %cst_76 = arith.constant dense<0.000000e+00> : vector<16xf32>
    %285 = vector.multi_reduction <add>, %12, %cst_76 [1] : vector<16x64xf32> to vector<16xf32>
    %286 = vector.shape_cast %285 : vector<16xf32> to vector<16x1xf32>
    %cst_77 = arith.constant 6.400000e+01 : f32
    %287 = vector.broadcast %cst_77 : f32 to vector<16x1xf32>
    %288 = arith.divf %286, %287 : vector<16x1xf32>
    %289 = vector.broadcast %288 : vector<16x1xf32> to vector<16x64xf32>
    %290 = arith.subf %12, %289 : vector<16x64xf32>
    %291 = arith.mulf %290, %290 : vector<16x64xf32>
    %cst_78 = arith.constant dense<0.000000e+00> : vector<16xf32>
    %292 = vector.multi_reduction <add>, %291, %cst_78 [1] : vector<16x64xf32> to vector<16xf32>
    %293 = vector.shape_cast %292 : vector<16xf32> to vector<16x1xf32>
    %cst_79 = arith.constant 6.400000e+01 : f32
    %294 = vector.broadcast %cst_79 : f32 to vector<16x1xf32>
    %295 = arith.divf %293, %294 : vector<16x1xf32>
    %296 = vector.broadcast %288 : vector<16x1xf32> to vector<16x64xf32>
    %297 = arith.subf %12, %296 : vector<16x64xf32>
    %cst_80 = arith.constant 9.99999974E-6 : f32
    %298 = vector.broadcast %cst_80 : f32 to vector<16x1xf32>
    %299 = arith.addf %295, %298 : vector<16x1xf32>
    %300 = math.rsqrt %299 : vector<16x1xf32>
    %301 = vector.broadcast %300 : vector<16x1xf32> to vector<16x64xf32>
    %302 = arith.mulf %297, %301 : vector<16x64xf32>
    %303 = vector.broadcast %279 : vector<1x64xf32> to vector<16x64xf32>
    %304 = arith.mulf %302, %303 : vector<16x64xf32>
    %305 = vector.broadcast %280 : vector<1x64xf32> to vector<16x64xf32>
    %306 = arith.addf %304, %305 : vector<16x64xf32>
    %307 = arith.truncf %306 : vector<16x64xf32> to vector<16x64xbf16>
    %cst_81 = arith.constant dense<0.000000e+00> : vector<8xf32>
    %308 = vector.multi_reduction <add>, %278, %cst_81 [1] : vector<8x64xf32> to vector<8xf32>
    %309 = vector.shape_cast %308 : vector<8xf32> to vector<8x1xf32>
    %cst_82 = arith.constant 6.400000e+01 : f32
    %310 = vector.broadcast %cst_82 : f32 to vector<8x1xf32>
    %311 = arith.divf %309, %310 : vector<8x1xf32>
    %312 = vector.broadcast %311 : vector<8x1xf32> to vector<8x64xf32>
    %313 = arith.subf %278, %312 : vector<8x64xf32>
    %314 = arith.mulf %313, %313 : vector<8x64xf32>
    %cst_83 = arith.constant dense<0.000000e+00> : vector<8xf32>
    %315 = vector.multi_reduction <add>, %314, %cst_83 [1] : vector<8x64xf32> to vector<8xf32>
    %316 = vector.shape_cast %315 : vector<8xf32> to vector<8x1xf32>
    %cst_84 = arith.constant 6.400000e+01 : f32
    %317 = vector.broadcast %cst_84 : f32 to vector<8x1xf32>
    %318 = arith.divf %316, %317 : vector<8x1xf32>
    %319 = vector.broadcast %311 : vector<8x1xf32> to vector<8x64xf32>
    %320 = arith.subf %278, %319 : vector<8x64xf32>
    %cst_85 = arith.constant 9.99999974E-6 : f32
    %321 = vector.broadcast %cst_85 : f32 to vector<8x1xf32>
    %322 = arith.addf %318, %321 : vector<8x1xf32>
    %323 = math.rsqrt %322 : vector<8x1xf32>
    %324 = vector.broadcast %323 : vector<8x1xf32> to vector<8x64xf32>
    %325 = arith.mulf %320, %324 : vector<8x64xf32>
    %326 = vector.broadcast %281 : vector<1x64xf32> to vector<8x64xf32>
    %327 = arith.mulf %325, %326 : vector<8x64xf32>
    %328 = vector.broadcast %282 : vector<1x64xf32> to vector<8x64xf32>
    %329 = arith.addf %327, %328 : vector<8x64xf32>
    %330 = arith.truncf %329 : vector<8x64xf32> to vector<8x64xbf16>
    %c1 = arith.constant 1 : index
    %c0_86 = arith.constant 0 : index
    %c0_87 = arith.constant 0 : index
    %331 = vector.load %arg4[%c1, %c0_86, %c0_87] : memref<2x64x512xbf16, #tpu.memory_space<vmem>>, vector<1x64x128xbf16>
    %332 = vector.shape_cast %331 : vector<1x64x128xbf16> to vector<64x128xbf16>
    %cst_88 = arith.constant dense<0.000000e+00> : vector<16x128xf32>
    %333 = tpu.matmul %307, %332, %cst_88 {dimension_numbers = #tpu.dot_dimension_numbers<[1], [0], [0], [1], [0, 0, 1, 1], [], []>} : vector<16x64xbf16>, vector<64x128xbf16>, vector<16x128xf32> -> vector<16x128xf32>
    %c1_89 = arith.constant 1 : index
    %c0_90 = arith.constant 0 : index
    %c0_91 = arith.constant 0 : index
    %334 = vector.load %arg4[%c1_89, %c0_90, %c0_91] : memref<2x64x512xbf16, #tpu.memory_space<vmem>>, vector<1x64x192xbf16>
    %335 = vector.shape_cast %334 : vector<1x64x192xbf16> to vector<64x192xbf16>
    %cst_92 = arith.constant dense<0.000000e+00> : vector<8x192xf32>
    %336 = tpu.matmul %330, %335, %cst_92 {dimension_numbers = #tpu.dot_dimension_numbers<[1], [0], [0], [1], [0, 0, 1, 1], [], []>} : vector<8x64xbf16>, vector<64x192xbf16>, vector<8x192xf32> -> vector<8x192xf32>
    %337 = vector.extract_strided_slice %333 {offsets = [0, 0], sizes = [16, 64], strides = [1, 1]} : vector<16x128xf32> to vector<16x64xf32>
    %338 = vector.extract_strided_slice %333 {offsets = [0, 64], sizes = [16, 64], strides = [1, 1]} : vector<16x128xf32> to vector<16x64xf32>
    %339 = vector.extract_strided_slice %336 {offsets = [0, 0], sizes = [8, 64], strides = [1, 1]} : vector<8x192xf32> to vector<8x64xf32>
    %340 = vector.extract_strided_slice %336 {offsets = [0, 64], sizes = [8, 64], strides = [1, 1]} : vector<8x192xf32> to vector<8x64xf32>
    %341 = vector.extract_strided_slice %336 {offsets = [0, 128], sizes = [8, 64], strides = [1, 1]} : vector<8x192xf32> to vector<8x64xf32>
    %342 = vector.extract_strided_slice %341 {offsets = [0, 0], sizes = [8, 16], strides = [1, 1]} : vector<8x64xf32> to vector<8x16xf32>
    %343 = arith.truncf %342 : vector<8x16xf32> to vector<8x16xbf16>
    %344 = vector.extract_strided_slice %337 {offsets = [0, 0], sizes = [16, 16], strides = [1, 1]} : vector<16x64xf32> to vector<16x16xf32>
    %345 = arith.truncf %344 : vector<16x16xf32> to vector<16x16xbf16>
    %346 = vector.extract_strided_slice %338 {offsets = [0, 0], sizes = [16, 16], strides = [1, 1]} : vector<16x64xf32> to vector<16x16xf32>
    %347 = arith.truncf %346 : vector<16x16xf32> to vector<16x16xbf16>
    %348 = vector.extract_strided_slice %339 {offsets = [0, 0], sizes = [8, 16], strides = [1, 1]} : vector<8x64xf32> to vector<8x16xf32>
    %349 = arith.truncf %348 : vector<8x16xf32> to vector<8x16xbf16>
    %350 = vector.extract_strided_slice %340 {offsets = [0, 0], sizes = [8, 16], strides = [1, 1]} : vector<8x64xf32> to vector<8x16xf32>
    %351 = arith.truncf %350 : vector<8x16xf32> to vector<8x16xbf16>
    %cst_93 = arith.constant dense<0.000000e+00> : vector<8x16xf32>
    %352 = tpu.matmul %343, %345, %cst_93 {dimension_numbers = #tpu.dot_dimension_numbers<[1], [1], [0], [0], [0, 0, 1, 0], [], []>} : vector<8x16xbf16>, vector<16x16xbf16>, vector<8x16xf32> -> vector<8x16xf32>
    %353 = arith.addf %352, %5 : vector<8x16xf32>
    %cst_94 = arith.constant dense<0.000000e+00> : vector<8x8xf32>
    %354 = tpu.matmul %343, %349, %cst_94 {dimension_numbers = #tpu.dot_dimension_numbers<[1], [1], [0], [0], [0, 0, 1, 0], [], []>} : vector<8x16xbf16>, vector<8x16xbf16>, vector<8x8xf32> -> vector<8x8xf32>
    %355 = arith.addf %354, %6 : vector<8x8xf32>
    %cst_95 = arith.constant dense<0xFF800000> : vector<8xf32>
    %356 = vector.multi_reduction <maximumf>, %353, %cst_95 [1] : vector<8x16xf32> to vector<8xf32>
    %357 = vector.shape_cast %356 : vector<8xf32> to vector<8x1xf32>
    %cst_96 = arith.constant dense<0xFF800000> : vector<8xf32>
    %358 = vector.multi_reduction <maximumf>, %355, %cst_96 [1] : vector<8x8xf32> to vector<8xf32>
    %359 = vector.shape_cast %358 : vector<8xf32> to vector<8x1xf32>
    %360 = arith.maximumf %357, %359 : vector<8x1xf32>
    %361 = vector.broadcast %360 : vector<8x1xf32> to vector<8x16xf32>
    %362 = arith.subf %353, %361 : vector<8x16xf32>
    %363 = math.exp %362 : vector<8x16xf32>
    %364 = vector.broadcast %360 : vector<8x1xf32> to vector<8x8xf32>
    %365 = arith.subf %355, %364 : vector<8x8xf32>
    %366 = math.exp %365 : vector<8x8xf32>
    %cst_97 = arith.constant dense<0.000000e+00> : vector<8xf32>
    %367 = vector.multi_reduction <add>, %363, %cst_97 [1] : vector<8x16xf32> to vector<8xf32>
    %368 = vector.shape_cast %367 : vector<8xf32> to vector<8x1xf32>
    %cst_98 = arith.constant dense<0.000000e+00> : vector<8xf32>
    %369 = vector.multi_reduction <add>, %366, %cst_98 [1] : vector<8x8xf32> to vector<8xf32>
    %370 = vector.shape_cast %369 : vector<8xf32> to vector<8x1xf32>
    %371 = arith.addf %368, %370 : vector<8x1xf32>
    %372 = arith.truncf %363 : vector<8x16xf32> to vector<8x16xbf16>
    %cst_99 = arith.constant dense<0.000000e+00> : vector<8x16xf32>
    %373 = tpu.matmul %372, %347, %cst_99 {dimension_numbers = #tpu.dot_dimension_numbers<[1], [0], [0], [1], [0, 0, 1, 1], [], []>} : vector<8x16xbf16>, vector<16x16xbf16>, vector<8x16xf32> -> vector<8x16xf32>
    %374 = arith.truncf %366 : vector<8x8xf32> to vector<8x8xbf16>
    %cst_100 = arith.constant dense<0.000000e+00> : vector<8x16xf32>
    %375 = tpu.matmul %374, %351, %cst_100 {dimension_numbers = #tpu.dot_dimension_numbers<[1], [0], [0], [1], [0, 0, 1, 1], [], []>} : vector<8x8xbf16>, vector<8x16xbf16>, vector<8x16xf32> -> vector<8x16xf32>
    %376 = arith.addf %373, %375 : vector<8x16xf32>
    %377 = tpu.reciprocal %371 {approx = true} : vector<8x1xf32> -> vector<8x1xf32>
    %378 = vector.broadcast %377 : vector<8x1xf32> to vector<8x16xf32>
    %379 = arith.mulf %376, %378 : vector<8x16xf32>
    %380 = vector.extract_strided_slice %341 {offsets = [0, 16], sizes = [8, 16], strides = [1, 1]} : vector<8x64xf32> to vector<8x16xf32>
    %381 = arith.truncf %380 : vector<8x16xf32> to vector<8x16xbf16>
    %382 = vector.extract_strided_slice %337 {offsets = [0, 16], sizes = [16, 16], strides = [1, 1]} : vector<16x64xf32> to vector<16x16xf32>
    %383 = arith.truncf %382 : vector<16x16xf32> to vector<16x16xbf16>
    %384 = vector.extract_strided_slice %338 {offsets = [0, 16], sizes = [16, 16], strides = [1, 1]} : vector<16x64xf32> to vector<16x16xf32>
    %385 = arith.truncf %384 : vector<16x16xf32> to vector<16x16xbf16>
    %386 = vector.extract_strided_slice %339 {offsets = [0, 16], sizes = [8, 16], strides = [1, 1]} : vector<8x64xf32> to vector<8x16xf32>
    %387 = arith.truncf %386 : vector<8x16xf32> to vector<8x16xbf16>
    %388 = vector.extract_strided_slice %340 {offsets = [0, 16], sizes = [8, 16], strides = [1, 1]} : vector<8x64xf32> to vector<8x16xf32>
    %389 = arith.truncf %388 : vector<8x16xf32> to vector<8x16xbf16>
    %cst_101 = arith.constant dense<0.000000e+00> : vector<8x16xf32>
    %390 = tpu.matmul %381, %383, %cst_101 {dimension_numbers = #tpu.dot_dimension_numbers<[1], [1], [0], [0], [0, 0, 1, 0], [], []>} : vector<8x16xbf16>, vector<16x16xbf16>, vector<8x16xf32> -> vector<8x16xf32>
    %391 = arith.addf %390, %5 : vector<8x16xf32>
    %cst_102 = arith.constant dense<0.000000e+00> : vector<8x8xf32>
    %392 = tpu.matmul %381, %387, %cst_102 {dimension_numbers = #tpu.dot_dimension_numbers<[1], [1], [0], [0], [0, 0, 1, 0], [], []>} : vector<8x16xbf16>, vector<8x16xbf16>, vector<8x8xf32> -> vector<8x8xf32>
    %393 = arith.addf %392, %6 : vector<8x8xf32>
    %cst_103 = arith.constant dense<0xFF800000> : vector<8xf32>
    %394 = vector.multi_reduction <maximumf>, %391, %cst_103 [1] : vector<8x16xf32> to vector<8xf32>
    %395 = vector.shape_cast %394 : vector<8xf32> to vector<8x1xf32>
    %cst_104 = arith.constant dense<0xFF800000> : vector<8xf32>
    %396 = vector.multi_reduction <maximumf>, %393, %cst_104 [1] : vector<8x8xf32> to vector<8xf32>
    %397 = vector.shape_cast %396 : vector<8xf32> to vector<8x1xf32>
    %398 = arith.maximumf %395, %397 : vector<8x1xf32>
    %399 = vector.broadcast %398 : vector<8x1xf32> to vector<8x16xf32>
    %400 = arith.subf %391, %399 : vector<8x16xf32>
    %401 = math.exp %400 : vector<8x16xf32>
    %402 = vector.broadcast %398 : vector<8x1xf32> to vector<8x8xf32>
    %403 = arith.subf %393, %402 : vector<8x8xf32>
    %404 = math.exp %403 : vector<8x8xf32>
    %cst_105 = arith.constant dense<0.000000e+00> : vector<8xf32>
    %405 = vector.multi_reduction <add>, %401, %cst_105 [1] : vector<8x16xf32> to vector<8xf32>
    %406 = vector.shape_cast %405 : vector<8xf32> to vector<8x1xf32>
    %cst_106 = arith.constant dense<0.000000e+00> : vector<8xf32>
    %407 = vector.multi_reduction <add>, %404, %cst_106 [1] : vector<8x8xf32> to vector<8xf32>
    %408 = vector.shape_cast %407 : vector<8xf32> to vector<8x1xf32>
    %409 = arith.addf %406, %408 : vector<8x1xf32>
    %410 = arith.truncf %401 : vector<8x16xf32> to vector<8x16xbf16>
    %cst_107 = arith.constant dense<0.000000e+00> : vector<8x16xf32>
    %411 = tpu.matmul %410, %385, %cst_107 {dimension_numbers = #tpu.dot_dimension_numbers<[1], [0], [0], [1], [0, 0, 1, 1], [], []>} : vector<8x16xbf16>, vector<16x16xbf16>, vector<8x16xf32> -> vector<8x16xf32>
    %412 = arith.truncf %404 : vector<8x8xf32> to vector<8x8xbf16>
    %cst_108 = arith.constant dense<0.000000e+00> : vector<8x16xf32>
    %413 = tpu.matmul %412, %389, %cst_108 {dimension_numbers = #tpu.dot_dimension_numbers<[1], [0], [0], [1], [0, 0, 1, 1], [], []>} : vector<8x8xbf16>, vector<8x16xbf16>, vector<8x16xf32> -> vector<8x16xf32>
    %414 = arith.addf %411, %413 : vector<8x16xf32>
    %415 = tpu.reciprocal %409 {approx = true} : vector<8x1xf32> -> vector<8x1xf32>
    %416 = vector.broadcast %415 : vector<8x1xf32> to vector<8x16xf32>
    %417 = arith.mulf %414, %416 : vector<8x16xf32>
    %418 = vector.extract_strided_slice %341 {offsets = [0, 32], sizes = [8, 16], strides = [1, 1]} : vector<8x64xf32> to vector<8x16xf32>
    %419 = arith.truncf %418 : vector<8x16xf32> to vector<8x16xbf16>
    %420 = vector.extract_strided_slice %337 {offsets = [0, 32], sizes = [16, 16], strides = [1, 1]} : vector<16x64xf32> to vector<16x16xf32>
    %421 = arith.truncf %420 : vector<16x16xf32> to vector<16x16xbf16>
    %422 = vector.extract_strided_slice %338 {offsets = [0, 32], sizes = [16, 16], strides = [1, 1]} : vector<16x64xf32> to vector<16x16xf32>
    %423 = arith.truncf %422 : vector<16x16xf32> to vector<16x16xbf16>
    %424 = vector.extract_strided_slice %339 {offsets = [0, 32], sizes = [8, 16], strides = [1, 1]} : vector<8x64xf32> to vector<8x16xf32>
    %425 = arith.truncf %424 : vector<8x16xf32> to vector<8x16xbf16>
    %426 = vector.extract_strided_slice %340 {offsets = [0, 32], sizes = [8, 16], strides = [1, 1]} : vector<8x64xf32> to vector<8x16xf32>
    %427 = arith.truncf %426 : vector<8x16xf32> to vector<8x16xbf16>
    %cst_109 = arith.constant dense<0.000000e+00> : vector<8x16xf32>
    %428 = tpu.matmul %419, %421, %cst_109 {dimension_numbers = #tpu.dot_dimension_numbers<[1], [1], [0], [0], [0, 0, 1, 0], [], []>} : vector<8x16xbf16>, vector<16x16xbf16>, vector<8x16xf32> -> vector<8x16xf32>
    %429 = arith.addf %428, %5 : vector<8x16xf32>
    %cst_110 = arith.constant dense<0.000000e+00> : vector<8x8xf32>
    %430 = tpu.matmul %419, %425, %cst_110 {dimension_numbers = #tpu.dot_dimension_numbers<[1], [1], [0], [0], [0, 0, 1, 0], [], []>} : vector<8x16xbf16>, vector<8x16xbf16>, vector<8x8xf32> -> vector<8x8xf32>
    %431 = arith.addf %430, %6 : vector<8x8xf32>
    %cst_111 = arith.constant dense<0xFF800000> : vector<8xf32>
    %432 = vector.multi_reduction <maximumf>, %429, %cst_111 [1] : vector<8x16xf32> to vector<8xf32>
    %433 = vector.shape_cast %432 : vector<8xf32> to vector<8x1xf32>
    %cst_112 = arith.constant dense<0xFF800000> : vector<8xf32>
    %434 = vector.multi_reduction <maximumf>, %431, %cst_112 [1] : vector<8x8xf32> to vector<8xf32>
    %435 = vector.shape_cast %434 : vector<8xf32> to vector<8x1xf32>
    %436 = arith.maximumf %433, %435 : vector<8x1xf32>
    %437 = vector.broadcast %436 : vector<8x1xf32> to vector<8x16xf32>
    %438 = arith.subf %429, %437 : vector<8x16xf32>
    %439 = math.exp %438 : vector<8x16xf32>
    %440 = vector.broadcast %436 : vector<8x1xf32> to vector<8x8xf32>
    %441 = arith.subf %431, %440 : vector<8x8xf32>
    %442 = math.exp %441 : vector<8x8xf32>
    %cst_113 = arith.constant dense<0.000000e+00> : vector<8xf32>
    %443 = vector.multi_reduction <add>, %439, %cst_113 [1] : vector<8x16xf32> to vector<8xf32>
    %444 = vector.shape_cast %443 : vector<8xf32> to vector<8x1xf32>
    %cst_114 = arith.constant dense<0.000000e+00> : vector<8xf32>
    %445 = vector.multi_reduction <add>, %442, %cst_114 [1] : vector<8x8xf32> to vector<8xf32>
    %446 = vector.shape_cast %445 : vector<8xf32> to vector<8x1xf32>
    %447 = arith.addf %444, %446 : vector<8x1xf32>
    %448 = arith.truncf %439 : vector<8x16xf32> to vector<8x16xbf16>
    %cst_115 = arith.constant dense<0.000000e+00> : vector<8x16xf32>
    %449 = tpu.matmul %448, %423, %cst_115 {dimension_numbers = #tpu.dot_dimension_numbers<[1], [0], [0], [1], [0, 0, 1, 1], [], []>} : vector<8x16xbf16>, vector<16x16xbf16>, vector<8x16xf32> -> vector<8x16xf32>
    %450 = arith.truncf %442 : vector<8x8xf32> to vector<8x8xbf16>
    %cst_116 = arith.constant dense<0.000000e+00> : vector<8x16xf32>
    %451 = tpu.matmul %450, %427, %cst_116 {dimension_numbers = #tpu.dot_dimension_numbers<[1], [0], [0], [1], [0, 0, 1, 1], [], []>} : vector<8x8xbf16>, vector<8x16xbf16>, vector<8x16xf32> -> vector<8x16xf32>
    %452 = arith.addf %449, %451 : vector<8x16xf32>
    %453 = tpu.reciprocal %447 {approx = true} : vector<8x1xf32> -> vector<8x1xf32>
    %454 = vector.broadcast %453 : vector<8x1xf32> to vector<8x16xf32>
    %455 = arith.mulf %452, %454 : vector<8x16xf32>
    %456 = vector.extract_strided_slice %341 {offsets = [0, 48], sizes = [8, 16], strides = [1, 1]} : vector<8x64xf32> to vector<8x16xf32>
    %457 = arith.truncf %456 : vector<8x16xf32> to vector<8x16xbf16>
    %458 = vector.extract_strided_slice %337 {offsets = [0, 48], sizes = [16, 16], strides = [1, 1]} : vector<16x64xf32> to vector<16x16xf32>
    %459 = arith.truncf %458 : vector<16x16xf32> to vector<16x16xbf16>
    %460 = vector.extract_strided_slice %338 {offsets = [0, 48], sizes = [16, 16], strides = [1, 1]} : vector<16x64xf32> to vector<16x16xf32>
    %461 = arith.truncf %460 : vector<16x16xf32> to vector<16x16xbf16>
    %462 = vector.extract_strided_slice %339 {offsets = [0, 48], sizes = [8, 16], strides = [1, 1]} : vector<8x64xf32> to vector<8x16xf32>
    %463 = arith.truncf %462 : vector<8x16xf32> to vector<8x16xbf16>
    %464 = vector.extract_strided_slice %340 {offsets = [0, 48], sizes = [8, 16], strides = [1, 1]} : vector<8x64xf32> to vector<8x16xf32>
    %465 = arith.truncf %464 : vector<8x16xf32> to vector<8x16xbf16>
    %cst_117 = arith.constant dense<0.000000e+00> : vector<8x16xf32>
    %466 = tpu.matmul %457, %459, %cst_117 {dimension_numbers = #tpu.dot_dimension_numbers<[1], [1], [0], [0], [0, 0, 1, 0], [], []>} : vector<8x16xbf16>, vector<16x16xbf16>, vector<8x16xf32> -> vector<8x16xf32>
    %467 = arith.addf %466, %5 : vector<8x16xf32>
    %cst_118 = arith.constant dense<0.000000e+00> : vector<8x8xf32>
    %468 = tpu.matmul %457, %463, %cst_118 {dimension_numbers = #tpu.dot_dimension_numbers<[1], [1], [0], [0], [0, 0, 1, 0], [], []>} : vector<8x16xbf16>, vector<8x16xbf16>, vector<8x8xf32> -> vector<8x8xf32>
    %469 = arith.addf %468, %6 : vector<8x8xf32>
    %cst_119 = arith.constant dense<0xFF800000> : vector<8xf32>
    %470 = vector.multi_reduction <maximumf>, %467, %cst_119 [1] : vector<8x16xf32> to vector<8xf32>
    %471 = vector.shape_cast %470 : vector<8xf32> to vector<8x1xf32>
    %cst_120 = arith.constant dense<0xFF800000> : vector<8xf32>
    %472 = vector.multi_reduction <maximumf>, %469, %cst_120 [1] : vector<8x8xf32> to vector<8xf32>
    %473 = vector.shape_cast %472 : vector<8xf32> to vector<8x1xf32>
    %474 = arith.maximumf %471, %473 : vector<8x1xf32>
    %475 = vector.broadcast %474 : vector<8x1xf32> to vector<8x16xf32>
    %476 = arith.subf %467, %475 : vector<8x16xf32>
    %477 = math.exp %476 : vector<8x16xf32>
    %478 = vector.broadcast %474 : vector<8x1xf32> to vector<8x8xf32>
    %479 = arith.subf %469, %478 : vector<8x8xf32>
    %480 = math.exp %479 : vector<8x8xf32>
    %cst_121 = arith.constant dense<0.000000e+00> : vector<8xf32>
    %481 = vector.multi_reduction <add>, %477, %cst_121 [1] : vector<8x16xf32> to vector<8xf32>
    %482 = vector.shape_cast %481 : vector<8xf32> to vector<8x1xf32>
    %cst_122 = arith.constant dense<0.000000e+00> : vector<8xf32>
    %483 = vector.multi_reduction <add>, %480, %cst_122 [1] : vector<8x8xf32> to vector<8xf32>
    %484 = vector.shape_cast %483 : vector<8xf32> to vector<8x1xf32>
    %485 = arith.addf %482, %484 : vector<8x1xf32>
    %486 = arith.truncf %477 : vector<8x16xf32> to vector<8x16xbf16>
    %cst_123 = arith.constant dense<0.000000e+00> : vector<8x16xf32>
    %487 = tpu.matmul %486, %461, %cst_123 {dimension_numbers = #tpu.dot_dimension_numbers<[1], [0], [0], [1], [0, 0, 1, 1], [], []>} : vector<8x16xbf16>, vector<16x16xbf16>, vector<8x16xf32> -> vector<8x16xf32>
    %488 = arith.truncf %480 : vector<8x8xf32> to vector<8x8xbf16>
    %cst_124 = arith.constant dense<0.000000e+00> : vector<8x16xf32>
    %489 = tpu.matmul %488, %465, %cst_124 {dimension_numbers = #tpu.dot_dimension_numbers<[1], [0], [0], [1], [0, 0, 1, 1], [], []>} : vector<8x8xbf16>, vector<8x16xbf16>, vector<8x16xf32> -> vector<8x16xf32>
    %490 = arith.addf %487, %489 : vector<8x16xf32>
    %491 = tpu.reciprocal %485 {approx = true} : vector<8x1xf32> -> vector<8x1xf32>
    %492 = vector.broadcast %491 : vector<8x1xf32> to vector<8x16xf32>
    %493 = arith.mulf %490, %492 : vector<8x16xf32>
    %494 = tpu.concatenate %379, %417, %455, %493 in 1 : vector<8x16xf32>, vector<8x16xf32>, vector<8x16xf32>, vector<8x16xf32> -> vector<8x64xf32>
    %495 = arith.truncf %494 : vector<8x64xf32> to vector<8x64xbf16>
    %c1_125 = arith.constant 1 : index
    %c0_126 = arith.constant 0 : index
    %c192_127 = arith.constant 192 : index
    %496 = vector.load %arg4[%c1_125, %c0_126, %c192_127] : memref<2x64x512xbf16, #tpu.memory_space<vmem>>, vector<1x64x64xbf16>
    %497 = vector.shape_cast %496 : vector<1x64x64xbf16> to vector<64x64xbf16>
    %cst_128 = arith.constant dense<0.000000e+00> : vector<8x64xf32>
    %498 = tpu.matmul %495, %497, %cst_128 {dimension_numbers = #tpu.dot_dimension_numbers<[1], [0], [0], [1], [0, 0, 1, 1], [], []>} : vector<8x64xbf16>, vector<64x64xbf16>, vector<8x64xf32> -> vector<8x64xf32>
    %499 = arith.addf %278, %498 : vector<8x64xf32>
    %cst_129 = arith.constant dense<0.000000e+00> : vector<8xf32>
    %500 = vector.multi_reduction <add>, %499, %cst_129 [1] : vector<8x64xf32> to vector<8xf32>
    %501 = vector.shape_cast %500 : vector<8xf32> to vector<8x1xf32>
    %cst_130 = arith.constant 6.400000e+01 : f32
    %502 = vector.broadcast %cst_130 : f32 to vector<8x1xf32>
    %503 = arith.divf %501, %502 : vector<8x1xf32>
    %504 = vector.broadcast %503 : vector<8x1xf32> to vector<8x64xf32>
    %505 = arith.subf %499, %504 : vector<8x64xf32>
    %506 = arith.mulf %505, %505 : vector<8x64xf32>
    %cst_131 = arith.constant dense<0.000000e+00> : vector<8xf32>
    %507 = vector.multi_reduction <add>, %506, %cst_131 [1] : vector<8x64xf32> to vector<8xf32>
    %508 = vector.shape_cast %507 : vector<8xf32> to vector<8x1xf32>
    %cst_132 = arith.constant 6.400000e+01 : f32
    %509 = vector.broadcast %cst_132 : f32 to vector<8x1xf32>
    %510 = arith.divf %508, %509 : vector<8x1xf32>
    %511 = vector.broadcast %503 : vector<8x1xf32> to vector<8x64xf32>
    %512 = arith.subf %499, %511 : vector<8x64xf32>
    %cst_133 = arith.constant 9.99999974E-6 : f32
    %513 = vector.broadcast %cst_133 : f32 to vector<8x1xf32>
    %514 = arith.addf %510, %513 : vector<8x1xf32>
    %515 = math.rsqrt %514 : vector<8x1xf32>
    %516 = vector.broadcast %515 : vector<8x1xf32> to vector<8x64xf32>
    %517 = arith.mulf %512, %516 : vector<8x64xf32>
    %518 = vector.broadcast %283 : vector<1x64xf32> to vector<8x64xf32>
    %519 = arith.mulf %517, %518 : vector<8x64xf32>
    %520 = vector.broadcast %284 : vector<1x64xf32> to vector<8x64xf32>
    %521 = arith.addf %519, %520 : vector<8x64xf32>
    %522 = arith.truncf %521 : vector<8x64xf32> to vector<8x64xbf16>
    %c1_134 = arith.constant 1 : index
    %c0_135 = arith.constant 0 : index
    %c256_136 = arith.constant 256 : index
    %523 = vector.load %arg4[%c1_134, %c0_135, %c256_136] : memref<2x64x512xbf16, #tpu.memory_space<vmem>>, vector<1x64x256xbf16>
    %524 = vector.shape_cast %523 : vector<1x64x256xbf16> to vector<64x256xbf16>
    %cst_137 = arith.constant dense<0.000000e+00> : vector<8x256xf32>
    %525 = tpu.matmul %522, %524, %cst_137 {dimension_numbers = #tpu.dot_dimension_numbers<[1], [0], [0], [1], [0, 0, 1, 1], [], []>} : vector<8x64xbf16>, vector<64x256xbf16>, vector<8x256xf32> -> vector<8x256xf32>
    %cst_138 = arith.constant 5.000000e-01 : f32
    %526 = vector.broadcast %cst_138 : f32 to vector<8x256xf32>
    %527 = arith.mulf %526, %525 : vector<8x256xf32>
    %528 = arith.mulf %525, %525 : vector<8x256xf32>
    %529 = arith.mulf %525, %528 : vector<8x256xf32>
    %cst_139 = arith.constant 4.471500e-02 : f32
    %530 = vector.broadcast %cst_139 : f32 to vector<8x256xf32>
    %531 = arith.mulf %530, %529 : vector<8x256xf32>
    %532 = arith.addf %525, %531 : vector<8x256xf32>
    %cst_140 = arith.constant 0.797884583 : f32
    %533 = vector.broadcast %cst_140 : f32 to vector<8x256xf32>
    %534 = arith.mulf %533, %532 : vector<8x256xf32>
    %535 = math.tanh %534 : vector<8x256xf32>
    %cst_141 = arith.constant 1.000000e+00 : f32
    %536 = vector.broadcast %cst_141 : f32 to vector<8x256xf32>
    %537 = arith.addf %536, %535 : vector<8x256xf32>
    %538 = arith.mulf %527, %537 : vector<8x256xf32>
    %539 = arith.truncf %538 : vector<8x256xf32> to vector<8x256xbf16>
    %c1_142 = arith.constant 1 : index
    %c0_143 = arith.constant 0 : index
    %c0_144 = arith.constant 0 : index
    %540 = vector.load %arg5[%c1_142, %c0_143, %c0_144] : memref<2x256x64xbf16, #tpu.memory_space<vmem>>, vector<1x256x64xbf16>
    %541 = vector.shape_cast %540 : vector<1x256x64xbf16> to vector<256x64xbf16>
    %cst_145 = arith.constant dense<0.000000e+00> : vector<8x64xf32>
    %542 = tpu.matmul %539, %541, %cst_145 {dimension_numbers = #tpu.dot_dimension_numbers<[1], [0], [0], [1], [0, 0, 1, 1], [], []>} : vector<8x256xbf16>, vector<256x64xbf16>, vector<8x64xf32> -> vector<8x64xf32>
    %543 = arith.addf %499, %542 : vector<8x64xf32>
    %544 = arith.truncf %543 : vector<8x64xf32> to vector<8x64xbf16>
    %c32 = arith.constant 32 : index
    %c0_146 = arith.constant 0 : index
    %545 = vector.load %arg3[%c32, %c0_146] : memref<96x64xbf16, #tpu.memory_space<vmem>>, vector<64x64xbf16>
    %cst_147 = arith.constant dense<0.000000e+00> : vector<8x64xf32>
    %546 = tpu.matmul %544, %545, %cst_147 {dimension_numbers = #tpu.dot_dimension_numbers<[1], [0], [0], [1], [0, 0, 1, 1], [], []>} : vector<8x64xbf16>, vector<64x64xbf16>, vector<8x64xf32> -> vector<8x64xf32>
    %547 = vector.broadcast %2 : vector<1x64xf32> to vector<8x64xf32>
    %548 = arith.addf %546, %547 : vector<8x64xf32>
    %cst_148 = arith.constant dense<0.000000e+00> : vector<8xf32>
    %549 = vector.multi_reduction <add>, %548, %cst_148 [1] : vector<8x64xf32> to vector<8xf32>
    %550 = vector.shape_cast %549 : vector<8xf32> to vector<8x1xf32>
    %cst_149 = arith.constant 6.400000e+01 : f32
    %551 = vector.broadcast %cst_149 : f32 to vector<8x1xf32>
    %552 = arith.divf %550, %551 : vector<8x1xf32>
    %553 = vector.broadcast %552 : vector<8x1xf32> to vector<8x64xf32>
    %554 = arith.subf %548, %553 : vector<8x64xf32>
    %555 = arith.mulf %554, %554 : vector<8x64xf32>
    %cst_150 = arith.constant dense<0.000000e+00> : vector<8xf32>
    %556 = vector.multi_reduction <add>, %555, %cst_150 [1] : vector<8x64xf32> to vector<8xf32>
    %557 = vector.shape_cast %556 : vector<8xf32> to vector<8x1xf32>
    %cst_151 = arith.constant 6.400000e+01 : f32
    %558 = vector.broadcast %cst_151 : f32 to vector<8x1xf32>
    %559 = arith.divf %557, %558 : vector<8x1xf32>
    %560 = vector.broadcast %552 : vector<8x1xf32> to vector<8x64xf32>
    %561 = arith.subf %548, %560 : vector<8x64xf32>
    %cst_152 = arith.constant 9.99999974E-6 : f32
    %562 = vector.broadcast %cst_152 : f32 to vector<8x1xf32>
    %563 = arith.addf %559, %562 : vector<8x1xf32>
    %564 = math.rsqrt %563 : vector<8x1xf32>
    %565 = vector.broadcast %564 : vector<8x1xf32> to vector<8x64xf32>
    %566 = arith.mulf %561, %565 : vector<8x64xf32>
    %567 = vector.broadcast %3 : vector<1x64xf32> to vector<8x64xf32>
    %568 = arith.mulf %566, %567 : vector<8x64xf32>
    %569 = vector.broadcast %4 : vector<1x64xf32> to vector<8x64xf32>
    %570 = arith.addf %568, %569 : vector<8x64xf32>
    %c0_153 = arith.constant 0 : index
    %c0_154 = arith.constant 0 : index
    %571 = vector.load %arg7[%c0_153, %c0_154] : memref<8x64xf32, #tpu.memory_space<vmem>>, vector<8x64xf32>
    tpu.vector_store %arg7[%c0_153, %c0_154], %570 {strides = array<i32>} : memref<8x64xf32, #tpu.memory_space<vmem>>, vector<8x64xf32>,
    return
  }
  func.func @transform_0(%arg0: i32) -> (i32, i32) {
    %c0_i32 = arith.constant 0 : i32
    %c0_i32_0 = arith.constant 0 : i32
    %c0_i32_1 = arith.constant 0 : i32
    return %c0_i32, %c0_i32_0 : i32, i32
  }
  func.func @transform_1(%arg0: i32) -> (i32, i32) {
    %c0_i32 = arith.constant 0 : i32
    %c0_i32_0 = arith.constant 0 : i32
    %c0_i32_1 = arith.constant 0 : i32
    return %c0_i32, %c0_i32_0 : i32, i32
  }
  func.func @transform_2(%arg0: i32) -> (i32, i32) {
    %c0_i32 = arith.constant 0 : i32
    %c0_i32_0 = arith.constant 0 : i32
    %c0_i32_1 = arith.constant 0 : i32
    return %c0_i32, %c0_i32_0 : i32, i32
  }
  func.func @transform_3(%arg0: i32) -> (i32, i32, i32) {
    %c0_i32 = arith.constant 0 : i32
    %c0_i32_0 = arith.constant 0 : i32
    %c0_i32_1 = arith.constant 0 : i32
    %c0_i32_2 = arith.constant 0 : i32
    return %c0_i32, %c0_i32_0, %c0_i32_1 : i32, i32, i32
  }
  func.func @transform_4(%arg0: i32) -> (i32, i32, i32) {
    %c0_i32 = arith.constant 0 : i32
    %c0_i32_0 = arith.constant 0 : i32
    %c0_i32_1 = arith.constant 0 : i32
    %c0_i32_2 = arith.constant 0 : i32
    return %c0_i32, %c0_i32_0, %c0_i32_1 : i32, i32, i32
  }
  func.func @transform_5(%arg0: i32) -> (i32, i32) {
    %c0_i32 = arith.constant 0 : i32
    %c0_i32_0 = arith.constant 0 : i32
    %c0_i32_1 = arith.constant 0 : i32
    return %c0_i32, %c0_i32_0 : i32, i32
  }
  func.func @transform_6(%arg0: i32) -> (i32, i32) {
    %c0_i32 = arith.constant 0 : i32
    %c0_i32_0 = arith.constant 0 : i32
    %c0_i32_1 = arith.constant 0 : i32
    return %c0_i32, %c0_i32_0 : i32, i32
  }
}

</mosaic_0001>

<bundles_post_ra>
// kernel: resampler_forward.1
= control target key start
LH: loop header
LB: loop body
LE: loop exit
PB: predicated region body
PF: predicated region fallthrough
CT: control target
= control target key end

     0   :  { %v4005_v1 = vmov 0.0   ;;  %vm4006_vm0 = vmmov 0   ;;  %vm52_vm1 = vcmask 261120   ;;  %s4868_s0 = inlined_call_operand.vmem [shape: f32[16,32], index: 0, kind: input, shape index: {}]   ;;  %s4869_s1 = inlined_call_operand.vmem [shape: f32[8,64], index: 1, kind: input, shape index: {}]   ;;  %s4870_s2 = inlined_call_operand.vmem [shape: bf16[96,64], index: 2, kind: input, shape index: {}]   ;;  %s4871_s3 = inlined_call_operand.vmem [shape: bf16[2,64,512], index: 3, kind: input, shape index: {}]   ;;  %s4872_s4 = inlined_call_operand.vmem [shape: bf16[2,256,64], index: 4, kind: input, shape index: {}]   ;;  %s4873_s5 = inlined_call_operand.vmem [shape: f32[32,64], index: 5, kind: input, shape index: {}]   ;;  %s4874_s6 = inlined_call_operand.hbm [shape: f32[8,64], index: 6, kind: output, shape index: {}]  }
   0x1   :  { %v3805_v0 = vld [vmem:[%s4870_s2] sm:$0xff]   ;;  %3502 = vmatprep.subr.bf16.mxu0 %v4005_v1  ;;  %3510 = vmatprep.subr.bf16.mxu1 %v4005_v1  ;;  %v3806_v2 = vld [vmem:[%s4870_s2 + $0x8] sm:$0xff]  }
   0x2   :  { %3503 = vmatpush3.bf16.msra.mxu0 %v3805_v0  ;;  %3506 = vmatprep.mubr.msk.bf16.mxu0 %vm4006_vm0, %v4005_v1  ;;  %v29_v3 = vld [vmem:[%s4868_s0] sm:$0xff]  ;;  %v30_v4 = vld [vmem:[%s4868_s0 + $0x8] sm:$0xff] }
   0x3   :  { %3504 = vmatprep.subr.bf16.mxu0 %v4005_v1  ;;  %3518 = vmatprep.mubr.msk.bf16.mxu1 %vm4006_vm0, %v4005_v1  ;;  %v31_v5 = vpack.c.bf16 %v30_v4, %v29_v3 }
   0x6   :  { %3505 = vmatpush3.bf16.msra.mxu0 %v3806_v2 }
   0x9   :  { %3507 = vmatmul.mubr.msk.bf16.vlgmr.msra.gmra.mrb[0].mxu0 %vm52_vm1, %v31_v5 }
   0xa   :  { %11 = vsyncpa [#allocation3], 0  ;;  %vm98_vm2 = vcmask 523264   ;;  %v4074_v6 = vld [vmem:[%s4869_s1] sm:$0xff]  ;;  %v36_v8 = vlaneseq  ;;  %v4007_v48 = vmov 0   ;;  %v4154_v60 = vld [vmem:[%s4873_s5 + $0x8] sm:$0xff] }
   0xb   :  { %v139_v7 = vsel %vm98_vm2, %v4074_v6, 0.0  ;;  %v4084_v11 = vld [vmem:[%s4873_s5] sm:$0xff]  ;;  %322 = vmatprep.mubr.bf16.mxu0 %v4007_v48  ;;  %vm334_vm3 = vcmask 130048   ;;  %s4008_s1 = smov 112   ;;  %s4009_s8 = smov 96   ;;  %vm453_vm4 = vcmask 1043456  }
   0xc   :  { %140 = vadd.xlane.f32.xlu1 %v139_v7  ;;  %v4078_v9 = vshrl.u32 %v36_v8, 7  ;;  %v3809_v36 = vld [vmem:[%s4871_s3 + $0x4] ss:$16 sps:$4 sm:$0xff]   ;;  %v3807_v37 = vld [vmem:[%s4871_s3] ss:$16 sps:$4 sm:$0xff]   ;;  %s4010_s9 = smov 80  }
   0xd   :  { %v3810_v38 = vld [vmem:[%s4871_s3] ss:$16 sps:$4 sm:$0xff]   ;;  %290 = vmatprep.subr.bf16.mxu0 %v3809_v36  ;;  %v3813_v39 = vld [vmem:[%s4871_s3 + $0x24] ss:$16 sps:$4 sm:$0xff]   ;;  %s4011_s10 = smov 64   ;;  %vm427_vm5 = vcmask 64512  }
   0xe   :  { %v38_v10 = vsub.s32 0, %v4078_v9  ;;  %3511 = vmatpush3.bf16.msra.mxu1 %v3810_v38  ;;  %291 = vmatpush1.bf16.msra.mxu0 %v3807_v37  ;;  %v3811_v40 = vld [vmem:[%s4871_s3 + $0x20] ss:$16 sps:$4 sm:$0xff]   ;;  %v3817_v42 = vld [vmem:[%s4871_s3 + $0x44] ss:$16 sps:$4 sm:$0xff]   ;;  %v1594_v58 = vsub.s32 2, %v4078_v9 }
   0xf   :  { %3512 = vmatprep.subr.bf16.mxu1 %v4005_v1  ;;  %v3814_v41 = vld [vmem:[%s4871_s3 + $0x20] ss:$16 sps:$4 sm:$0xff]   ;;  %292 = vmatprep.subr.bf16.mxu0 %v3813_v39  ;;  %v3821_v46 = vld [vmem:[%s4871_s3 + $0x64] ss:$16 sps:$4 sm:$0xff]   ;;  %v128_v59 = vsub.s32 4, %v4078_v9  ;;  %v154_v61 = vsub.s32 6, %v4078_v9 }
  0x10   :  { %v39_v12 = vrot.slane %v4084_v11, %v38_v10  ;;  %v3815_v43 = vld [vmem:[%s4871_s3 + $0x40] ss:$16 sps:$4 sm:$0xff]   ;;  %v134_v63 = vsub.s32 5, %v4078_v9  ;;  %v159_v0 = vsub.s32 7, %v4078_v9  ;;  %v1595_v2 = vrot.slane %v4154_v60, %v1594_v58  ;;  %s4012_s15 = smov 48   ;;  %s4013_s16 = smov 32  }
  0x11   :  { %v3818_v44 = vld [vmem:[%s4871_s3 + $0x40] ss:$16 sps:$4 sm:$0xff]   ;;  %v129_v4 = vrot.slane %v4084_v11, %v128_v59  ;;  %v1600_v5 = vsub.s32 3, %v4078_v9  ;;  %v155_v7 = vrot.slane %v4084_v11, %v154_v61  ;;  %s4014_s17 = smov 16   ;;  %vm1200_vm6 = vcmask 392192  }
  0x12   :  { %3513 = vmatpush3.bf16.msra.mxu1 %v3814_v41  ;;  %293 = vmatpush1.bf16.msra.mxu0 %v3811_v40  ;;  %v3819_v45 = vld [vmem:[%s4871_s3 + $0x60] ss:$16 sps:$4 sm:$0xff]  }
  0x13   :  { %3514 = vmatprep.subr.bf16.mxu1 %v4005_v1  ;;  %294 = vmatprep.subr.bf16.mxu0 %v3817_v42  ;;  %v3822_v47 = vld [vmem:[%s4871_s3 + $0x60] ss:$16 sps:$4 sm:$0xff]  }
  0x16   :  { %3515 = vmatpush3.bf16.msra.mxu1 %v3818_v44  ;;  %295 = vmatpush1.bf16.msra.mxu0 %v3815_v43 }
  0x17   :  { %3516 = vmatprep.subr.bf16.mxu1 %v4005_v1  ;;  %296 = vmatprep.subr.bf16.mxu0 %v3821_v46 }
  0x1a   :  { %3517 = vmatpush3.bf16.msra.mxu1 %v3822_v47  ;;  %297 = vmatpush1.bf16.msra.mxu0 %v3819_v45 }
  0x1b   :  { %3528 = vmatprep.subr.bf16.mxu0 %v4005_v1  ;;  %3522 = vmatprep.subr.bf16.mxu1 %v4005_v1 }
  0x99   :  { %v141_v21 = vpop.xlane.xlu1 %140 }
  0x9a   :  { %v142_v22 = vmul.f32 0.015625, %v141_v21 }
  0x9c   :  { %v4092_v25 = vsub.f32 %v4074_v6, %v142_v22 }
  0x9e   :  { %v144_v30 = vmul.f32 %v4092_v25, %v4092_v25 }
  0xa0   :  { %v145_v33 = vsel %vm98_vm2, %v144_v30, 0.0 }
  0xdc   :  { %v90_v13 = vpop.f32.mrb[0].mxu0 }
  0xdd   :  { %v91_v14 = vadd.f32 %v90_v13, %v39_v12  ;;  %v3508_v15 = vpop.f32.mrb[1].mxu0 }
  0xde   :  { %v93_v16 = vpop.f32.mrb[2].mxu0  ;;  %v160_v15 = vrot.slane %v4084_v11, %v159_v0 }
  0xdf   :  { %v94_v17 = vadd.f32 %v93_v16, %v39_v12  ;;  %v3509_v18 = vpop.f32.mrb[3].mxu0  ;;  %v99_v19 = vsel %vm98_vm2, %v91_v14, 0.0 }
  0xe0   :  { %100 = vadd.xlane.f32.xlu0 %v99_v19  ;;  %v1601_v19 = vrot.slane %v4154_v60, %v1600_v5 }
  0xe1   :  { %v102_v20 = vsel %vm98_vm2, %v94_v17, 0.0 }
  0xe4   :  { %103 = vadd.xlane.f32.xlu0 %v102_v20 }
 0x16d   :  { %v101_v23 = vpop.xlane.xlu0 %100 }
 0x16e   :  { %v106_v24 = vmul.f32 0.015625, %v101_v23 }
 0x170   :  { %v4094_v26 = vsub.f32 %v91_v14, %v106_v24  ;;  %v135_v14 = vrot.slane %v4084_v11, %v134_v63 }
 0x171   :  { %v104_v27 = vpop.xlane.xlu0 %103 }
 0x172   :  { %v107_v28 = vmul.f32 0.015625, %v104_v27  ;;  %v110_v29 = vmul.f32 %v4094_v26, %v4094_v26 }
 0x174   :  { %v4100_v31 = vsub.f32 %v94_v17, %v107_v28  ;;  %v112_v32 = vsel %vm98_vm2, %v110_v29, 0.0 }
 0x175   :  { %113 = vadd.xlane.f32.xlu1 %v112_v32 }
 0x176   :  { %v111_v34 = vmul.f32 %v4100_v31, %v4100_v31 }
 0x178   :  { %v115_v35 = vsel %vm98_vm2, %v111_v34, 0.0 }
 0x179   :  { %146 = vadd.xlane.f32.xlu1 %v145_v33  ;;  %116 = vadd.xlane.f32.xlu0 %v115_v35 }
 0x202   :  { %v114_v49 = vpop.xlane.xlu1 %113 }
 0x203   :  { %v118_v50 = vmul.f32 0.015625, %v114_v49 }
 0x205   :  { %v120_v51 = vadd.f32 1e-05, %v118_v50 }
 0x206   :  { %v147_v52 = vpop.xlane.xlu1 %146  ;;  %v117_v53 = vpop.xlane.xlu0 %116 }
 0x207   :  { %3907 = vrsqrt.f32 %v120_v51  ;;  %v148_v54 = vmul.f32 0.015625, %v147_v52  ;;  %v119_v55 = vmul.f32 0.015625, %v117_v53 }
 0x209   :  { %v149_v56 = vadd.f32 1e-05, %v148_v54  ;;  %v121_v57 = vadd.f32 1e-05, %v119_v55 }
 0x20b   :  { %3909 = vrsqrt.f32 %v149_v56 }
 0x20c   :  { %3911 = vrsqrt.f32 %v121_v57 }
 0x211   :  { %v3908_v62 = vpop.eup %3907 }
 0x212   :  { %v124_v3 = vmul.f32 %v3908_v62, %v4094_v26 }
 0x214   :  { %v1596_v16 = vmul.f32 %v1595_v2, %v124_v3  ;;  %v130_v18 = vmul.f32 %v129_v4, %v124_v3 }
 0x215   :  { %v3910_v8 = vpop.eup %3909 }
 0x216   :  { %v3912_v12 = vpop.eup %3911  ;;  %v151_v13 = vmul.f32 %v3910_v8, %v4092_v25  ;;  %v136_v24 = vadd.f32 %v135_v14, %v130_v18  ;;  %v4181_v26 = vadd.f32 %v1601_v19, %v1596_v16 }
 0x217   :  { %v125_v17 = vmul.f32 %v3912_v12, %v4100_v31 }
 0x218   :  { %v156_v20 = vmul.f32 %v155_v7, %v151_v13  ;;  %v4267_v13 = vld [vmem:[%s4873_s5 + $0x10] sm:$0xff] }
 0x219   :  { %v1597_v21 = vmul.f32 %v1595_v2, %v125_v17  ;;  %v131_v22 = vmul.f32 %v129_v4, %v125_v17  ;;  %v4261_v4 = vld [vmem:[%s4873_s5 + $0x18] sm:$0xff] }
 0x21a   :  { %v161_v23 = vadd.f32 %v160_v15, %v156_v20 }
 0x21b   :  { %v137_v25 = vadd.f32 %v135_v14, %v131_v22  ;;  %v4183_v27 = vadd.f32 %v1601_v19, %v1597_v21 }
 0x21c   :  { %v162_v28 = vpack.c.bf16 %v161_v23, %v161_v23 }
 0x21d   :  { %v138_v11 = vpack.c.bf16 %v137_v25, %v136_v24  ;;  %v1604_v29 = vpack.c.bf16 %v4183_v27, %v4181_v26  ;;  %v3850_v26 = vld [vmem:[%s4872_s4 + $0x18] sm:$0xff]   ;;  %v3851_v27 = vld [vmem:[%s4872_s4 + $0x60] sm:$0xff]  }
 0x21e   :  { %3190 = vmatmul.mubr.msk.bf16.vlgmr.msra.gmra.mrb[4].mxu0 %vm98_vm2, %v162_v28 }
 0x21f   :  { %3519 = vmatmul.mubr.msk.bf16.vlgmr.msra.gmra.mrb[0].mxu1 %vm98_vm2, %v138_v11  ;;  %3530 = vmatprep.mubr.msk.bf16.mxu0 %vm4006_vm0, %v4005_v1 }
 0x220   :  { %3524 = vmatprep.mubr.msk.bf16.mxu1 %vm4006_vm0, %v4005_v1 }
 0x2f1   :  { %v324_v30 = vpop.f32.mrb[4].mxu0 }
 0x2f2   :  { %v232_v31 = vpop.f32.mrb[0].mxu1  ;;  %v4193_v32 = vpack.c.bf16 %v324_v30, %v324_v30  ;;  %v326_v33 = vpop.f32.mrb[5].mxu0 }
 0x2f3   :  { %v3520_v34 = vpop.f32.mrb[1].mxu1  ;;  %v331_v35 = vpack.c.bf16 %v326_v33, %v326_v33  ;;  %v328_v36 = vpop.f32.mrb[6].mxu0 }
 0x2f4   :  { %v235_v37 = vpop.f32.mrb[2].mxu1  ;;  %v329_v38 = vpop.f32.mrb[7].mxu0  ;;  %v382_v39 = vsel %vm334_vm3, %v4193_v32, 0 }
 0x2f5   :  { %v4197_v40 = vpack.c.bf16 %v235_v37, %v232_v31  ;;  %v3521_v41 = vpop.f32.mrb[3].mxu1  ;;  %3529 = vmatpush3.bf16.xpose.msra.mxu0 %v382_v39  ;;  %547 = vrot.lane.b32.xlu1 %v331_v35, %s4008_s1 }
 0x2f6   :  { %3546 = vmatprep.subr.bf16.mxu0 %v4005_v1 }
 0x2f7   :  { %549 = vrot.lane.b32.xlu0 %v4197_v40, %s4008_s1  ;;  %v339_v42 = vsel %vm334_vm3, %v4197_v40, 0 }
 0x2f8   :  { %3523 = vmatpush3.bf16.xpose.msra.mxu1 %v339_v42 }
 0x2f9   :  { %597 = vrot.lane.b32.xlu1 %v4193_v32, %s4008_s1  ;;  %3534 = vmatprep.subr.bf16.mxu1 %v4005_v1 }
 0x2fb   :  { %760 = vrot.lane.b32.xlu0 %v331_v35, %s4009_s8 }
 0x2fc   :  { %3531 = vmatmul.mubr.msk.bf16.vlgmr.msra.gmra.mrb[8].mxu0 %vm334_vm3, %v331_v35 }
 0x2fd   :  { %762 = vrot.lane.b32.xlu1 %v4197_v40, %s4009_s8  ;;  %3548 = vmatprep.mubr.msk.bf16.mxu0 %vm4006_vm0, %v4005_v1 }
 0x2ff   :  { %975 = vrot.lane.b32.xlu0 %v4197_v40, %s4010_s9  ;;  %3525 = vmatmul.mubr.msk.bf16.vlgmr.msra.gmra.mrb[4].mxu1 %vm334_vm3, %v331_v35 }
 0x300   :  { %3536 = vmatprep.mubr.msk.bf16.mxu1 %vm4006_vm0, %v4005_v1 }
 0x301   :  { %810 = vrot.lane.b32.xlu1 %v4193_v32, %s4009_s8 }
 0x303   :  { %1023 = vrot.lane.b32.xlu0 %v4193_v32, %s4010_s9 }
 0x305   :  { %973 = vrot.lane.b32.xlu1 %v331_v35, %s4010_s9 }
 0x309   :  { %448 = vrot.lane.b32.xlu1 %v4193_v32, %s4011_s10 }
 0x367   :  { %v548_v43 = vpop.permute.xlu1 %547 }
 0x369   :  { %v550_v44 = vpop.permute.xlu0 %549 }
 0x36a   :  { %v555_v45 = vsel %vm334_vm3, %v550_v44, 0 }
 0x36b   :  { %3547 = vmatpush3.bf16.xpose.msra.mxu0 %v555_v45  ;;  %v598_v46 = vpop.permute.xlu1 %597 }
 0x36c   :  { %3552 = vmatprep.subr.bf16.mxu0 %v4005_v1  ;;  %v600_v49 = vsel %vm334_vm3, %v598_v46, 0 }
 0x36d   :  { %v761_v55 = vpop.permute.xlu0 %760 }
 0x36f   :  { %v763_v47 = vpop.permute.xlu1 %762 }
 0x370   :  { %v768_v52 = vsel %vm334_vm3, %v763_v47, 0 }
 0x371   :  { %v976_v57 = vpop.permute.xlu0 %975 }
 0x372   :  { %3549 = vmatmul.mubr.msk.bf16.vlgmr.msra.gmra.mrb[12].mxu0 %vm334_vm3, %v548_v43  ;;  %v981_v62 = vsel %vm334_vm3, %v976_v57, 0 }
 0x373   :  { %3553 = vmatpush3.bf16.xpose.msra.mxu0 %v600_v49  ;;  %v811_v50 = vpop.permute.xlu1 %810  ;;  %3554 = vmatprep.mubr.msk.bf16.mxu0 %vm4006_vm0, %v4005_v1 }
 0x374   :  { %3570 = vmatprep.subr.bf16.mxu0 %v4005_v1  ;;  %v813_v56 = vsel %vm334_vm3, %v811_v50, 0 }
 0x375   :  { %v1024_v2 = vpop.permute.xlu0 %1023 }
 0x376   :  { %v1026_v3 = vsel %vm334_vm3, %v1024_v2, 0 }
 0x377   :  { %v974_v51 = vpop.permute.xlu1 %973 }
 0x37a   :  { %3555 = vmatmul.mubr.msk.bf16.vlgmr.msra.gmra.mrb[16].mxu0 %vm334_vm3, %v548_v43 }
 0x37b   :  { %3571 = vmatpush3.bf16.xpose.msra.mxu0 %v768_v52  ;;  %v449_v53 = vpop.permute.xlu1 %448  ;;  %3572 = vmatprep.mubr.msk.bf16.mxu0 %vm4006_vm0, %v4005_v1 }
 0x37c   :  { %v455_v54 = vsel %vm453_vm4, %v449_v53, 0  ;;  %3576 = vmatprep.subr.bf16.mxu0 %v4005_v1 }
 0x37d   :  { %3535 = vmatpush3.bf16.msra.mxu1 %v455_v54 }
 0x37e   :  { %3540 = vmatprep.subr.bf16.mxu1 %v4005_v1 }
 0x382   :  { %3573 = vmatmul.mubr.msk.bf16.vlgmr.msra.gmra.mrb[20].mxu0 %vm334_vm3, %v761_v55 }
 0x383   :  { %3577 = vmatpush3.bf16.xpose.msra.mxu0 %v813_v56  ;;  %3578 = vmatprep.mubr.msk.bf16.mxu0 %vm4006_vm0, %v4005_v1 }
 0x384   :  { %3594 = vmatprep.subr.bf16.mxu0 %v4005_v1 }
 0x38a   :  { %3579 = vmatmul.mubr.msk.bf16.vlgmr.msra.gmra.mrb[24].mxu0 %vm334_vm3, %v761_v55 }
 0x38b   :  { %3595 = vmatpush3.bf16.xpose.msra.mxu0 %v981_v62  ;;  %3596 = vmatprep.mubr.msk.bf16.mxu0 %vm4006_vm0, %v4005_v1 }
 0x38c   :  { %3600 = vmatprep.subr.bf16.mxu0 %v4005_v1 }
 0x392   :  { %3597 = vmatmul.mubr.msk.bf16.vlgmr.msra.gmra.mrb[28].mxu0 %vm334_vm3, %v974_v51 }
 0x393   :  { %3601 = vmatpush3.bf16.xpose.msra.mxu0 %v1026_v3  ;;  %3602 = vmatprep.mubr.msk.bf16.mxu0 %vm4006_vm0, %v4005_v1 }
 0x394   :  { %3618 = vmatprep.subr.bf16.mxu0 %v4005_v1 }
 0x39a   :  { %3603 = vmatmul.mubr.msk.bf16.vlgmr.msra.gmra.mrb[32].mxu0 %vm334_vm3, %v974_v51 }
 0x39b   :  { %3626 = vmatprep.mubr.msk.bf16.mxu0 %vm4006_vm0, %v4005_v1 }
 0x3cf   :  { %v418_v7 = vpop.f32.mrb[8].mxu0 }
 0x3d0   :  { %v419_v8 = vadd.f32 %v418_v7, %v4261_v4  ;;  %v3532_v12 = vpop.f32.mrb[9].mxu0 }
 0x3d1   :  { %v421_v14 = vpop.f32.mrb[10].mxu0 }
 0x3d2   :  { %v375_v15 = vpop.f32.mrb[4].mxu1  ;;  %v3533_v16 = vpop.f32.mrb[11].mxu0  ;;  %v428_v17 = vsel %vm427_vm5, %v419_v8, -inf }
 0x3d3   :  { %v4271_v18 = vadd.f32 %v375_v15, %v4267_v13  ;;  %v3526_v19 = vpop.f32.mrb[5].mxu1  ;;  %429 = vmax.xlane.f32.xlu0 %v428_v17 }
 0x3d4   :  { %v378_v20 = vpop.f32.mrb[6].mxu1 }
 0x3d5   :  { %v3527_v21 = vpop.f32.mrb[7].mxu1  ;;  %v424_v22 = vsel %vm334_vm3, %v4271_v18, -inf }
 0x3d6   :  { %425 = vmax.xlane.f32.xlu1 %v424_v22 }
 0x3e7   :  { %664 = vrot.lane.b32.xlu1 %v4193_v32, %s4012_s15 }
 0x3eb   :  { %712 = vrot.lane.b32.xlu1 %v4197_v40, %s4012_s15 }
 0x445   :  { %v591_v23 = vpop.f32.mrb[12].mxu0 }
 0x446   :  { %v4280_v24 = vadd.f32 %v591_v23, %v4267_v13  ;;  %v3550_v25 = vpop.f32.mrb[13].mxu0 }
 0x447   :  { %v594_v28 = vpop.f32.mrb[14].mxu0 }
 0x448   :  { %v3551_v11 = vpop.f32.mrb[15].mxu0  ;;  %v642_v30 = vsel %vm334_vm3, %v4280_v24, -inf }
 0x449   :  { %643 = vmax.xlane.f32.xlu0 %v642_v30 }
 0x44d   :  { %v636_v31 = vpop.f32.mrb[16].mxu0 }
 0x44e   :  { %v4285_v33 = vadd.f32 %v636_v31, %v4261_v4  ;;  %v3556_v34 = vpop.f32.mrb[17].mxu0 }
 0x44f   :  { %v639_v35 = vpop.f32.mrb[18].mxu0 }
 0x450   :  { %v3557_v36 = vpop.f32.mrb[19].mxu0  ;;  %v645_v37 = vsel %vm427_vm5, %v4285_v33, -inf }
 0x451   :  { %646 = vmax.xlane.f32.xlu0 %v645_v37 }
 0x455   :  { %v804_v38 = vpop.f32.mrb[20].mxu0 }
 0x456   :  { %v3574_v39 = vpop.f32.mrb[21].mxu0  ;;  %v805_v15 = vadd.f32 %v804_v38, %v4267_v13 }
 0x457   :  { %v807_v41 = vpop.f32.mrb[22].mxu0 }
 0x458   :  { %v3575_v42 = vpop.f32.mrb[23].mxu0  ;;  %v855_v17 = vsel %vm334_vm3, %v805_v15, -inf }
 0x45d   :  { %v849_v43 = vpop.f32.mrb[24].mxu0 }
 0x45e   :  { %v3580_v44 = vpop.f32.mrb[25].mxu0  ;;  %v850_v16 = vadd.f32 %v849_v43, %v4261_v4 }
 0x45f   :  { %v852_v45 = vpop.f32.mrb[26].mxu0 }
 0x460   :  { %v3581_v46 = vpop.f32.mrb[27].mxu0  ;;  %v430_v47 = vpop.xlane.xlu0 %429  ;;  %v858_v20 = vsel %vm427_vm5, %v850_v16, -inf }
 0x463   :  { %v426_v49 = vpop.xlane.xlu1 %425 }
 0x464   :  { %v431_v50 = vmax.f32 %v426_v49, %v430_v47 }
 0x465   :  { %v1017_v51 = vpop.f32.mrb[28].mxu0 }
 0x466   :  { %v435_v52 = vsub.f32 %v419_v8, %v431_v50  ;;  %v4290_v53 = vadd.f32 %v1017_v51, %v4267_v13  ;;  %v3598_v54 = vpop.f32.mrb[29].mxu0  ;;  %v432_v22 = vsub.f32 %v4271_v18, %v431_v50 }
 0x467   :  { %498 = vrot.lane.b32.xlu0 %v4197_v40, %s4011_s10  ;;  %v1020_v55 = vpop.f32.mrb[30].mxu0  ;;  %v665_v35 = vpop.permute.xlu1 %664 }
 0x468   :  { %v436_v56 = vmul.f32 1.442695, %v435_v52  ;;  %v3599_v57 = vpop.f32.mrb[31].mxu0  ;;  %v1068_v62 = vsel %vm334_vm3, %v4290_v53, -inf  ;;  %v433_v23 = vmul.f32 1.442695, %v432_v22 }
 0x469   :  { %1069 = vmax.xlane.f32.xlu1 %v1068_v62  ;;  %v670_v18 = vsel %vm453_vm4, %v665_v35, 0 }
 0x46a   :  { %3913 = vpow2.f32 %v436_v56 }
 0x46b   :  { %3915 = vpow2.f32 %v433_v23  ;;  %v713_v42 = vpop.permute.xlu1 %712 }
 0x46d   :  { %v1062_v2 = vpop.f32.mrb[32].mxu0 }
 0x46e   :  { %v3604_v3 = vpop.f32.mrb[33].mxu0  ;;  %v1063_v19 = vadd.f32 %v1062_v2, %v4261_v4 }
 0x46f   :  { %v1065_v7 = vpop.f32.mrb[34].mxu0 }
 0x470   :  { %v3605_v12 = vpop.f32.mrb[35].mxu0  ;;  %v1071_v21 = vsel %vm427_vm5, %v1063_v19, -inf }
 0x474   :  { %v4296_v8 = vpop.eup %3913 }
 0x475   :  { %v446_v14 = vpack.c.bf16 %v4296_v8, %v4296_v8  ;;  %v4318_v11 = vpop.eup %3915 }
 0x476   :  { %v438_v23 = vsel %vm334_vm3, %v4318_v11, 0.0 }
 0x477   :  { %3537 = vmatmul.mubr.msk.bf16.vlgmr.msra.gmra.mrb[8].mxu1 %vm427_vm5, %v446_v14 }
 0x478   :  { %3542 = vmatprep.mubr.msk.bf16.mxu1 %vm4006_vm0, %v4005_v1 }
 0x47a   :  { %925 = vrot.lane.b32.xlu1 %v4197_v40, %s4013_s16 }
 0x47e   :  { %1090 = vrot.lane.b32.xlu1 %v4193_v32, %s4014_s17 }
 0x482   :  { %1138 = vrot.lane.b32.xlu1 %v4197_v40, %s4014_s17 }
 0x486   :  { %856 = vmax.xlane.f32.xlu0 %v855_v17 }
 0x48a   :  { %859 = vmax.xlane.f32.xlu0 %v858_v20 }
 0x48e   :  { %1072 = vmax.xlane.f32.xlu0 %v1071_v21 }
 0x4a4   :  { %877 = vrot.lane.b32.xlu0 %v4193_v32, %s4013_s16  ;;  %v445_v32 = vpack.c.bf16 %v4318_v11, %v4318_v11 }
 0x4d6   :  { %v644_v40 = vpop.xlane.xlu0 %643 }
 0x4de   :  { %v647_v25 = vpop.xlane.xlu0 %646 }
 0x4df   :  { %v648_v28 = vmax.f32 %v644_v40, %v647_v25  ;;  %v441_v25 = vsel %vm427_vm5, %v4296_v8, 0.0  ;;  %v3823_v8 = vld [vmem:[%s4871_s3 + $0x4] ss:$16 sps:$4 sm:$0xff]  }
 0x4e1   :  { %v649_v30 = vsub.f32 %v4280_v24, %v648_v28  ;;  %v652_v31 = vsub.f32 %v4285_v33, %v648_v28 }
 0x4e2   :  { %v499_v34 = vpop.permute.xlu0 %498 }
 0x4e3   :  { %v650_v36 = vmul.f32 1.442695, %v649_v30  ;;  %v653_v37 = vmul.f32 1.442695, %v652_v31  ;;  %3541 = vmatpush3.bf16.msra.mxu1 %v499_v34  ;;  %v3824_v34 = vld [vmem:[%s4871_s3 + $0x44] ss:$16 sps:$4 sm:$0xff]  }
 0x4e4   :  { %3558 = vmatprep.subr.bf16.mxu1 %v4005_v1 }
 0x4e5   :  { %3917 = vpow2.f32 %v650_v36  ;;  %v3825_v36 = vld [vmem:[%s4871_s3 + $0x24] ss:$16 sps:$4 sm:$0xff]  }
 0x4e6   :  { %3919 = vpow2.f32 %v653_v37  ;;  %3543 = vmatmul.mubr.msk.bf16.vlgmr.msra.gmra.mrb[8].mxu1 %vm334_vm3, %v445_v32 }
 0x4e7   :  { %3559 = vmatpush3.bf16.msra.mxu1 %v670_v18  ;;  %3560 = vmatprep.mubr.msk.bf16.mxu1 %vm4006_vm0, %v4005_v1 }
 0x4e8   :  { %3564 = vmatprep.subr.bf16.mxu1 %v4005_v1 }
 0x4ef   :  { %v3918_v24 = vpop.eup %3917 }
 0x4f0   :  { %v3920_v33 = vpop.eup %3919  ;;  %v655_v38 = vsel %vm334_vm3, %v3918_v24, 0.0  ;;  %v662_v43 = vpack.c.bf16 %v3918_v24, %v3918_v24 }
 0x4f1   :  { %v658_v39 = vsel %vm427_vm5, %v3920_v33, 0.0  ;;  %656 = vadd.xlane.f32.xlu1 %v655_v38  ;;  %v663_v41 = vpack.c.bf16 %v3920_v33, %v3920_v33 }
 0x4f2   :  { %659 = vadd.xlane.f32.xlu0 %v658_v39 }
 0x4f3   :  { %3561 = vmatmul.mubr.msk.bf16.vlgmr.msra.gmra.mrb[12].mxu1 %vm427_vm5, %v663_v41 }
 0x4f4   :  { %3565 = vmatpush3.bf16.msra.mxu1 %v713_v42  ;;  %3566 = vmatprep.mubr.msk.bf16.mxu1 %vm4006_vm0, %v4005_v1 }
 0x4f5   :  { %3582 = vmatprep.subr.bf16.mxu1 %v4005_v1 }
 0x4f6   :  { %v1070_v50 = vpop.xlane.xlu1 %1069 }
 0x4ff   :  { %3567 = vmatmul.mubr.msk.bf16.vlgmr.msra.gmra.mrb[12].mxu1 %vm334_vm3, %v662_v43 }
 0x500   :  { %3584 = vmatprep.mubr.msk.bf16.mxu1 %vm4006_vm0, %v4005_v1 }
 0x513   :  { %v857_v44 = vpop.xlane.xlu0 %856 }
 0x517   :  { %v860_v45 = vpop.xlane.xlu0 %859 }
 0x518   :  { %v861_v46 = vmax.f32 %v857_v44, %v860_v45 }
 0x51a   :  { %v862_v47 = vsub.f32 %v805_v15, %v861_v46  ;;  %v865_v49 = vsub.f32 %v850_v16, %v861_v46 }
 0x51b   :  { %v1073_v51 = vpop.xlane.xlu0 %1072 }
 0x51c   :  { %v863_v52 = vmul.f32 1.442695, %v862_v47  ;;  %v866_v54 = vmul.f32 1.442695, %v865_v49  ;;  %v1074_v55 = vmax.f32 %v1070_v50, %v1073_v51 }
 0x51e   :  { %3921 = vpow2.f32 %v863_v52  ;;  %v1075_v56 = vsub.f32 %v4290_v53, %v1074_v55  ;;  %v1078_v57 = vsub.f32 %v1063_v19, %v1074_v55  ;;  %v926_v53 = vpop.permute.xlu1 %925 }
 0x51f   :  { %3923 = vpow2.f32 %v866_v54  ;;  %v878_v62 = vpop.permute.xlu0 %877 }
 0x520   :  { %v1076_v2 = vmul.f32 1.442695, %v1075_v56  ;;  %v1079_v3 = vmul.f32 1.442695, %v1078_v57  ;;  %v883_v7 = vsel %vm453_vm4, %v878_v62, 0 }
 0x521   :  { %3583 = vmatpush3.bf16.msra.mxu1 %v883_v7 }
 0x522   :  { %3925 = vpow2.f32 %v1076_v2  ;;  %3588 = vmatprep.subr.bf16.mxu1 %v4005_v1  ;;  %v1091_v40 = vpop.permute.xlu1 %1090 }
 0x523   :  { %3927 = vpow2.f32 %v1079_v3  ;;  %v1096_v30 = vsel %vm453_vm4, %v1091_v40, 0 }
 0x526   :  { %v1139_v11 = vpop.permute.xlu1 %1138 }
 0x528   :  { %v3922_v12 = vpop.eup %3921 }
 0x529   :  { %v3924_v14 = vpop.eup %3923  ;;  %v868_v15 = vsel %vm334_vm3, %v3922_v12, 0.0  ;;  %v875_v28 = vpack.c.bf16 %v3922_v12, %v3922_v12 }
 0x52a   :  { %869 = vadd.xlane.f32.xlu0 %v868_v15  ;;  %v876_v16 = vpack.c.bf16 %v3924_v14, %v3924_v14  ;;  %v871_v19 = vsel %vm427_vm5, %v3924_v14, 0.0 }
 0x52c   :  { %v3926_v17 = vpop.eup %3925  ;;  %3585 = vmatmul.mubr.msk.bf16.vlgmr.msra.gmra.mrb[16].mxu1 %vm427_vm5, %v876_v16 }
 0x52d   :  { %3589 = vmatpush3.bf16.msra.mxu1 %v926_v53  ;;  %v1081_v20 = vsel %vm334_vm3, %v3926_v17, 0.0  ;;  %3590 = vmatprep.mubr.msk.bf16.mxu1 %vm4006_vm0, %v4005_v1  ;;  %v3928_v21 = vpop.eup %3927  ;;  %v1088_v35 = vpack.c.bf16 %v3926_v17, %v3926_v17 }
 0x52e   :  { %872 = vadd.xlane.f32.xlu0 %v871_v19  ;;  %1082 = vadd.xlane.f32.xlu1 %v1081_v20  ;;  %v1084_v22 = vsel %vm427_vm5, %v3928_v21, 0.0  ;;  %v1089_v31 = vpack.c.bf16 %v3928_v21, %v3928_v21  ;;  %v3826_v19 = vld [vmem:[%s4871_s3 + $0x64] ss:$16 sps:$4 sm:$0xff]  }
 0x52f   :  { %3606 = vmatprep.subr.bf16.mxu1 %v4005_v1 }
 0x532   :  { %1085 = vadd.xlane.f32.xlu0 %v1084_v22  ;;  %439 = vadd.xlane.f32.xlu1 %v438_v23 }
 0x536   :  { %442 = vadd.xlane.f32.xlu0 %v441_v25 }
 0x538   :  { %3591 = vmatmul.mubr.msk.bf16.vlgmr.msra.gmra.mrb[16].mxu1 %vm334_vm3, %v875_v28 }
 0x539   :  { %3607 = vmatpush3.bf16.msra.mxu1 %v1096_v30  ;;  %3608 = vmatprep.mubr.msk.bf16.mxu1 %vm4006_vm0, %v4005_v1 }
 0x53a   :  { %3612 = vmatprep.subr.bf16.mxu1 %v4005_v1 }
 0x540   :  { %3609 = vmatmul.mubr.msk.bf16.vlgmr.msra.gmra.mrb[20].mxu1 %vm427_vm5, %v1089_v31 }
 0x541   :  { %3613 = vmatpush3.bf16.msra.mxu1 %v1139_v11  ;;  %3614 = vmatprep.mubr.msk.bf16.mxu1 %vm4006_vm0, %v4005_v1 }
 0x543   :  { %1231 = vrot.lane.b32.xlu1 %v3823_v8, %s4011_s10 }
 0x547   :  { %1235 = vrot.lane.b32.xlu1 %v3824_v34, %s4011_s10 }
 0x54c   :  { %3615 = vmatmul.mubr.msk.bf16.vlgmr.msra.gmra.mrb[20].mxu1 %vm334_vm3, %v1088_v35  ;;  %1233 = vrot.lane.b32.xlu0 %v3825_v36, %s4011_s10 }
 0x54d   :  { %1394 = vmatprep.mubr.bf16.mxu1 %v4007_v48 }
 0x57e   :  { %v657_v32 = vpop.xlane.xlu1 %656 }
 0x57f   :  { %v660_v37 = vpop.xlane.xlu0 %659 }
 0x580   :  { %v661_v47 = vadd.f32 %v660_v37, %v657_v32 }
 0x5b7   :  { %v870_v18 = vpop.xlane.xlu0 %869 }
 0x5b9   :  { %v538_v24 = vpop.f32.mrb[8].mxu1 }
 0x5ba   :  { %v3544_v33 = vpop.f32.mrb[9].mxu1 }
 0x5bb   :  { %v873_v38 = vpop.xlane.xlu0 %872  ;;  %v1083_v39 = vpop.xlane.xlu1 %1082 }
 0x5bc   :  { %v541_v41 = vpop.f32.mrb[10].mxu1  ;;  %v874_v2 = vadd.f32 %v873_v38, %v870_v18 }
 0x5bd   :  { %v3545_v42 = vpop.f32.mrb[11].mxu1 }
 0x5bf   :  { %v1086_v43 = vpop.xlane.xlu0 %1085  ;;  %v440_v44 = vpop.xlane.xlu1 %439 }
 0x5c0   :  { %v1087_v20 = vadd.f32 %v1086_v43, %v1083_v39 }
 0x5c3   :  { %v443_v45 = vpop.xlane.xlu0 %442  ;;  %v1232_v46 = vpop.permute.xlu1 %1231 }
 0x5c4   :  { %v444_v49 = vadd.f32 %v443_v45, %v440_v44  ;;  %3619 = vmatpush3.bf16.msra.mxu0 %v1232_v46  ;;  %v3827_v46 = vld [vmem:[%s4871_s3 + $0x8] ss:$16 sps:$4 sm:$0xff]  }
 0x5c5   :  { %3620 = vmatprep.subr.bf16.mxu0 %v4005_v1 }
 0x5c6   :  { %3929 = vrcp.f32 %v444_v49  ;;  %v3830_v49 = vld [vmem:[%s4871_s3 + $0x28] ss:$16 sps:$4 sm:$0xff]  }
 0x5c7   :  { %3931 = vrcp.f32 %v661_v47  ;;  %v1234_v3 = vpop.permute.xlu0 %1233  ;;  %v1236_v7 = vpop.permute.xlu1 %1235  ;;  %v3832_v47 = vld [vmem:[%s4871_s3 + $0x2c] ss:$16 sps:$4 sm:$0xff]  }
 0x5c8   :  { %3933 = vrcp.f32 %v874_v2  ;;  %3621 = vmatpush3.bf16.msra.mxu0 %v1234_v3 }
 0x5c9   :  { %3622 = vmatprep.subr.bf16.mxu0 %v4005_v1  ;;  %3935 = vrcp.f32 %v1087_v20  ;;  %v3839_v20 = vld [vmem:[%s4871_s3 + $0x80] ss:$16 sps:$4 sm:$0xff]  }
 0x5cc   :  { %3623 = vmatpush3.bf16.msra.mxu0 %v1236_v7 }
 0x5cd   :  { %3624 = vmatprep.subr.bf16.mxu0 %v4005_v1 }
 0x5d0   :  { %v3930_v50 = vpop.eup %3929 }
 0x5d1   :  { %v545_v51 = vmul.f32 %v3930_v50, %v538_v24  ;;  %v3932_v52 = vpop.eup %3931  ;;  %v3835_v50 = vld [vmem:[%s4871_s3 + $0x4c] ss:$16 sps:$4 sm:$0xff]  }
 0x5d2   :  { %v752_v54 = vpop.f32.mrb[12].mxu1  ;;  %v3934_v12 = vpop.eup %3933 }
 0x5d3   :  { %v759_v55 = vmul.f32 %v3932_v52, %v752_v54  ;;  %v3568_v56 = vpop.f32.mrb[13].mxu1  ;;  %v3936_v21 = vpop.eup %3935  ;;  %v3838_v52 = vld [vmem:[%s4871_s3 + $0x6c] ss:$16 sps:$4 sm:$0xff]   ;;  %v3836_v54 = vld [vmem:[%s4871_s3 + $0x68] ss:$16 sps:$4 sm:$0xff]  }
 0x5d4   :  { %v755_v57 = vpop.f32.mrb[14].mxu1  ;;  %v3844_v56 = vld [vmem:[%s4872_s4] sm:$0xff]  }
 0x5d5   :  { %1187 = vrot.lane.b32.xlu1 %v759_v55, %s4014_s17  ;;  %v3569_v62 = vpop.f32.mrb[15].mxu1  ;;  %v3843_v55 = vld [vmem:[%s4872_s4 + $0x40] sm:$0xff]   ;;  %v3845_v57 = vld [vmem:[%s4872_s4 + $0x48] sm:$0xff]  }
 0x5d6   :  { %v3846_v62 = vld [vmem:[%s4872_s4 + $0x8] sm:$0xff]  }
 0x60b   :  { %v965_v14 = vpop.f32.mrb[16].mxu1 }
 0x60c   :  { %v972_v15 = vmul.f32 %v3934_v12, %v965_v14  ;;  %v3592_v16 = vpop.f32.mrb[17].mxu1  ;;  %v1307_v12 = vsub.s32 1, %v4078_v9  ;;  %v1303_v14 = vrot.slane %v4154_v60, %v38_v10  ;;  %v3840_v10 = vld [vmem:[%s4871_s3 + $0xa0] ss:$16 sps:$4 sm:$0xff]  }
 0x60d   :  { %v968_v17 = vpop.f32.mrb[18].mxu1 }
 0x60e   :  { %1191 = vrot.lane.b32.xlu1 %v972_v15, %s4013_s16  ;;  %v3593_v53 = vpop.f32.mrb[19].mxu1  ;;  %v1308_v17 = vrot.slane %v4154_v60, %v1307_v12  ;;  %v3841_v60 = vld [vmem:[%s4871_s3 + $0xc0] ss:$16 sps:$4 sm:$0xff]  }
 0x612   :  { %1237 = vrot.lane.b32.xlu1 %v3826_v19, %s4011_s10 }
 0x61f   :  { %v1178_v22 = vpop.f32.mrb[20].mxu1 }
 0x620   :  { %v1185_v23 = vmul.f32 %v3936_v21, %v1178_v22  ;;  %v3616_v40 = vpop.f32.mrb[21].mxu1  ;;  %v3842_v22 = vld [vmem:[%s4871_s3 + $0xe0] ss:$16 sps:$4 sm:$0xff]  }
 0x621   :  { %v1181_v25 = vpop.f32.mrb[22].mxu1  ;;  %v3848_v40 = vld [vmem:[%s4872_s4 + $0x10] sm:$0xff]  }
 0x622   :  { %1195 = vrot.lane.b32.xlu0 %v1185_v23, %s4012_s15  ;;  %v3617_v28 = vpop.f32.mrb[23].mxu1  ;;  %v3847_v23 = vld [vmem:[%s4872_s4 + $0x50] sm:$0xff]   ;;  %v3849_v25 = vld [vmem:[%s4872_s4 + $0x58] sm:$0xff]  }
 0x623   :  { %v3853_v28 = vld [vmem:[%s4872_s4 + $0x68] sm:$0xff]  }
 0x647   :  { %v1188_v30 = vpop.permute.xlu1 %1187 }
 0x648   :  { %v1198_v8 = vsel %vm334_vm3, %v545_v51, %v1188_v30  ;;  %v3833_v51 = vld [vmem:[%s4871_s3 + $0x48] ss:$16 sps:$4 sm:$0xff]  }
 0x649   :  { %v3854_v30 = vld [vmem:[%s4872_s4 + $0x28] sm:$0xff]  }
 0x680   :  { %v1192_v31 = vpop.permute.xlu1 %1191 }
 0x681   :  { %v1199_v34 = vsel %vm52_vm1, %v1198_v8, %v1192_v31  ;;  %v3855_v31 = vld [vmem:[%s4872_s4 + $0x70] sm:$0xff]   ;;  %v3857_v8 = vld [vmem:[%s4872_s4 + $0x78] sm:$0xff]  }
 0x684   :  { %v1238_v11 = vpop.permute.xlu1 %1237 }
 0x685   :  { %3625 = vmatpush3.bf16.msra.mxu0 %v1238_v11  ;;  %v3856_v11 = vld [vmem:[%s4872_s4 + $0x30] sm:$0xff]  }
 0x686   :  { %3411 = vmatprep.subr.bf16.mxu0 %v3843_v55 }
 0x694   :  { %v1196_v35 = vpop.permute.xlu0 %1195 }
 0x695   :  { %v1201_v36 = vsel %vm1200_vm6, %v1199_v34, %v1196_v35  ;;  %v3858_v34 = vld [vmem:[%s4872_s4 + $0x38] sm:$0xff]  }
 0x696   :  { %v1202_v37 = vpack.c.bf16 %v1201_v36, %v1201_v36 }
 0x698   :  { %3627 = vmatmul.mubr.msk.bf16.vlgmr.msra.gmra.mrb[36].mxu0 %vm98_vm2, %v1202_v37 }
 0x699   :  { %3412 = vmatpush3.bf16.msra.mxu0 %v3844_v56 }
 0x69a   :  { %3413 = vmatprep.subr.bf16.mxu0 %v3845_v57 }
 0x69d   :  { %3414 = vmatpush3.bf16.msra.mxu0 %v3846_v62 }
 0x69e   :  { %3415 = vmatprep.subr.bf16.mxu0 %v3847_v23 }
 0x6a1   :  { %3416 = vmatpush3.bf16.msra.mxu0 %v3848_v40 }
 0x6a2   :  { %3417 = vmatprep.subr.bf16.mxu0 %v3849_v25 }
 0x6a5   :  { %3418 = vmatpush3.bf16.msra.mxu0 %v3850_v26  ;;  %v3861_v26 = vld [vmem:[%s4871_s3 + $0x84] ss:$16 sps:$4 sm:$0xff]  }
 0x6a6   :  { %3419 = vmatprep.subr.bf16.mxu0 %v3851_v27  ;;  %v3864_v27 = vld [vmem:[%s4871_s3 + $0xa4] ss:$16 sps:$4 sm:$0xff]  }
 0x76b   :  { %v1280_v32 = vpop.f32.mrb[36].mxu0 }
 0x76c   :  { %v4391_v18 = vadd.f32 %v1280_v32, %v4074_v6  ;;  %v3628_v24 = vpop.f32.mrb[37].mxu0  ;;  %v3829_v6 = vld [vmem:[%s4871_s3 + $0xc] ss:$16 sps:$4 sm:$0xff]  }
 0x76d   :  { %v1283_v33 = vpop.f32.mrb[38].mxu0  ;;  %1362 = vmatprep.subr.bf16.mxu1 %v3829_v6 }
 0x76e   :  { %v3629_v38 = vpop.f32.mrb[39].mxu0  ;;  %v1287_v39 = vsel %vm98_vm2, %v4391_v18, 0.0  ;;  %1363 = vmatpush1.bf16.msra.mxu1 %v3827_v46 }
 0x76f   :  { %1288 = vadd.xlane.f32.xlu0 %v1287_v39  ;;  %1364 = vmatprep.subr.bf16.mxu1 %v3832_v47 }
 0x772   :  { %1365 = vmatpush1.bf16.msra.mxu1 %v3830_v49 }
 0x773   :  { %1366 = vmatprep.subr.bf16.mxu1 %v3835_v50 }
 0x776   :  { %1367 = vmatpush1.bf16.msra.mxu1 %v3833_v51 }
 0x777   :  { %1368 = vmatprep.subr.bf16.mxu1 %v3838_v52 }
 0x77a   :  { %1369 = vmatpush1.bf16.msra.mxu1 %v3836_v54 }
 0x77b   :  { %3630 = vmatprep.subr.bf16.mxu1 %v4005_v1 }
 0x7fc   :  { %v1289_v41 = vpop.xlane.xlu0 %1288 }
 0x7fd   :  { %v1290_v42 = vmul.f32 0.015625, %v1289_v41 }
 0x7ff   :  { %v1291_v43 = vsub.f32 %v4391_v18, %v1290_v42 }
 0x801   :  { %v1292_v44 = vmul.f32 %v1291_v43, %v1291_v43 }
 0x803   :  { %v1293_v45 = vsel %vm98_vm2, %v1292_v44, 0.0 }
 0x804   :  { %1294 = vadd.xlane.f32.xlu1 %v1293_v45 }
 0x891   :  { %v1295_v2 = vpop.xlane.xlu1 %1294 }
 0x892   :  { %v1296_v3 = vmul.f32 0.015625, %v1295_v2 }
 0x894   :  { %v1297_v7 = vadd.f32 1e-05, %v1296_v3 }
 0x896   :  { %3937 = vrsqrt.f32 %v1297_v7 }
 0x8a0   :  { %v3938_v15 = vpop.eup %3937 }
 0x8a1   :  { %v1299_v16 = vmul.f32 %v3938_v15, %v1291_v43 }
 0x8a3   :  { %v1304_v53 = vmul.f32 %v1303_v14, %v1299_v16 }
 0x8a5   :  { %v1309_v19 = vadd.f32 %v1308_v17, %v1304_v53 }
 0x8a7   :  { %v1310_v21 = vpack.c.bf16 %v1309_v19, %v1309_v19 }
 0x8a9   :  { %3220 = vmatmul.mubr.msk.bf16.vlgmr.msra.gmra.mrb[24].mxu1 %vm98_vm2, %v1310_v21 }
 0x8aa   :  { %3631 = vmatpush3.bf16.msra.mxu1 %v3839_v20  ;;  %3638 = vmatprep.mubr.msk.bf16.mxu1 %vm4006_vm0, %v4005_v1 }
 0x8ab   :  { %3632 = vmatprep.subr.bf16.mxu1 %v4005_v1 }
 0x8ae   :  { %3633 = vmatpush3.bf16.msra.mxu1 %v3840_v10 }
 0x8af   :  { %3634 = vmatprep.subr.bf16.mxu1 %v4005_v1 }
 0x8b2   :  { %3635 = vmatpush3.bf16.msra.mxu1 %v3841_v60 }
 0x8b3   :  { %3636 = vmatprep.subr.bf16.mxu1 %v4005_v1 }
 0x8b6   :  { %3637 = vmatpush3.bf16.msra.mxu1 %v3842_v22 }
 0x8b7   :  { %1757 = vmatprep.subr.bf16.mxu1 %v3861_v26 }
 0x8b9   :  { %3639 = vmatmul.mubr.msk.bf16.vlgmr.msra.gmra.mrb[28].mxu1 %vm98_vm2, %v1604_v29  ;;  %v3852_v29 = vld [vmem:[%s4872_s4 + $0x20] sm:$0xff]  }
 0x8ba   :  { %1789 = vmatprep.mubr.bf16.mxu1 %v4007_v48  ;;  %3420 = vmatpush3.bf16.msra.mxu0 %v3852_v29  ;;  %v3862_v29 = vld [vmem:[%s4871_s3 + $0xa0] ss:$16 sps:$4 sm:$0xff]  }
 0x8bb   :  { %3421 = vmatprep.subr.bf16.mxu0 %v3853_v28  ;;  %v3867_v28 = vld [vmem:[%s4871_s3 + $0xc4] ss:$16 sps:$4 sm:$0xff]  }
 0x8be   :  { %3422 = vmatpush3.bf16.msra.mxu0 %v3854_v30  ;;  %v3865_v30 = vld [vmem:[%s4871_s3 + $0xc0] ss:$16 sps:$4 sm:$0xff]  }
 0x8bf   :  { %3423 = vmatprep.subr.bf16.mxu0 %v3855_v31  ;;  %v3870_v31 = vld [vmem:[%s4871_s3 + $0xe4] ss:$16 sps:$4 sm:$0xff]  }
 0x8c2   :  { %3424 = vmatpush3.bf16.msra.mxu0 %v3856_v11  ;;  %v3868_v11 = vld [vmem:[%s4871_s3 + $0xe0] ss:$16 sps:$4 sm:$0xff]  }
 0x8c3   :  { %3425 = vmatprep.subr.bf16.mxu0 %v3857_v8 }
 0x8c6   :  { %3426 = vmatpush3.bf16.msra.mxu0 %v3858_v34 }
 0x8c7   :  { %3642 = vmatprep.subr.bf16.mxu0 %v4005_v1 }
 0x97c   :  { %v1396_v35 = vpop.f32.mrb[24].mxu1 }
 0x97d   :  { %v1405_v36 = vmul.f32 %v1396_v35, %v1396_v35  ;;  %v1398_v37 = vpop.f32.mrb[25].mxu1  ;;  %v1403_v55 = vmul.f32 0.5, %v1396_v35 }
 0x97e   :  { %v1406_v32 = vmul.f32 %v1398_v37, %v1398_v37  ;;  %v1400_v24 = vpop.f32.mrb[26].mxu1  ;;  %v1404_v57 = vmul.f32 0.5, %v1398_v37 }
 0x97f   :  { %v1407_v33 = vmul.f32 %v1405_v36, %v1396_v35  ;;  %v1401_v38 = vpop.f32.mrb[27].mxu1  ;;  %v4545_v36 = vld [vmem:[%s4873_s5 + $0x8] sm:$0xff] }
 0x980   :  { %v1408_v39 = vmul.f32 %v1406_v32, %v1398_v37 }
 0x981   :  { %v1409_v41 = vmul.f32 0.044715, %v1407_v33  ;;  %v1626_v33 = vrot.slane %v4545_v36, %v134_v63 }
 0x982   :  { %v1410_v42 = vmul.f32 0.044715, %v1408_v39 }
 0x983   :  { %v1411_v43 = vadd.f32 %v1409_v41, %v1396_v35 }
 0x984   :  { %v1412_v44 = vadd.f32 %v1410_v42, %v1398_v37  ;;  %v1621_v37 = vrot.slane %v4545_v36, %v128_v59 }
 0x985   :  { %v1413_v45 = vmul.f32 0.7978846, %v1411_v43 }
 0x986   :  { %v1414_v6 = vmul.f32 0.7978846, %v1412_v44 }
 0x987   :  { %3939 = vtanh.f32 %v1413_v45 }
 0x988   :  { %3941 = vtanh.f32 %v1414_v6 }
 0x98c   :  { %v1699_v46 = vpop.f32.mrb[28].mxu1 }
 0x98d   :  { %v3640_v47 = vpop.f32.mrb[29].mxu1 }
 0x98e   :  { %v1702_v49 = vpop.f32.mrb[30].mxu1 }
 0x98f   :  { %v4501_v50 = vpack.c.bf16 %v1702_v49, %v1699_v46  ;;  %v3641_v51 = vpop.f32.mrb[31].mxu1 }
 0x991   :  { %v3940_v52 = vpop.eup %3939  ;;  %v1805_v15 = vsel %vm334_vm3, %v4501_v50, 0 }
 0x992   :  { %v3942_v54 = vpop.eup %3941  ;;  %v1417_v56 = vadd.f32 1.0, %v3940_v52 }
 0x993   :  { %v1418_v62 = vadd.f32 1.0, %v3942_v54 }
 0x994   :  { %v1419_v2 = vmul.f32 %v1417_v56, %v1403_v55 }
 0x995   :  { %v1420_v3 = vmul.f32 %v1418_v62, %v1404_v57 }
 0x996   :  { %v1421_v14 = vpack.c.bf16 %v1419_v2, %v1419_v2 }
 0x997   :  { %v1422_v7 = vpack.c.bf16 %v1420_v3, %v1420_v3 }
 0x999   :  { %1583 = vmatprep.mubr.bf16.mxu0 %v1422_v7 }
 0x99a   :  { %1584 = vmatmul.mubr.bf16.vlgmr.msra.gmra.mrb[40].mxu0 %v1421_v14 }
 0x99b   :  { %3643 = vmatpush3.bf16.xpose.msra.mxu0 %v1805_v15  ;;  %3644 = vmatprep.mubr.msk.bf16.mxu0 %vm4006_vm0, %v4005_v1 }
 0x99c   :  { %3648 = vmatprep.subr.bf16.mxu0 %v4005_v1 }
 0xa6d   :  { %v3427_v16 = vpop.f32.mrb[40].mxu0 }
 0xa6e   :  { %v3428_v17 = vpop.f32.mrb[41].mxu0 }
 0xa6f   :  { %v3429_v53 = vadd.f32 %v3428_v17, %v3427_v16  ;;  %v3430_v19 = vpop.f32.mrb[42].mxu0 }
 0xa70   :  { %v3431_v20 = vpop.f32.mrb[43].mxu0 }
 0xa71   :  { %v4509_v21 = vadd.f32 %v3429_v53, %v4391_v18  ;;  %v3859_v18 = vld [vmem:[%s4871_s3 + $0x80] ss:$16 sps:$4 sm:$0xff]  }
 0xa72   :  { %1758 = vmatpush1.bf16.msra.mxu1 %v3859_v18 }
 0xa73   :  { %v1605_v10 = vsel %vm98_vm2, %v4509_v21, 0.0  ;;  %1759 = vmatprep.subr.bf16.mxu1 %v3864_v27 }
 0xa74   :  { %1606 = vadd.xlane.f32.xlu0 %v1605_v10 }
 0xa76   :  { %1760 = vmatpush1.bf16.msra.mxu1 %v3862_v29 }
 0xa77   :  { %1761 = vmatprep.subr.bf16.mxu1 %v3867_v28 }
 0xa7a   :  { %1762 = vmatpush1.bf16.msra.mxu1 %v3865_v30 }
 0xa7b   :  { %1763 = vmatprep.subr.bf16.mxu1 %v3870_v31 }
 0xa7e   :  { %1764 = vmatpush1.bf16.msra.mxu1 %v3868_v11 }
 0xa7f   :  { %3654 = vmatprep.subr.bf16.mxu1 %v4005_v1 }
 0xb01   :  { %v1607_v60 = vpop.xlane.xlu0 %1606 }
 0xb02   :  { %v1608_v22 = vmul.f32 0.015625, %v1607_v60 }
 0xb04   :  { %v1609_v23 = vsub.f32 %v4509_v21, %v1608_v22 }
 0xb06   :  { %v1610_v40 = vmul.f32 %v1609_v23, %v1609_v23 }
 0xb08   :  { %v1611_v25 = vsel %vm98_vm2, %v1610_v40, 0.0 }
 0xb09   :  { %1612 = vadd.xlane.f32.xlu0 %v1611_v25 }
 0xb1f   :  { %2013 = vrot.lane.b32.xlu0 %v4501_v50, %s4008_s1 }
 0xb96   :  { %v1613_v8 = vpop.xlane.xlu0 %1612 }
 0xb97   :  { %v1614_v34 = vmul.f32 0.015625, %v1613_v8 }
 0xb99   :  { %v1615_v35 = vadd.f32 1e-05, %v1614_v34 }
 0xb9a   :  { %v2014_v63 = vpop.permute.xlu0 %2013 }
 0xb9b   :  { %3943 = vrsqrt.f32 %v1615_v35  ;;  %v2019_v47 = vsel %vm334_vm3, %v2014_v63, 0 }
 0xba5   :  { %v3944_v32 = vpop.eup %3943 }
 0xba6   :  { %v1617_v24 = vmul.f32 %v3944_v32, %v1609_v23 }
 0xba8   :  { %v1622_v38 = vmul.f32 %v1621_v37, %v1617_v24 }
 0xbaa   :  { %v1627_v39 = vadd.f32 %v1626_v33, %v1622_v38 }
 0xbac   :  { %v1628_v41 = vpack.c.bf16 %v1627_v39, %v1627_v39 }
 0xbae   :  { %3266 = vmatmul.mubr.msk.bf16.vlgmr.msra.gmra.mrb[32].mxu1 %vm98_vm2, %v1628_v41 }
 0xbaf   :  { %3656 = vmatprep.mubr.msk.bf16.mxu1 %vm4006_vm0, %v4005_v1 }
 0xc81   :  { %v1791_v42 = vpop.f32.mrb[32].mxu1 }
 0xc82   :  { %v4556_v43 = vpack.c.bf16 %v1791_v42, %v1791_v42  ;;  %v1793_v44 = vpop.f32.mrb[33].mxu1 }
 0xc83   :  { %v1798_v45 = vpack.c.bf16 %v1793_v44, %v1793_v44  ;;  %v1795_v59 = vpop.f32.mrb[34].mxu1 }
 0xc84   :  { %v1796_v6 = vpop.f32.mrb[35].mxu1  ;;  %v1848_v46 = vsel %vm334_vm3, %v4556_v43, 0 }
 0xc85   :  { %2224 = vrot.lane.b32.xlu0 %v1798_v45, %s4009_s8  ;;  %2011 = vrot.lane.b32.xlu1 %v1798_v45, %s4008_s1 }
 0xc86   :  { %3645 = vmatmul.mubr.msk.bf16.vlgmr.msra.gmra.mrb[44].mxu0 %vm334_vm3, %v1798_v45 }
 0xc87   :  { %3649 = vmatpush3.bf16.xpose.msra.mxu0 %v1848_v46  ;;  %3650 = vmatprep.mubr.msk.bf16.mxu0 %vm4006_vm0, %v4005_v1 }
 0xc88   :  { %3666 = vmatprep.subr.bf16.mxu0 %v4005_v1 }
 0xc89   :  { %2439 = vrot.lane.b32.xlu0 %v4501_v50, %s4010_s9  ;;  %2061 = vrot.lane.b32.xlu1 %v4556_v43, %s4008_s1 }
 0xc8d   :  { %2487 = vrot.lane.b32.xlu0 %v4556_v43, %s4010_s9  ;;  %2226 = vrot.lane.b32.xlu1 %v4501_v50, %s4009_s8 }
 0xc8e   :  { %3651 = vmatmul.mubr.msk.bf16.vlgmr.msra.gmra.mrb[48].mxu0 %vm334_vm3, %v1798_v45 }
 0xc8f   :  { %3667 = vmatpush3.bf16.xpose.msra.mxu0 %v2019_v47  ;;  %3668 = vmatprep.mubr.msk.bf16.mxu0 %vm4006_vm0, %v4005_v1 }
 0xc90   :  { %3672 = vmatprep.subr.bf16.mxu0 %v4005_v1 }
 0xc91   :  { %2274 = vrot.lane.b32.xlu1 %v4556_v43, %s4009_s8 }
 0xc95   :  { %2437 = vrot.lane.b32.xlu1 %v1798_v45, %s4010_s9 }
 0xc99   :  { %1913 = vrot.lane.b32.xlu1 %v4556_v43, %s4011_s10 }
 0xcf7   :  { %v2012_v49 = vpop.permute.xlu1 %2011  ;;  %v2225_v62 = vpop.permute.xlu0 %2224 }
 0xcf8   :  { %3669 = vmatmul.mubr.msk.bf16.vlgmr.msra.gmra.mrb[52].mxu0 %vm334_vm3, %v2012_v49 }
 0xcf9   :  { %3674 = vmatprep.mubr.msk.bf16.mxu0 %vm4006_vm0, %v4005_v1 }
 0xcfb   :  { %v2062_v51 = vpop.permute.xlu1 %2061  ;;  %v2440_v14 = vpop.permute.xlu0 %2439 }
 0xcfc   :  { %v2064_v52 = vsel %vm334_vm3, %v2062_v51, 0  ;;  %v2445_v15 = vsel %vm334_vm3, %v2440_v14, 0 }
 0xcfd   :  { %3673 = vmatpush3.bf16.xpose.msra.mxu0 %v2064_v52 }
 0xcfe   :  { %3690 = vmatprep.subr.bf16.mxu0 %v4005_v1 }
 0xcff   :  { %v2227_v54 = vpop.permute.xlu1 %2226  ;;  %v2488_v16 = vpop.permute.xlu0 %2487 }
 0xd00   :  { %v2232_v56 = vsel %vm334_vm3, %v2227_v54, 0  ;;  %v2490_v17 = vsel %vm334_vm3, %v2488_v16, 0 }
 0xd03   :  { %v2275_v55 = vpop.permute.xlu1 %2274 }
 0xd04   :  { %3675 = vmatmul.mubr.msk.bf16.vlgmr.msra.gmra.mrb[56].mxu0 %vm334_vm3, %v2012_v49  ;;  %v2277_v3 = vsel %vm334_vm3, %v2275_v55, 0 }
 0xd05   :  { %3691 = vmatpush3.bf16.xpose.msra.mxu0 %v2232_v56  ;;  %3692 = vmatprep.mubr.msk.bf16.mxu0 %vm4006_vm0, %v4005_v1 }
 0xd06   :  { %3696 = vmatprep.subr.bf16.mxu0 %v4005_v1 }
 0xd07   :  { %v2438_v57 = vpop.permute.xlu1 %2437 }
 0xd0b   :  { %v1914_v2 = vpop.permute.xlu1 %1913 }
 0xd0c   :  { %v1919_v7 = vsel %vm453_vm4, %v1914_v2, 0  ;;  %3693 = vmatmul.mubr.msk.bf16.vlgmr.msra.gmra.mrb[60].mxu0 %vm334_vm3, %v2225_v62 }
 0xd0d   :  { %3655 = vmatpush3.bf16.msra.mxu1 %v1919_v7  ;;  %3697 = vmatpush3.bf16.xpose.msra.mxu0 %v2277_v3 }
 0xd0e   :  { %3698 = vmatprep.mubr.msk.bf16.mxu0 %vm4006_vm0, %v4005_v1  ;;  %3714 = vmatprep.subr.bf16.mxu0 %v4005_v1 }
 0xd0f   :  { %3660 = vmatprep.subr.bf16.mxu1 %v4005_v1 }
 0xd14   :  { %3699 = vmatmul.mubr.msk.bf16.vlgmr.msra.gmra.mrb[64].mxu0 %vm334_vm3, %v2225_v62 }
 0xd15   :  { %3715 = vmatpush3.bf16.xpose.msra.mxu0 %v2445_v15  ;;  %3716 = vmatprep.mubr.msk.bf16.mxu0 %vm4006_vm0, %v4005_v1 }
 0xd16   :  { %3720 = vmatprep.subr.bf16.mxu0 %v4005_v1 }
 0xd1c   :  { %3717 = vmatmul.mubr.msk.bf16.vlgmr.msra.gmra.mrb[68].mxu0 %vm334_vm3, %v2438_v57 }
 0xd1d   :  { %3721 = vmatpush3.bf16.xpose.msra.mxu0 %v2490_v17  ;;  %3722 = vmatprep.mubr.msk.bf16.mxu0 %vm4006_vm0, %v4005_v1  ;;  %v3979_v17 = vld [vmem:[%s4873_s5 + $0x18] sm:$0xff] }
 0xd1e   :  { %3738 = vmatprep.subr.bf16.mxu0 %v4005_v1 }
 0xd24   :  { %3723 = vmatmul.mubr.msk.bf16.vlgmr.msra.gmra.mrb[72].mxu0 %vm334_vm3, %v2438_v57 }
 0xd25   :  { %3746 = vmatprep.mubr.msk.bf16.mxu0 %vm4006_vm0, %v4005_v1 }
 0xd59   :  { %v1841_v53 = vpop.f32.mrb[44].mxu0 }
 0xd5a   :  { %v4615_v19 = vadd.f32 %v1841_v53, %v4267_v13  ;;  %v3646_v20 = vpop.f32.mrb[45].mxu0 }
 0xd5b   :  { %v1844_v10 = vpop.f32.mrb[46].mxu0 }
 0xd5c   :  { %v3647_v60 = vpop.f32.mrb[47].mxu0  ;;  %v1890_v22 = vsel %vm334_vm3, %v4615_v19, -inf }
 0xd5d   :  { %1891 = vmax.xlane.f32.xlu1 %v1890_v22 }
 0xd61   :  { %v1884_v23 = vpop.f32.mrb[48].mxu0 }
 0xd62   :  { %v1885_v40 = vadd.f32 %v1884_v23, %v4261_v4  ;;  %v3652_v25 = vpop.f32.mrb[49].mxu0 }
 0xd63   :  { %v1887_v26 = vpop.f32.mrb[50].mxu0 }
 0xd64   :  { %v3653_v18 = vpop.f32.mrb[51].mxu0  ;;  %v1893_v27 = vsel %vm427_vm5, %v1885_v40, -inf }
 0xd65   :  { %1894 = vmax.xlane.f32.xlu0 %v1893_v27 }
 0xd6e   :  { %2128 = vrot.lane.b32.xlu1 %v4556_v43, %s4012_s15 }
 0xd72   :  { %2176 = vrot.lane.b32.xlu1 %v4501_v50, %s4012_s15 }
 0xdcb   :  { %v2055_v29 = vpop.f32.mrb[52].mxu0 }
 0xdcc   :  { %v4626_v28 = vadd.f32 %v2055_v29, %v4267_v13  ;;  %v3670_v30 = vpop.f32.mrb[53].mxu0 }
 0xdcd   :  { %v2058_v31 = vpop.f32.mrb[54].mxu0 }
 0xdce   :  { %v3671_v11 = vpop.f32.mrb[55].mxu0  ;;  %v2106_v8 = vsel %vm334_vm3, %v4626_v28, -inf }
 0xdcf   :  { %2107 = vmax.xlane.f32.xlu0 %v2106_v8 }
 0xdd7   :  { %v2100_v34 = vpop.f32.mrb[56].mxu0 }
 0xdd8   :  { %v4631_v35 = vadd.f32 %v2100_v34, %v4261_v4  ;;  %v3676_v37 = vpop.f32.mrb[57].mxu0  ;;  %v3978_v4 = vld [vmem:[%s4873_s5 + $0x10] sm:$0xff] }
 0xdd9   :  { %v2103_v32 = vpop.f32.mrb[58].mxu0 }
 0xdda   :  { %v3677_v24 = vpop.f32.mrb[59].mxu0  ;;  %v2109_v33 = vsel %vm427_vm5, %v4631_v35, -inf }
 0xddb   :  { %2110 = vmax.xlane.f32.xlu0 %v2109_v33 }
 0xddf   :  { %v2268_v13 = vpop.f32.mrb[60].mxu0 }
 0xde0   :  { %v3694_v38 = vpop.f32.mrb[61].mxu0  ;;  %v2269_v16 = vadd.f32 %v3978_v4, %v2268_v13 }
 0xde1   :  { %v2271_v39 = vpop.f32.mrb[62].mxu0 }
 0xde2   :  { %v3695_v41 = vpop.f32.mrb[63].mxu0  ;;  %v2319_v20 = vsel %vm334_vm3, %v2269_v16, -inf }
 0xde7   :  { %v2313_v42 = vpop.f32.mrb[64].mxu0 }
 0xde8   :  { %v3700_v44 = vpop.f32.mrb[65].mxu0  ;;  %v2314_v53 = vadd.f32 %v3979_v17, %v2313_v42 }
 0xde9   :  { %v2316_v45 = vpop.f32.mrb[66].mxu0 }
 0xdea   :  { %v3701_v59 = vpop.f32.mrb[67].mxu0  ;;  %v1892_v49 = vpop.xlane.xlu1 %1891  ;;  %v2322_v60 = vsel %vm427_vm5, %v2314_v53, -inf }
 0xdee   :  { %v2129_v31 = vpop.permute.xlu1 %2128 }
 0xdef   :  { %v2481_v6 = vpop.f32.mrb[68].mxu0 }
 0xdf0   :  { %v4638_v46 = vadd.f32 %v3978_v4, %v2481_v6  ;;  %v3718_v63 = vpop.f32.mrb[69].mxu0 }
 0xdf1   :  { %1962 = vrot.lane.b32.xlu0 %v4501_v50, %s4011_s10  ;;  %v2484_v47 = vpop.f32.mrb[70].mxu0 }
 0xdf2   :  { %v1895_v51 = vpop.xlane.xlu0 %1894  ;;  %v2532_v52 = vsel %vm334_vm3, %v4638_v46, -inf  ;;  %v3719_v55 = vpop.f32.mrb[71].mxu0 }
 0xdf3   :  { %v1896_v54 = vmax.f32 %v1892_v49, %v1895_v51  ;;  %2533 = vmax.xlane.f32.xlu1 %v2532_v52  ;;  %v2177_v24 = vpop.permute.xlu1 %2176 }
 0xdf5   :  { %v1900_v56 = vsub.f32 %v1885_v40, %v1896_v54 }
 0xdf7   :  { %v1901_v57 = vmul.f32 1.442695, %v1900_v56  ;;  %v2526_v62 = vpop.f32.mrb[72].mxu0 }
 0xdf8   :  { %v3724_v2 = vpop.f32.mrb[73].mxu0  ;;  %v2527_v10 = vadd.f32 %v3979_v17, %v2526_v62 }
 0xdf9   :  { %v2529_v3 = vpop.f32.mrb[74].mxu0  ;;  %3945 = vpow2.f32 %v1901_v57 }
 0xdfa   :  { %v3725_v7 = vpop.f32.mrb[75].mxu0  ;;  %v2535_v22 = vsel %vm427_vm5, %v2527_v10, -inf }
 0xe03   :  { %v4644_v14 = vpop.eup %3945 }
 0xe04   :  { %2389 = vrot.lane.b32.xlu1 %v4501_v50, %s4013_s16  ;;  %v1911_v15 = vpack.c.bf16 %v4644_v14, %v4644_v14 }
 0xe06   :  { %3657 = vmatmul.mubr.msk.bf16.vlgmr.msra.gmra.mrb[36].mxu1 %vm427_vm5, %v1911_v15 }
 0xe07   :  { %3662 = vmatprep.mubr.msk.bf16.mxu1 %vm4006_vm0, %v4005_v1 }
 0xe08   :  { %2554 = vrot.lane.b32.xlu1 %v4556_v43, %s4014_s17 }
 0xe0c   :  { %2602 = vrot.lane.b32.xlu1 %v4501_v50, %s4014_s17  ;;  %v1897_v50 = vsub.f32 %v4615_v19, %v1896_v54  ;;  %v2134_v19 = vsel %vm453_vm4, %v2129_v31, 0 }
 0xe0e   :  { %v1898_v23 = vmul.f32 1.442695, %v1897_v50 }
 0xe10   :  { %2320 = vmax.xlane.f32.xlu0 %v2319_v20  ;;  %3947 = vpow2.f32 %v1898_v23  ;;  %v1906_v20 = vsel %vm427_vm5, %v4644_v14, 0.0  ;;  %v3871_v14 = vld [vmem:[%s4871_s3 + $0x84] ss:$16 sps:$4 sm:$0xff]  }
 0xe11   :  { %v3872_v23 = vld [vmem:[%s4871_s3 + $0xc4] ss:$16 sps:$4 sm:$0xff]  }
 0xe14   :  { %2323 = vmax.xlane.f32.xlu0 %v2322_v60 }
 0xe18   :  { %2536 = vmax.xlane.f32.xlu0 %v2535_v22 }
 0xe1a   :  { %v4666_v18 = vpop.eup %3947 }
 0xe1b   :  { %v1903_v17 = vsel %vm334_vm3, %v4666_v18, 0.0 }
 0xe2e   :  { %2341 = vrot.lane.b32.xlu0 %v4556_v43, %s4013_s16  ;;  %v1910_v43 = vpack.c.bf16 %v4666_v18, %v4666_v18 }
 0xe5c   :  { %v2108_v40 = vpop.xlane.xlu0 %2107 }
 0xe68   :  { %v2111_v25 = vpop.xlane.xlu0 %2110 }
 0xe69   :  { %v2112_v26 = vmax.f32 %v2108_v40, %v2111_v25  ;;  %v3873_v25 = vld [vmem:[%s4871_s3 + $0xa4] ss:$16 sps:$4 sm:$0xff]  }
 0xe6b   :  { %v2113_v27 = vsub.f32 %v4626_v28, %v2112_v26  ;;  %v2116_v29 = vsub.f32 %v4631_v35, %v2112_v26 }
 0xe6c   :  { %v1963_v30 = vpop.permute.xlu0 %1962 }
 0xe6d   :  { %v2114_v11 = vmul.f32 1.442695, %v2113_v27  ;;  %v2117_v8 = vmul.f32 1.442695, %v2116_v29  ;;  %3661 = vmatpush3.bf16.msra.mxu1 %v1963_v30 }
 0xe6e   :  { %3678 = vmatprep.subr.bf16.mxu1 %v4005_v1 }
 0xe6f   :  { %3949 = vpow2.f32 %v2114_v11 }
 0xe70   :  { %3951 = vpow2.f32 %v2117_v8  ;;  %3663 = vmatmul.mubr.msk.bf16.vlgmr.msra.gmra.mrb[36].mxu1 %vm334_vm3, %v1910_v43 }
 0xe71   :  { %3679 = vmatpush3.bf16.msra.mxu1 %v2134_v19  ;;  %3680 = vmatprep.mubr.msk.bf16.mxu1 %vm4006_vm0, %v4005_v1 }
 0xe72   :  { %3684 = vmatprep.subr.bf16.mxu1 %v4005_v1 }
 0xe79   :  { %v3950_v28 = vpop.eup %3949 }
 0xe7a   :  { %v3952_v34 = vpop.eup %3951  ;;  %v2119_v35 = vsel %vm334_vm3, %v3950_v28, 0.0  ;;  %v2126_v33 = vpack.c.bf16 %v3950_v28, %v3950_v28 }
 0xe7b   :  { %2120 = vadd.xlane.f32.xlu1 %v2119_v35  ;;  %v2122_v37 = vsel %vm427_vm5, %v3952_v34, 0.0  ;;  %v2127_v32 = vpack.c.bf16 %v3952_v34, %v3952_v34 }
 0xe7c   :  { %2123 = vadd.xlane.f32.xlu0 %v2122_v37 }
 0xe7d   :  { %3681 = vmatmul.mubr.msk.bf16.vlgmr.msra.gmra.mrb[40].mxu1 %vm427_vm5, %v2127_v32 }
 0xe7e   :  { %3685 = vmatpush3.bf16.msra.mxu1 %v2177_v24  ;;  %3686 = vmatprep.mubr.msk.bf16.mxu1 %vm4006_vm0, %v4005_v1 }
 0xe7f   :  { %3702 = vmatprep.subr.bf16.mxu1 %v4005_v1 }
 0xe80   :  { %v2534_v44 = vpop.xlane.xlu1 %2533 }
 0xe89   :  { %3687 = vmatmul.mubr.msk.bf16.vlgmr.msra.gmra.mrb[40].mxu1 %vm334_vm3, %v2126_v33 }
 0xe8a   :  { %3704 = vmatprep.mubr.msk.bf16.mxu1 %vm4006_vm0, %v4005_v1 }
 0xe9d   :  { %v2321_v13 = vpop.xlane.xlu0 %2320 }
 0xea1   :  { %v2324_v38 = vpop.xlane.xlu0 %2323 }
 0xea2   :  { %v2325_v39 = vmax.f32 %v2321_v13, %v2324_v38 }
 0xea4   :  { %v2326_v41 = vsub.f32 %v2269_v16, %v2325_v39  ;;  %v2329_v42 = vsub.f32 %v2314_v53, %v2325_v39 }
 0xea5   :  { %v2537_v45 = vpop.xlane.xlu0 %2536 }
 0xea6   :  { %v2327_v59 = vmul.f32 1.442695, %v2326_v41  ;;  %v2330_v6 = vmul.f32 1.442695, %v2329_v42  ;;  %v2538_v4 = vmax.f32 %v2534_v44, %v2537_v45 }
 0xea8   :  { %3953 = vpow2.f32 %v2327_v59  ;;  %v2539_v63 = vsub.f32 %v4638_v46, %v2538_v4  ;;  %v2542_v47 = vsub.f32 %v2527_v10, %v2538_v4  ;;  %v2390_v46 = vpop.permute.xlu1 %2389 }
 0xea9   :  { %3955 = vpow2.f32 %v2330_v6  ;;  %v2342_v49 = vpop.permute.xlu0 %2341 }
 0xeaa   :  { %v2540_v51 = vmul.f32 1.442695, %v2539_v63  ;;  %v2543_v52 = vmul.f32 1.442695, %v2542_v47  ;;  %v2347_v54 = vsel %vm453_vm4, %v2342_v49, 0 }
 0xeab   :  { %3703 = vmatpush3.bf16.msra.mxu1 %v2347_v54 }
 0xeac   :  { %3957 = vpow2.f32 %v2540_v51  ;;  %3708 = vmatprep.subr.bf16.mxu1 %v4005_v1  ;;  %v2555_v53 = vpop.permute.xlu1 %2554 }
 0xead   :  { %3959 = vpow2.f32 %v2543_v52  ;;  %v2560_v60 = vsel %vm453_vm4, %v2555_v53, 0  ;;  %v3874_v52 = vld [vmem:[%s4871_s3 + $0xe4] ss:$16 sps:$4 sm:$0xff]  }
 0xeb0   :  { %v2603_v50 = vpop.permute.xlu1 %2602 }
 0xeb2   :  { %v3954_v55 = vpop.eup %3953 }
 0xeb3   :  { %v3956_v56 = vpop.eup %3955  ;;  %v2332_v57 = vsel %vm334_vm3, %v3954_v55, 0.0  ;;  %v2339_v10 = vpack.c.bf16 %v3954_v55, %v3954_v55 }
 0xeb4   :  { %2333 = vadd.xlane.f32.xlu0 %v2332_v57  ;;  %v2340_v62 = vpack.c.bf16 %v3956_v56, %v3956_v56  ;;  %v2335_v3 = vsel %vm427_vm5, %v3956_v56, 0.0 }
 0xeb6   :  { %v3958_v2 = vpop.eup %3957  ;;  %3705 = vmatmul.mubr.msk.bf16.vlgmr.msra.gmra.mrb[44].mxu1 %vm427_vm5, %v2340_v62 }
 0xeb7   :  { %3709 = vmatpush3.bf16.msra.mxu1 %v2390_v46  ;;  %v2545_v7 = vsel %vm334_vm3, %v3958_v2, 0.0  ;;  %3710 = vmatprep.mubr.msk.bf16.mxu1 %vm4006_vm0, %v4005_v1  ;;  %v3960_v15 = vpop.eup %3959  ;;  %v2552_v40 = vpack.c.bf16 %v3958_v2, %v3958_v2 }
 0xeb8   :  { %2336 = vadd.xlane.f32.xlu0 %v2335_v3  ;;  %2546 = vadd.xlane.f32.xlu1 %v2545_v7  ;;  %v2548_v16 = vsel %vm427_vm5, %v3960_v15, 0.0  ;;  %v2553_v22 = vpack.c.bf16 %v3960_v15, %v3960_v15 }
 0xeb9   :  { %3726 = vmatprep.subr.bf16.mxu1 %v4005_v1 }
 0xebc   :  { %2549 = vadd.xlane.f32.xlu0 %v2548_v16  ;;  %1904 = vadd.xlane.f32.xlu1 %v1903_v17 }
 0xec0   :  { %1907 = vadd.xlane.f32.xlu0 %v1906_v20 }
 0xec2   :  { %3711 = vmatmul.mubr.msk.bf16.vlgmr.msra.gmra.mrb[44].mxu1 %vm334_vm3, %v2339_v10 }
 0xec3   :  { %3727 = vmatpush3.bf16.msra.mxu1 %v2560_v60  ;;  %3728 = vmatprep.mubr.msk.bf16.mxu1 %vm4006_vm0, %v4005_v1 }
 0xec4   :  { %3732 = vmatprep.subr.bf16.mxu1 %v4005_v1 }
 0xeca   :  { %3729 = vmatmul.mubr.msk.bf16.vlgmr.msra.gmra.mrb[48].mxu1 %vm427_vm5, %v2553_v22 }
 0xecb   :  { %3733 = vmatpush3.bf16.msra.mxu1 %v2603_v50  ;;  %3734 = vmatprep.mubr.msk.bf16.mxu1 %vm4006_vm0, %v4005_v1 }
 0xecd   :  { %2694 = vrot.lane.b32.xlu1 %v3871_v14, %s4011_s10 }
 0xed1   :  { %2698 = vrot.lane.b32.xlu1 %v3872_v23, %s4011_s10 }
 0xed6   :  { %3735 = vmatmul.mubr.msk.bf16.vlgmr.msra.gmra.mrb[48].mxu1 %vm334_vm3, %v2552_v40  ;;  %2696 = vrot.lane.b32.xlu0 %v3873_v25, %s4011_s10 }
 0xed7   :  { %2857 = vmatprep.mubr.bf16.mxu1 %v4007_v48 }
 0xf08   :  { %v2121_v18 = vpop.xlane.xlu1 %2120 }
 0xf09   :  { %v2124_v26 = vpop.xlane.xlu0 %2123 }
 0xf0a   :  { %v2125_v48 = vadd.f32 %v2124_v26, %v2121_v18 }
 0xf41   :  { %v2334_v27 = vpop.xlane.xlu0 %2333 }
 0xf43   :  { %v2002_v29 = vpop.f32.mrb[36].mxu1 }
 0xf44   :  { %v3664_v30 = vpop.f32.mrb[37].mxu1 }
 0xf45   :  { %v2547_v31 = vpop.xlane.xlu1 %2546  ;;  %v2337_v11 = vpop.xlane.xlu0 %2336  ;;  %v3875_v30 = vld [vmem:[%s4871_s3 + $0x88] ss:$16 sps:$4 sm:$0xff]  }
 0xf46   :  { %v2005_v8 = vpop.f32.mrb[38].mxu1  ;;  %v2338_v44 = vadd.f32 %v2337_v11, %v2334_v27  ;;  %v3878_v11 = vld [vmem:[%s4871_s3 + $0xa8] ss:$16 sps:$4 sm:$0xff]  }
 0xf47   :  { %v3665_v43 = vpop.f32.mrb[39].mxu1  ;;  %v3883_v8 = vld [vmem:[%s4871_s3 + $0xcc] ss:$16 sps:$4 sm:$0xff]  }
 0xf48   :  { %v3881_v43 = vld [vmem:[%s4871_s3 + $0xc8] ss:$16 sps:$4 sm:$0xff]  }
 0xf49   :  { %v1905_v19 = vpop.xlane.xlu1 %1904  ;;  %v2550_v28 = vpop.xlane.xlu0 %2549 }
 0xf4a   :  { %v2551_v54 = vadd.f32 %v2550_v28, %v2547_v31  ;;  %v3880_v31 = vld [vmem:[%s4871_s3 + $0xac] ss:$16 sps:$4 sm:$0xff]  }
 0xf4b   :  { %v3886_v28 = vld [vmem:[%s4871_s3 + $0xec] ss:$16 sps:$4 sm:$0xff]  }
 0xf4d   :  { %v1908_v34 = vpop.xlane.xlu0 %1907  ;;  %v2695_v35 = vpop.permute.xlu1 %2694 }
 0xf4e   :  { %v1909_v37 = vadd.f32 %v1908_v34, %v1905_v19  ;;  %3739 = vmatpush3.bf16.msra.mxu0 %v2695_v35  ;;  %v3884_v19 = vld [vmem:[%s4871_s3 + $0xe8] ss:$16 sps:$4 sm:$0xff]   ;;  %v3887_v34 = vld [vmem:[%s4872_s4 + $0xc0] sm:$0xff]  }
 0xf4f   :  { %3740 = vmatprep.subr.bf16.mxu0 %v4005_v1  ;;  %v3888_v35 = vld [vmem:[%s4872_s4 + $0x80] sm:$0xff]  }
 0xf50   :  { %3961 = vrcp.f32 %v1909_v37 }
 0xf51   :  { %3963 = vrcp.f32 %v2125_v48  ;;  %v2697_v45 = vpop.permute.xlu0 %2696  ;;  %v2699_v59 = vpop.permute.xlu1 %2698 }
 0xf52   :  { %3965 = vrcp.f32 %v2338_v44  ;;  %3741 = vmatpush3.bf16.msra.mxu0 %v2697_v45  ;;  %v3889_v44 = vld [vmem:[%s4872_s4 + $0xc8] sm:$0xff]   ;;  %v3893_v45 = vld [vmem:[%s4872_s4 + $0xd8] sm:$0xff]  }
 0xf53   :  { %3742 = vmatprep.subr.bf16.mxu0 %v4005_v1  ;;  %3967 = vrcp.f32 %v2551_v54  ;;  %v3902_v54 = vld [vmem:[%s4872_s4 + $0xb8] sm:$0xff]  }
 0xf56   :  { %3743 = vmatpush3.bf16.msra.mxu0 %v2699_v59  ;;  %v3894_v59 = vld [vmem:[%s4872_s4 + $0x98] sm:$0xff]  }
 0xf57   :  { %3744 = vmatprep.subr.bf16.mxu0 %v4005_v1 }
 0xf5a   :  { %v3962_v32 = vpop.eup %3961 }
 0xf5b   :  { %v2009_v24 = vmul.f32 %v3962_v32, %v2002_v29  ;;  %v3964_v33 = vpop.eup %3963 }
 0xf5c   :  { %v2216_v13 = vpop.f32.mrb[40].mxu1  ;;  %v3966_v6 = vpop.eup %3965 }
 0xf5d   :  { %v2223_v38 = vmul.f32 %v3964_v33, %v2216_v13  ;;  %v3688_v39 = vpop.f32.mrb[41].mxu1  ;;  %v3968_v55 = vpop.eup %3967 }
 0xf5e   :  { %v2219_v41 = vpop.f32.mrb[42].mxu1 }
 0xf5f   :  { %2651 = vrot.lane.b32.xlu1 %v2223_v38, %s4014_s17  ;;  %v3689_v42 = vpop.f32.mrb[43].mxu1  ;;  %v2771_v38 = vrot.slane %v4545_v36, %v159_v0  ;;  %v3891_v0 = vld [vmem:[%s4872_s4 + $0xd0] sm:$0xff]  }
 0xf95   :  { %v2429_v4 = vpop.f32.mrb[44].mxu1 }
 0xf96   :  { %v2436_v63 = vmul.f32 %v3966_v6, %v2429_v4  ;;  %v3712_v47 = vpop.f32.mrb[45].mxu1  ;;  %v3895_v6 = vld [vmem:[%s4872_s4 + $0xe0] sm:$0xff]  }
 0xf97   :  { %v2432_v49 = vpop.f32.mrb[46].mxu1  ;;  %v3896_v4 = vld [vmem:[%s4872_s4 + $0xa0] sm:$0xff]   ;;  %v3898_v47 = vld [vmem:[%s4872_s4 + $0xa8] sm:$0xff]  }
 0xf98   :  { %2655 = vrot.lane.b32.xlu1 %v2436_v63, %s4013_s16  ;;  %v3713_v51 = vpop.f32.mrb[47].mxu1  ;;  %v3897_v63 = vld [vmem:[%s4872_s4 + $0xe8] sm:$0xff]   ;;  %v3899_v49 = vld [vmem:[%s4872_s4 + $0xf0] sm:$0xff]  }
 0xf99   :  { %v3900_v51 = vld [vmem:[%s4872_s4 + $0xb0] sm:$0xff]  }
 0xf9c   :  { %2700 = vrot.lane.b32.xlu1 %v3874_v52, %s4011_s10  ;;  %v3901_v52 = vld [vmem:[%s4872_s4 + $0xf8] sm:$0xff]  }
 0xfa9   :  { %v2642_v56 = vpop.f32.mrb[48].mxu1 }
 0xfaa   :  { %v2649_v57 = vmul.f32 %v3968_v55, %v2642_v56  ;;  %v3736_v62 = vpop.f32.mrb[49].mxu1  ;;  %v3903_v55 = vld [vmem:[%s4870_s2 + $0x10] sm:$0xff]   ;;  %v3904_v56 = vld [vmem:[%s4870_s2 + $0x18] sm:$0xff]  }
 0xfab   :  { %v2645_v2 = vpop.f32.mrb[50].mxu1 }
 0xfac   :  { %2659 = vrot.lane.b32.xlu0 %v2649_v57, %s4012_s15  ;;  %v3737_v46 = vpop.f32.mrb[51].mxu1 }
 0xfd1   :  { %v2652_v3 = vpop.permute.xlu1 %2651 }
 0xfd2   :  { %v2662_v16 = vsel %vm334_vm3, %v2009_v24, %v2652_v3  ;;  %v2766_v24 = vrot.slane %v4545_v36, %v154_v61  ;;  %v3890_v61 = vld [vmem:[%s4872_s4 + $0x88] sm:$0xff]   ;;  %v3892_v36 = vld [vmem:[%s4872_s4 + $0x90] sm:$0xff]  }
0x100a   :  { %v2656_v7 = vpop.permute.xlu1 %2655 }
0x100b   :  { %v2663_v17 = vsel %vm52_vm1, %v2662_v16, %v2656_v7 }
0x100e   :  { %v2701_v15 = vpop.permute.xlu1 %2700 }
0x100f   :  { %3745 = vmatpush3.bf16.msra.mxu0 %v2701_v15 }
0x1010   :  { %3475 = vmatprep.subr.bf16.mxu0 %v3887_v34 }
0x101e   :  { %v2660_v53 = vpop.permute.xlu0 %2659 }
0x101f   :  { %v2664_v20 = vsel %vm1200_vm6, %v2663_v17, %v2660_v53 }
0x1020   :  { %v2665_v10 = vpack.c.bf16 %v2664_v20, %v2664_v20 }
0x1022   :  { %3747 = vmatmul.mubr.msk.bf16.vlgmr.msra.gmra.mrb[76].mxu0 %vm98_vm2, %v2665_v10 }
0x1023   :  { %3476 = vmatpush3.bf16.msra.mxu0 %v3888_v35 }
0x1024   :  { %3477 = vmatprep.subr.bf16.mxu0 %v3889_v44 }
0x1027   :  { %3478 = vmatpush3.bf16.msra.mxu0 %v3890_v61 }
0x1028   :  { %3479 = vmatprep.subr.bf16.mxu0 %v3891_v0 }
0x102b   :  { %3480 = vmatpush3.bf16.msra.mxu0 %v3892_v36 }
0x102c   :  { %3481 = vmatprep.subr.bf16.mxu0 %v3893_v45 }
0x102f   :  { %3482 = vmatpush3.bf16.msra.mxu0 %v3894_v59 }
0x1030   :  { %3483 = vmatprep.subr.bf16.mxu0 %v3895_v6 }
0x1033   :  { %3484 = vmatpush3.bf16.msra.mxu0 %v3896_v4 }
0x1034   :  { %3485 = vmatprep.subr.bf16.mxu0 %v3897_v63 }
0x1037   :  { %3486 = vmatpush3.bf16.msra.mxu0 %v3898_v47 }
0x1038   :  { %3487 = vmatprep.subr.bf16.mxu0 %v3899_v49 }
0x103b   :  { %3488 = vmatpush3.bf16.msra.mxu0 %v3900_v51 }
0x103c   :  { %3489 = vmatprep.subr.bf16.mxu0 %v3901_v52 }
0x103f   :  { %3490 = vmatpush3.bf16.msra.mxu0 %v3902_v54 }
0x10f5   :  { %v2743_v60 = vpop.f32.mrb[76].mxu0 }
0x10f6   :  { %v4739_v22 = vadd.f32 %v2743_v60, %v4509_v21  ;;  %v3748_v50 = vpop.f32.mrb[77].mxu0  ;;  %v3877_v21 = vld [vmem:[%s4871_s3 + $0x8c] ss:$16 sps:$4 sm:$0xff]  }
0x10f7   :  { %v2746_v14 = vpop.f32.mrb[78].mxu0  ;;  %2825 = vmatprep.subr.bf16.mxu1 %v3877_v21 }
0x10f8   :  { %v3749_v23 = vpop.f32.mrb[79].mxu0  ;;  %v2750_v40 = vsel %vm98_vm2, %v4739_v22, 0.0  ;;  %2826 = vmatpush1.bf16.msra.mxu1 %v3875_v30 }
0x10f9   :  { %2751 = vadd.xlane.f32.xlu0 %v2750_v40  ;;  %2827 = vmatprep.subr.bf16.mxu1 %v3880_v31  ;;  %v3905_v31 = vld [vmem:[%s4870_s2 + $0x20] sm:$0xff]  }
0x10fc   :  { %2828 = vmatpush1.bf16.msra.mxu1 %v3878_v11  ;;  %v3906_v11 = vld [vmem:[%s4870_s2 + $0x28] sm:$0xff]   ;;  %s4015_s2 = smov [#allocation2]  }
0x10fd   :  { %2829 = vmatprep.subr.bf16.mxu1 %v3883_v8 }
0x1100   :  { %2830 = vmatpush1.bf16.msra.mxu1 %v3881_v43 }
0x1101   :  { %2831 = vmatprep.subr.bf16.mxu1 %v3886_v28 }
0x1104   :  { %2832 = vmatpush1.bf16.msra.mxu1 %v3884_v19 }
0x1105   :  { %3750 = vmatprep.subr.bf16.mxu1 %v4005_v1 }
0x1186   :  { %v2752_v25 = vpop.xlane.xlu0 %2751 }
0x1187   :  { %v2753_v26 = vmul.f32 0.015625, %v2752_v25 }
0x1189   :  { %v2754_v18 = vsub.f32 %v4739_v22, %v2753_v26 }
0x118b   :  { %v2755_v27 = vmul.f32 %v2754_v18, %v2754_v18 }
0x118d   :  { %v2756_v29 = vsel %vm98_vm2, %v2755_v27, 0.0 }
0x118e   :  { %2757 = vadd.xlane.f32.xlu1 %v2756_v29 }
0x121b   :  { %v2758_v48 = vpop.xlane.xlu1 %2757 }
0x121c   :  { %v2759_v37 = vmul.f32 0.015625, %v2758_v48 }
0x121e   :  { %v2760_v32 = vadd.f32 1e-05, %v2759_v37  ;;  %v3980_v37 = vld [vmem:[%s4873_s5] sm:$0xff]  ;;  %s3166_s5 = sshll.u32 %s4015_s2, 4  ;;  %s3167_s5 = int_to_ptr.vmem [resolvable:$true] %s3166_s5 }
0x121f   :  { %v3157_v4 = vrot.slane %v3980_v37, %v1600_v5  ;;  %s3981_s7 = scalar_lea.vmem %s3167_s5, 128  ;;  %p3986_p1 = scmp.lt.s32.totalorder %s3167_s5, %s3167_s5 }
0x1220   :  { %3969 = vrsqrt.f32 %v2760_v32  ;;  %p3982_p0 = scmp.ne.s32.totalorder %s3167_s5, %s3981_s7  ;;  %p3987_p2 = scmp.lt.s32.totalorder %s3981_s7, %s3981_s7 }
0x1222   :  { %p3988_p3 = por %p3987_p2, %p3986_p1 }
0x1224   :  { %p3989_p4 = pnand %p3988_p3, %p3982_p0 }
0x122a   :  { %v3970_v33 = vpop.eup %3969 }
0x122b   :  { %v2762_v13 = vmul.f32 %v3970_v33, %v2754_v18 }
0x122d   :  { %v2767_v39 = vmul.f32 %v2766_v24, %v2762_v13 }
0x122f   :  { %v2772_v41 = vadd.f32 %v2771_v38, %v2767_v39 }
0x1231   :  { %v2773_v42 = vpack.c.bf16 %v2772_v41, %v2772_v41 }
0x1233   :  { %3312 = vmatmul.mubr.msk.bf16.vlgmr.msra.gmra.mrb[52].mxu1 %vm98_vm2, %v2773_v42 }
0x1234   :  { %3758 = vmatprep.mubr.msk.bf16.mxu1 %vm4006_vm0, %v4005_v1  ;;  %3751 = vmatpush3.bf16.msra.mxu1 %v3903_v55 }
0x1235   :  { %3752 = vmatprep.subr.bf16.mxu1 %v4005_v1 }
0x1238   :  { %3753 = vmatpush3.bf16.msra.mxu1 %v3904_v56 }
0x1239   :  { %3754 = vmatprep.subr.bf16.mxu1 %v4005_v1 }
0x123c   :  { %3755 = vmatpush3.bf16.msra.mxu1 %v3905_v31 }
0x123d   :  { %3756 = vmatprep.subr.bf16.mxu1 %v4005_v1  ;;  %v3068_v1 = vrot.slane %v3980_v37, %v1307_v12  ;;  %v3152_v12 = vrot.slane %v3980_v37, %v1594_v58 }
0x1240   :  { %3757 = vmatpush3.bf16.msra.mxu1 %v3906_v11 }
0x1306   :  { %v2859_v57 = vpop.f32.mrb[52].mxu1 }
0x1307   :  { %v2868_v62 = vmul.f32 %v2859_v57, %v2859_v57  ;;  %v2861_v2 = vpop.f32.mrb[53].mxu1  ;;  %v2866_v40 = vmul.f32 0.5, %v2859_v57 }
0x1308   :  { %v2869_v46 = vmul.f32 %v2861_v2, %v2861_v2  ;;  %v2863_v3 = vpop.f32.mrb[54].mxu1  ;;  %v2867_v26 = vmul.f32 0.5, %v2861_v2 }
0x1309   :  { %v2870_v7 = vmul.f32 %v2868_v62, %v2859_v57  ;;  %v2864_v15 = vpop.f32.mrb[55].mxu1 }
0x130a   :  { %v2871_v16 = vmul.f32 %v2869_v46, %v2861_v2 }
0x130b   :  { %v2872_v17 = vmul.f32 0.044715, %v2870_v7 }
0x130c   :  { %v2873_v53 = vmul.f32 0.044715, %v2871_v16 }
0x130d   :  { %v2874_v20 = vadd.f32 %v2872_v17, %v2859_v57 }
0x130e   :  { %v2875_v10 = vadd.f32 %v2873_v53, %v2861_v2 }
0x130f   :  { %v2876_v60 = vmul.f32 0.7978846, %v2874_v20 }
0x1310   :  { %v2877_v50 = vmul.f32 0.7978846, %v2875_v10 }
0x1311   :  { %3971 = vtanh.f32 %v2876_v60 }
0x1312   :  { %3973 = vtanh.f32 %v2877_v50 }
0x131b   :  { %v3972_v14 = vpop.eup %3971 }
0x131c   :  { %v3974_v23 = vpop.eup %3973  ;;  %v2880_v25 = vadd.f32 1.0, %v3972_v14 }
0x131d   :  { %v2881_v18 = vadd.f32 1.0, %v3974_v23 }
0x131e   :  { %v2882_v27 = vmul.f32 %v2880_v25, %v2866_v40 }
0x131f   :  { %v2883_v29 = vmul.f32 %v2881_v18, %v2867_v26 }
0x1320   :  { %v2884_v30 = vpack.c.bf16 %v2882_v27, %v2882_v27 }
0x1321   :  { %v2885_v21 = vpack.c.bf16 %v2883_v29, %v2883_v29 }
0x1323   :  { %3047 = vmatprep.mubr.bf16.mxu0 %v2885_v21 }
0x1324   :  { %3048 = vmatmul.mubr.bf16.vlgmr.msra.gmra.mrb[80].mxu0 %v2884_v30 }
0x13f7   :  { %v3491_v8 = vpop.f32.mrb[80].mxu0 }
0x13f8   :  { %v3492_v43 = vpop.f32.mrb[81].mxu0 }
0x13f9   :  { %v3493_v19 = vadd.f32 %v3492_v43, %v3491_v8  ;;  %v3494_v28 = vpop.f32.mrb[82].mxu0 }
0x13fa   :  { %v3495_v34 = vpop.f32.mrb[83].mxu0 }
0x13fb   :  { %v3055_v35 = vadd.f32 %v3493_v19, %v4739_v22 }
0x13fd   :  { %v3056_v48 = vpack.c.bf16 %v3055_v35, %v3055_v35 }
0x13ff   :  { %3759 = vmatmul.mubr.msk.bf16.vlgmr.msra.gmra.mrb[56].mxu1 %vm98_vm2, %v3056_v48 }
0x14d2   :  { %v3130_v32 = vpop.f32.mrb[56].mxu1 }
0x14d3   :  { %v3131_v24 = vadd.f32 %v3130_v32, %v3068_v1  ;;  %v3760_v33 = vpop.f32.mrb[57].mxu1 }
0x14d4   :  { %v3133_v13 = vpop.f32.mrb[58].mxu1 }
0x14d5   :  { %v3761_v38 = vpop.f32.mrb[59].mxu1  ;;  %v3136_v39 = vsel %vm98_vm2, %v3131_v24, 0.0 }
0x14d6   :  { %3137 = vadd.xlane.f32.xlu0 %v3136_v39 }
0x1563   :  { %v3138_v41 = vpop.xlane.xlu0 %3137 }
0x1564   :  { %v3139_v22 = vmul.f32 0.015625, %v3138_v41 }
0x1566   :  { %v3140_v42 = vsub.f32 %v3131_v24, %v3139_v22 }
0x1568   :  { %v3141_v44 = vmul.f32 %v3140_v42, %v3140_v42 }
0x156a   :  { %v3142_v61 = vsel %vm98_vm2, %v3141_v44, 0.0 }
0x156b   :  { %3143 = vadd.xlane.f32.xlu0 %v3142_v61 }
0x15f8   :  { %v3144_v0 = vpop.xlane.xlu0 %3143 }
0x15f9   :  { %v3145_v36 = vmul.f32 0.015625, %v3144_v0 }
0x15fb   :  { %v3146_v45 = vadd.f32 1e-05, %v3145_v36 }
0x15fd   :  { %3975 = vrsqrt.f32 %v3146_v45 }
0x1607   :  { %v3976_v59 = vpop.eup %3975 }
0x1608   :  { %v3148_v6 = vmul.f32 %v3976_v59, %v3140_v42 }
0x160a   :  { %v3153_v63 = vmul.f32 %v3152_v12, %v3148_v6 }
0x160c   :  { %v3158_v47 = vadd.f32 %v3157_v4, %v3153_v63 }
0x160e   :  { %3159 = vst.msk [vmem:[#allocation2] sm:$0xff] %vm98_vm2, %v3158_v47 }
0x160f   :  { %3992 = shalt.err (!%p3989_p4)
}
0x1610   :  { %s3993_s13 = scalar_lea.hbm %s4874_s6, 128 }
0x1611   :  { %p3994_p5 = scmp.ne.s32.totalorder %s4874_s6, %s3993_s13  ;;  %p3997_p6 = scmp.lt.u32.totalorder %s3993_s13, %s4874_s6 }
0x1613   :  { %p3999_p7 = pnand %p3997_p6, %p3994_p5 }
0x1615   :  { %4002 = shalt.err (!%p3999_p7)
}
0x1616   :  { %3169 = dma.vmem_to_hbm [thread:$0]  %s3167_s5, 128, %s4874_s6, [#allocation3]  }
0x1617   :  { %4003 = dma.done.wait [#allocation3], 128  }
0x1618   :  { %4004 = vsyncadd [#allocation3], 4294967168 }
0x1619   :  { %3173 = vsyncpa [#allocation3], 1 }

</bundles_post_ra>
